<compile_context>
chip_gen: v6e
topology: v6e:2x2x1
jax: 0.10.0
libtpu: 0.0.40
codegen_flags: <defaults>
</compile_context>

<pallas_src>
import functools
import math

import numpy as np
import jax
import jax.numpy as jnp
from jax import lax
from jax.experimental import pallas as pl
from jax.experimental.pallas import tpu as pltpu


# ----------------------------- in-kernel helpers -----------------------------

def _erf(x):
    # Abramowitz & Stegun 7.1.26, max abs error ~1.5e-7 (exact reciprocal keeps the bound).
    a1, a2, a3, a4, a5 = 0.254829592, -0.284496736, 1.421413741, -1.453152027, 1.061405429
    p = 0.3275911
    s = jnp.where(x >= 0.0, 1.0, -1.0)
    z = jnp.abs(x)
    t = 1.0 / (1.0 + p * z)
    poly = ((((a5 * t + a4) * t + a3) * t + a2) * t + a1) * t
    return s * (1.0 - poly * jnp.exp(-z * z))


def _gelu(x):
    # PyTorch nn.GELU() default (approximate='none'): exact-erf formulation.
    return 0.5 * x * (1.0 + _erf(x * (1.0 / math.sqrt(2.0))))


# ---------------------------------- kernel ----------------------------------

def fused_kernel(x_ref, wconv_ref, agrp_ref, mpoolT_ref, wqkv_ref, bqkv_ref,
                 wproj_ref, mupT_ref, pvec_ref, out_ref, *, num_heads, scale, W):
    """Per batch element, channel-major layout (C rows on sublanes, HW / N on lanes)."""
    C, HW = x_ref.shape
    hd = C // num_heads
    N = mpoolT_ref.shape[1]

    # packed per-channel parameter vectors: columns =
    # [conv_b, gn_g, gn_b, proj_b, lnsa_g, lnsa_b, lnfc_g, lnfc_b]
    pvec = pvec_ref[...]
    bconv, gn_g, gn_b, bproj = pvec[:, 0:1], pvec[:, 1:2], pvec[:, 2:3], pvec[:, 3:4]
    lnsa_g, lnsa_b, lnfc_g, lnfc_b = pvec[:, 4:5], pvec[:, 5:6], pvec[:, 6:7], pvec[:, 7:8]

    x = x_ref[...]                                                          # (C, HW) f32

    # ---- in-kernel im2col: 9 shifted + boundary-masked copies of x (lane-axis rolls) ----
    lane = lax.broadcasted_iota(jnp.int32, (C, HW), 1)
    if (W & (W - 1)) == 0:
        w_idx = jnp.bitwise_and(lane, W - 1)          # column index, power-of-two fast path
    else:
        w_idx = lax.rem(lane, W)                      # general fallback
    taps = []
    for dy in (0, 1, 2):
        for dx in (0, 1, 2):
            s = (dy - 1) * W + (dx - 1)               # lane shift for tap (dy, dx)
            t = x if s == 0 else pltpu.roll(x, shift=(-s) % HW, axis=1)
            mask = None
            if dy == 0:                               # needs x[h-1] -> invalid at h == 0
                mask = lane >= W
            elif dy == 2:                             # needs x[h+1] -> invalid at h == H-1
                mask = lane < (HW - W)
            if dx == 0:                               # needs x[w-1] -> invalid at w == 0
                m = w_idx != 0
                mask = m if mask is None else jnp.logical_and(mask, m)
            elif dx == 2:                             # needs x[w+1] -> invalid at w == W-1
                m = w_idx != (W - 1)
                mask = m if mask is None else jnp.logical_and(mask, m)
            if mask is not None:
                t = jnp.where(mask, t, 0.0)
            taps.append(t.astype(jnp.bfloat16))
    taps = jnp.concatenate(taps, axis=0)                                    # (9C, HW) bf16

    # ---- pre_conv: Conv3x3 as a single K=9C matmul + bias ----
    acc = jnp.dot(wconv_ref[...], taps,
                  preferred_element_type=jnp.float32) + bconv               # (C, HW) f32

    # ---- GroupNorm(16): one (C,C)@(C,2) stats matmul (one-pass variance), ReLU, residual ----
    ch_sum = jnp.sum(acc, axis=1, keepdims=True)                            # (C, 1)
    ch_sq = jnp.sum(acc * acc, axis=1, keepdims=True)                       # (C, 1)
    stats = jnp.dot(agrp_ref[...], jnp.concatenate([ch_sum, ch_sq], axis=1),
                    preferred_element_type=jnp.float32)                     # (C, 2), already /(cpg*HW)
    mean = stats[:, 0:1]
    var = stats[:, 1:2] - mean * mean
    y = (acc - mean) * lax.rsqrt(var + 1e-5) * gn_g + gn_b
    y = jnp.maximum(y, 0.0)                                                 # ReLU
    x0 = x + y                                                              # (C, HW) f32

    # ---- adaptive average pool (matmul with pooling matrix, f32 — tiny) ----
    xt = jnp.dot(x0, mpoolT_ref[...], preferred_element_type=jnp.float32)   # (C, N)

    # ---- fused Q/K/V projection: one (3C, C) @ (C, N) matmul ----
    qkv = jnp.dot(wqkv_ref[...], xt.astype(jnp.bfloat16),
                  preferred_element_type=jnp.float32) + bqkv_ref[...]       # (3C, N)

    # ---- MHSA via batched einsums (tile-aligned slices, no per-head relayouts) ----
    q = qkv[0 * C:1 * C].reshape(num_heads, hd, N)
    k = qkv[1 * C:2 * C].reshape(num_heads, hd, N)
    v = qkv[2 * C:3 * C].reshape(num_heads, hd, N)
    att = jnp.einsum('hdn,hdm->hnm', q, k,
                     preferred_element_type=jnp.float32) * scale            # (nh, N, N)
    att = att - jnp.max(att, axis=-1, keepdims=True)
    p = jnp.exp(att)
    p = p * pl.reciprocal(jnp.sum(p, axis=-1, keepdims=True), approx=True)
    attn_out = jnp.einsum('hdm,hnm->hdn', v, p,
                          preferred_element_type=jnp.float32).reshape(C, N)  # (C, N)

    # x = x + GELU(LayerNorm_sa(attn))   (LayerNorm over channel axis = axis 0 here)
    mu = jnp.mean(attn_out, axis=0, keepdims=True)
    d = attn_out - mu
    var1 = jnp.mean(d * d, axis=0, keepdims=True)
    ln1 = d * lax.rsqrt(var1 + 1e-5) * lnsa_g + lnsa_b
    x1 = xt + _gelu(ln1)

    # x = x + GELU(LayerNorm_fc(proj(x)))
    pr = jnp.dot(wproj_ref[...], x1.astype(jnp.bfloat16),
                 preferred_element_type=jnp.float32) + bproj                # (C, N)
    mu2 = jnp.mean(pr, axis=0, keepdims=True)
    d2 = pr - mu2
    var2 = jnp.mean(d2 * d2, axis=0, keepdims=True)
    ln2 = d2 * lax.rsqrt(var2 + 1e-5) * lnfc_g + lnfc_b
    x2 = x1 + _gelu(ln2)

    # bilinear upsample (matmul with interp matrix, f32) + residual -> lane-dense store
    up = jnp.dot(x2, mupT_ref[...], preferred_element_type=jnp.float32)     # (C, HW)
    out_ref[...] = x0 + up


# ------------------------------- host constants -------------------------------

def _pool_matrix(out_size, in_size):
    """Adaptive average pooling as a (out, in) matrix (PyTorch index rule)."""
    M = np.zeros((out_size, in_size), np.float32)
    for i in range(out_size):
        s = (i * in_size) // out_size
        e = -(-((i + 1) * in_size) // out_size)  # ceil
        M[i, s:e] = 1.0 / (e - s)
    return M


def _upsample_matrix(out_size, in_size):
    """Bilinear interpolation (align_corners=False) as a (out, in) matrix."""
    M = np.zeros((out_size, in_size), np.float32)
    scale = in_size / out_size
    for o in range(out_size):
        src = (o + 0.5) * scale - 0.5
        src = max(src, 0.0)
        i0 = min(int(np.floor(src)), in_size - 1)
        i1 = min(i0 + 1, in_size - 1)
        l1 = src - i0
        M[o, i0] += 1.0 - l1
        M[o, i1] += l1
    return M


@functools.lru_cache(maxsize=None)
def _pool_upsample_T(H, W, H2, W2):
    mpoolT = np.ascontiguousarray(np.kron(_pool_matrix(H2, H), _pool_matrix(W2, W)).T)
    mupT = np.ascontiguousarray(np.kron(_upsample_matrix(H, H2), _upsample_matrix(W, W2)).T)
    return mpoolT.astype(np.float32), mupT.astype(np.float32)


@functools.lru_cache(maxsize=None)
def _group_avg_matrix(C, groups, hw):
    """agrp[c, c'] = 1/(cpg*hw) if c and c' are in the same GroupNorm group."""
    cpg = C // groups
    a = np.zeros((C, C), np.float32)
    for c in range(C):
        g = c // cpg
        a[c, g * cpg:(g + 1) * cpg] = 1.0 / (cpg * hw)
    return a


# ------------------------------- params / wrapper -------------------------------

def init_params(key, dim, num_heads):
    """Deterministic synthetic init mirroring the module's shapes / _init_weights."""
    ks = jax.random.split(key, 4)
    p = {}
    p["wq"] = jax.random.normal(ks[0], (dim, dim), jnp.float32) * 0.02
    p["bq"] = jnp.zeros((dim,), jnp.float32)
    p["wkv"] = jax.random.normal(ks[1], (2 * dim, dim), jnp.float32) * 0.02
    p["bkv"] = jnp.zeros((2 * dim,), jnp.float32)
    p["wproj"] = jax.random.normal(ks[2], (dim, dim), jnp.float32) * 0.02
    p["bproj"] = jnp.zeros((dim,), jnp.float32)
    p["conv_w"] = jax.random.normal(ks[3], (dim, dim, 3, 3), jnp.float32) * math.sqrt(2.0 / (9 * dim))
    p["conv_b"] = jnp.zeros((dim,), jnp.float32)
    p["gn_g"] = jnp.ones((dim,), jnp.float32)
    p["gn_b"] = jnp.zeros((dim,), jnp.float32)
    p["lnsa_g"] = jnp.ones((dim,), jnp.float32)
    p["lnsa_b"] = jnp.zeros((dim,), jnp.float32)
    p["lnfc_g"] = jnp.ones((dim,), jnp.float32)
    p["lnfc_b"] = jnp.zeros((dim,), jnp.float32)
    return p


@functools.partial(jax.jit, static_argnames=("pool_size", "num_heads"))
def adaptive_pool_self_attention(x_nchw, params, pool_size=(7, 7), num_heads=8):
    B, C, H, W = x_nchw.shape
    H2, W2 = pool_size
    N = H2 * W2
    HW = H * W
    hd = C // num_heads
    scale = hd ** -0.5

    x_cm = x_nchw.astype(jnp.float32).reshape(B, C, HW)     # channel-major: (C rows, HW lanes)

    # conv weights: wconv[cout, (ky*3+kx)*C + cin] = conv_w[cout, cin, ky, kx]
    wconv = jnp.transpose(params["conv_w"], (0, 2, 3, 1)).reshape(C, 9 * C).astype(jnp.bfloat16)

    # GroupNorm(16) group-averaging matrix and pooling / upsample matrices (cached on host)
    agrp = jnp.asarray(_group_avg_matrix(C, 16, HW))                        # (C, C) f32
    mpoolT_np, mupT_np = _pool_upsample_T(H, W, H2, W2)
    mpoolT = jnp.asarray(mpoolT_np)                                         # (HW, N) f32
    mupT = jnp.asarray(mupT_np)                                             # (N, HW) f32

    # fused QKV weights: rows [Wq; Wk; Wv]  (PyTorch kv weight is already [Wk; Wv])
    wqkv = jnp.concatenate([params["wq"], params["wkv"]], axis=0).astype(jnp.bfloat16)  # (3C, C)
    bqkv = jnp.concatenate([params["bq"], params["bkv"]], axis=0).reshape(3 * C, 1)     # (3C, 1)
    wproj = params["wproj"].astype(jnp.bfloat16)                                        # (C, C)

    # packed per-channel parameter vectors (one DMA instead of eight tiny ones)
    pvec = jnp.stack([params["conv_b"], params["gn_g"], params["gn_b"], params["bproj"],
                      params["lnsa_g"], params["lnsa_b"], params["lnfc_g"], params["lnfc_b"]],
                     axis=1)                                                            # (C, 8)

    kernel = functools.partial(fused_kernel, num_heads=num_heads, scale=scale, W=W)
    out = pl.pallas_call(
        kernel,
        out_shape=jax.ShapeDtypeStruct((B, C, HW), jnp.float32),
        grid=(B,),
        in_specs=[
            pl.BlockSpec((None, C, HW), lambda b: (b, 0, 0)),     # x (residual + im2col source)
            pl.BlockSpec((C, 9 * C), lambda b: (0, 0)),           # conv weights (bf16)
            pl.BlockSpec((C, C), lambda b: (0, 0)),               # GroupNorm averaging matrix
            pl.BlockSpec((HW, N), lambda b: (0, 0)),              # pool matrix^T (f32)
            pl.BlockSpec((3 * C, C), lambda b: (0, 0)),           # fused QKV weights (bf16)
            pl.BlockSpec((3 * C, 1), lambda b: (0, 0)),           # fused QKV bias
            pl.BlockSpec((C, C), lambda b: (0, 0)),               # proj weights (bf16)
            pl.BlockSpec((N, HW), lambda b: (0, 0)),              # upsample matrix^T (f32)
            pl.BlockSpec((C, 8), lambda b: (0, 0)),               # packed per-channel params
        ],
        out_specs=pl.BlockSpec((None, C, HW), lambda b: (b, 0, 0)),
        compiler_params=pltpu.CompilerParams(dimension_semantics=("parallel",)),
    )(x_cm, wconv, agrp, mpoolT, wqkv, bqkv, wproj, mupT, pvec)

    # (B, C, HW) is already NCHW-flattened — no transpose needed.
    return out.reshape(B, C, H, W)


if __name__ == "__main__":
    B, C, H, W = 2, 32, 16, 16          # dim=32: divisible by num_heads=8 and GroupNorm groups=16
    num_heads = 8
    pool_size = (7, 7)

    key = jax.random.PRNGKey(0)
    kx, kp = jax.random.split(key)
    x = jax.random.normal(kx, (B, C, H, W), jnp.float32)
    params = init_params(kp, C, num_heads)

    out = adaptive_pool_self_attention(x, params, pool_size=pool_size, num_heads=num_heads)
    out = jax.block_until_ready(out)
    assert out.shape == (B, C, H, W), out.shape
    assert bool(jnp.all(jnp.isfinite(out)))
    print("KERNEL_OK")
</pallas_src>

<mosaic_0001>
module attributes {stable_mosaic.version = 11 : i64} {
  func.func @fused_kernel(%arg0: i32, %arg1: memref<1x32x256xf32, #tpu.memory_space<vmem>>, %arg2: memref<32x288xbf16, #tpu.memory_space<vmem>>, %arg3: memref<32x32xf32, #tpu.memory_space<vmem>>, %arg4: memref<256x49xf32, #tpu.memory_space<vmem>>, %arg5: memref<96x32xbf16, #tpu.memory_space<vmem>>, %arg6: memref<96x1xf32, #tpu.memory_space<vmem>>, %arg7: memref<32x32xbf16, #tpu.memory_space<vmem>>, %arg8: memref<49x256xf32, #tpu.memory_space<vmem>>, %arg9: memref<32x8xf32, #tpu.memory_space<vmem>>, %arg10: memref<1x32x256xf32, #tpu.memory_space<vmem>>) attributes {dimension_semantics = [#tpu.dimension_semantics<parallel>], iteration_bounds = array<i64: 2>, scalar_prefetch = 0 : i64, scratch_operands = 0 : i64, tpu.core_type = #tpu.core_type<tc>, window_params = [{transform_indices = @transform_0, window_bounds = array<i64: 1, 32, 256>}, {pipeline_mode = #tpu.pipeline_mode<synchronous>, transform_indices = @transform_1, window_bounds = array<i64: 32, 288>}, {pipeline_mode = #tpu.pipeline_mode<synchronous>, transform_indices = @transform_2, window_bounds = array<i64: 32, 32>}, {pipeline_mode = #tpu.pipeline_mode<synchronous>, transform_indices = @transform_3, window_bounds = array<i64: 256, 49>}, {pipeline_mode = #tpu.pipeline_mode<synchronous>, transform_indices = @transform_4, window_bounds = array<i64: 96, 32>}, {pipeline_mode = #tpu.pipeline_mode<synchronous>, transform_indices = @transform_5, window_bounds = array<i64: 96, 1>}, {pipeline_mode = #tpu.pipeline_mode<synchronous>, transform_indices = @transform_6, window_bounds = array<i64: 32, 32>}, {pipeline_mode = #tpu.pipeline_mode<synchronous>, transform_indices = @transform_7, window_bounds = array<i64: 49, 256>}, {pipeline_mode = #tpu.pipeline_mode<synchronous>, transform_indices = @transform_8, window_bounds = array<i64: 32, 8>}, {transform_indices = @transform_9, window_bounds = array<i64: 1, 32, 256>}]} {
    %c0 = arith.constant 0 : index
    %c0_0 = arith.constant 0 : index
    %0 = vector.load %arg9[%c0, %c0_0] : memref<32x8xf32, #tpu.memory_space<vmem>>, vector<32x8xf32>
    %1 = vector.extract_strided_slice %0 {offsets = [0, 0], sizes = [32, 1], strides = [1, 1]} : vector<32x8xf32> to vector<32x1xf32>
    %2 = vector.extract_strided_slice %0 {offsets = [0, 1], sizes = [32, 1], strides = [1, 1]} : vector<32x8xf32> to vector<32x1xf32>
    %3 = vector.extract_strided_slice %0 {offsets = [0, 2], sizes = [32, 1], strides = [1, 1]} : vector<32x8xf32> to vector<32x1xf32>
    %4 = vector.extract_strided_slice %0 {offsets = [0, 3], sizes = [32, 1], strides = [1, 1]} : vector<32x8xf32> to vector<32x1xf32>
    %5 = vector.extract_strided_slice %0 {offsets = [0, 4], sizes = [32, 1], strides = [1, 1]} : vector<32x8xf32> to vector<32x1xf32>
    %6 = vector.extract_strided_slice %0 {offsets = [0, 5], sizes = [32, 1], strides = [1, 1]} : vector<32x8xf32> to vector<32x1xf32>
    %7 = vector.extract_strided_slice %0 {offsets = [0, 6], sizes = [32, 1], strides = [1, 1]} : vector<32x8xf32> to vector<32x1xf32>
    %8 = vector.extract_strided_slice %0 {offsets = [0, 7], sizes = [32, 1], strides = [1, 1]} : vector<32x8xf32> to vector<32x1xf32>
    %c0_1 = arith.constant 0 : index
    %c0_2 = arith.constant 0 : index
    %c0_3 = arith.constant 0 : index
    %9 = vector.load %arg1[%c0_1, %c0_2, %c0_3] : memref<1x32x256xf32, #tpu.memory_space<vmem>>, vector<1x32x256xf32>
    %10 = vector.shape_cast %9 : vector<1x32x256xf32> to vector<32x256xf32>
    %11 = tpu.iota {dimensions = array<i32: 1>} : vector<32x256xi32>
    %c15_i32 = arith.constant 15 : i32
    %12 = vector.broadcast %c15_i32 : i32 to vector<32x256xi32>
    %13 = arith.andi %11, %12 : vector<32x256xi32>
    %c17_i32 = arith.constant 17 : i32
    %14 = tpu.dynamic_rotate %10 by %c17_i32 dim 1 : vector<32x256xf32>, i32 -> vector<32x256xf32>
    %c16_i32 = arith.constant 16 : i32
    %15 = vector.broadcast %c16_i32 : i32 to vector<32x256xi32>
    %16 = arith.cmpi sge, %11, %15 : vector<32x256xi32>
    %c0_i32 = arith.constant 0 : i32
    %17 = vector.broadcast %c0_i32 : i32 to vector<32x256xi32>
    %18 = arith.cmpi ne, %13, %17 : vector<32x256xi32>
    %19 = arith.andi %16, %18 : vector<32x256xi1>
    %cst = arith.constant 0.000000e+00 : f32
    %20 = vector.broadcast %cst : f32 to vector<32x256xf32>
    %21 = arith.select %19, %14, %20 : vector<32x256xi1>, vector<32x256xf32>
    %22 = arith.truncf %21 : vector<32x256xf32> to vector<32x256xbf16>
    %c16_i32_4 = arith.constant 16 : i32
    %23 = tpu.dynamic_rotate %10 by %c16_i32_4 dim 1 : vector<32x256xf32>, i32 -> vector<32x256xf32>
    %c16_i32_5 = arith.constant 16 : i32
    %24 = vector.broadcast %c16_i32_5 : i32 to vector<32x256xi32>
    %25 = arith.cmpi sge, %11, %24 : vector<32x256xi32>
    %cst_6 = arith.constant 0.000000e+00 : f32
    %26 = vector.broadcast %cst_6 : f32 to vector<32x256xf32>
    %27 = arith.select %25, %23, %26 : vector<32x256xi1>, vector<32x256xf32>
    %28 = arith.truncf %27 : vector<32x256xf32> to vector<32x256xbf16>
    %c15_i32_7 = arith.constant 15 : i32
    %29 = tpu.dynamic_rotate %10 by %c15_i32_7 dim 1 : vector<32x256xf32>, i32 -> vector<32x256xf32>
    %c16_i32_8 = arith.constant 16 : i32
    %30 = vector.broadcast %c16_i32_8 : i32 to vector<32x256xi32>
    %31 = arith.cmpi sge, %11, %30 : vector<32x256xi32>
    %c15_i32_9 = arith.constant 15 : i32
    %32 = vector.broadcast %c15_i32_9 : i32 to vector<32x256xi32>
    %33 = arith.cmpi ne, %13, %32 : vector<32x256xi32>
    %34 = arith.andi %31, %33 : vector<32x256xi1>
    %cst_10 = arith.constant 0.000000e+00 : f32
    %35 = vector.broadcast %cst_10 : f32 to vector<32x256xf32>
    %36 = arith.select %34, %29, %35 : vector<32x256xi1>, vector<32x256xf32>
    %37 = arith.truncf %36 : vector<32x256xf32> to vector<32x256xbf16>
    %c1_i32 = arith.constant 1 : i32
    %38 = tpu.dynamic_rotate %10 by %c1_i32 dim 1 : vector<32x256xf32>, i32 -> vector<32x256xf32>
    %c0_i32_11 = arith.constant 0 : i32
    %39 = vector.broadcast %c0_i32_11 : i32 to vector<32x256xi32>
    %40 = arith.cmpi ne, %13, %39 : vector<32x256xi32>
    %cst_12 = arith.constant 0.000000e+00 : f32
    %41 = vector.broadcast %cst_12 : f32 to vector<32x256xf32>
    %42 = arith.select %40, %38, %41 : vector<32x256xi1>, vector<32x256xf32>
    %43 = arith.truncf %42 : vector<32x256xf32> to vector<32x256xbf16>
    %44 = arith.truncf %10 : vector<32x256xf32> to vector<32x256xbf16>
    %c255_i32 = arith.constant 255 : i32
    %45 = tpu.dynamic_rotate %10 by %c255_i32 dim 1 : vector<32x256xf32>, i32 -> vector<32x256xf32>
    %c15_i32_13 = arith.constant 15 : i32
    %46 = vector.broadcast %c15_i32_13 : i32 to vector<32x256xi32>
    %47 = arith.cmpi ne, %13, %46 : vector<32x256xi32>
    %cst_14 = arith.constant 0.000000e+00 : f32
    %48 = vector.broadcast %cst_14 : f32 to vector<32x256xf32>
    %49 = arith.select %47, %45, %48 : vector<32x256xi1>, vector<32x256xf32>
    %50 = arith.truncf %49 : vector<32x256xf32> to vector<32x256xbf16>
    %c241_i32 = arith.constant 241 : i32
    %51 = tpu.dynamic_rotate %10 by %c241_i32 dim 1 : vector<32x256xf32>, i32 -> vector<32x256xf32>
    %c240_i32 = arith.constant 240 : i32
    %52 = vector.broadcast %c240_i32 : i32 to vector<32x256xi32>
    %53 = arith.cmpi slt, %11, %52 : vector<32x256xi32>
    %c0_i32_15 = arith.constant 0 : i32
    %54 = vector.broadcast %c0_i32_15 : i32 to vector<32x256xi32>
    %55 = arith.cmpi ne, %13, %54 : vector<32x256xi32>
    %56 = arith.andi %53, %55 : vector<32x256xi1>
    %cst_16 = arith.constant 0.000000e+00 : f32
    %57 = vector.broadcast %cst_16 : f32 to vector<32x256xf32>
    %58 = arith.select %56, %51, %57 : vector<32x256xi1>, vector<32x256xf32>
    %59 = arith.truncf %58 : vector<32x256xf32> to vector<32x256xbf16>
    %c240_i32_17 = arith.constant 240 : i32
    %60 = tpu.dynamic_rotate %10 by %c240_i32_17 dim 1 : vector<32x256xf32>, i32 -> vector<32x256xf32>
    %c240_i32_18 = arith.constant 240 : i32
    %61 = vector.broadcast %c240_i32_18 : i32 to vector<32x256xi32>
    %62 = arith.cmpi slt, %11, %61 : vector<32x256xi32>
    %cst_19 = arith.constant 0.000000e+00 : f32
    %63 = vector.broadcast %cst_19 : f32 to vector<32x256xf32>
    %64 = arith.select %62, %60, %63 : vector<32x256xi1>, vector<32x256xf32>
    %65 = arith.truncf %64 : vector<32x256xf32> to vector<32x256xbf16>
    %c239_i32 = arith.constant 239 : i32
    %66 = tpu.dynamic_rotate %10 by %c239_i32 dim 1 : vector<32x256xf32>, i32 -> vector<32x256xf32>
    %c240_i32_20 = arith.constant 240 : i32
    %67 = vector.broadcast %c240_i32_20 : i32 to vector<32x256xi32>
    %68 = arith.cmpi slt, %11, %67 : vector<32x256xi32>
    %c15_i32_21 = arith.constant 15 : i32
    %69 = vector.broadcast %c15_i32_21 : i32 to vector<32x256xi32>
    %70 = arith.cmpi ne, %13, %69 : vector<32x256xi32>
    %71 = arith.andi %68, %70 : vector<32x256xi1>
    %cst_22 = arith.constant 0.000000e+00 : f32
    %72 = vector.broadcast %cst_22 : f32 to vector<32x256xf32>
    %73 = arith.select %71, %66, %72 : vector<32x256xi1>, vector<32x256xf32>
    %74 = arith.truncf %73 : vector<32x256xf32> to vector<32x256xbf16>
    %75 = tpu.concatenate %22, %28, %37, %43, %44, %50, %59, %65, %74 in 0 : vector<32x256xbf16>, vector<32x256xbf16>, vector<32x256xbf16>, vector<32x256xbf16>, vector<32x256xbf16>, vector<32x256xbf16>, vector<32x256xbf16>, vector<32x256xbf16>, vector<32x256xbf16> -> vector<288x256xbf16>
    %c0_23 = arith.constant 0 : index
    %c0_24 = arith.constant 0 : index
    %76 = vector.load %arg2[%c0_23, %c0_24] : memref<32x288xbf16, #tpu.memory_space<vmem>>, vector<32x288xbf16>
    %cst_25 = arith.constant dense<0.000000e+00> : vector<32x256xf32>
    %77 = tpu.matmul %76, %75, %cst_25 {dimension_numbers = #tpu.dot_dimension_numbers<[1], [0], [0], [1], [0, 0, 1, 1], [], []>} : vector<32x288xbf16>, vector<288x256xbf16>, vector<32x256xf32> -> vector<32x256xf32>
    %78 = vector.broadcast %1 : vector<32x1xf32> to vector<32x256xf32>
    %79 = arith.addf %77, %78 : vector<32x256xf32>
    %cst_26 = arith.constant dense<0.000000e+00> : vector<32xf32>
    %80 = vector.multi_reduction <add>, %79, %cst_26 [1] : vector<32x256xf32> to vector<32xf32>
    %81 = vector.shape_cast %80 : vector<32xf32> to vector<32x1xf32>
    %82 = arith.mulf %79, %79 : vector<32x256xf32>
    %cst_27 = arith.constant dense<0.000000e+00> : vector<32xf32>
    %83 = vector.multi_reduction <add>, %82, %cst_27 [1] : vector<32x256xf32> to vector<32xf32>
    %84 = vector.shape_cast %83 : vector<32xf32> to vector<32x1xf32>
    %c0_28 = arith.constant 0 : index
    %c0_29 = arith.constant 0 : index
    %85 = vector.load %arg3[%c0_28, %c0_29] : memref<32x32xf32, #tpu.memory_space<vmem>>, vector<32x32xf32>
    %86 = tpu.concatenate %81, %84 in 1 : vector<32x1xf32>, vector<32x1xf32> -> vector<32x2xf32>
    %cst_30 = arith.constant dense<0.000000e+00> : vector<32x2xf32>
    %87 = tpu.matmul %85, %86, %cst_30 {dimension_numbers = #tpu.dot_dimension_numbers<[1], [0], [0], [1], [0, 0, 1, 1], [], []>} : vector<32x32xf32>, vector<32x2xf32>, vector<32x2xf32> -> vector<32x2xf32>
    %88 = vector.extract_strided_slice %87 {offsets = [0, 0], sizes = [32, 1], strides = [1, 1]} : vector<32x2xf32> to vector<32x1xf32>
    %89 = vector.extract_strided_slice %87 {offsets = [0, 1], sizes = [32, 1], strides = [1, 1]} : vector<32x2xf32> to vector<32x1xf32>
    %90 = arith.mulf %88, %88 : vector<32x1xf32>
    %91 = arith.subf %89, %90 : vector<32x1xf32>
    %92 = vector.broadcast %88 : vector<32x1xf32> to vector<32x256xf32>
    %93 = arith.subf %79, %92 : vector<32x256xf32>
    %cst_31 = arith.constant 9.99999974E-6 : f32
    %94 = vector.broadcast %cst_31 : f32 to vector<32x1xf32>
    %95 = arith.addf %91, %94 : vector<32x1xf32>
    %96 = math.rsqrt %95 : vector<32x1xf32>
    %97 = vector.broadcast %96 : vector<32x1xf32> to vector<32x256xf32>
    %98 = arith.mulf %93, %97 : vector<32x256xf32>
    %99 = vector.broadcast %2 : vector<32x1xf32> to vector<32x256xf32>
    %100 = arith.mulf %98, %99 : vector<32x256xf32>
    %101 = vector.broadcast %3 : vector<32x1xf32> to vector<32x256xf32>
    %102 = arith.addf %100, %101 : vector<32x256xf32>
    %cst_32 = arith.constant 0.000000e+00 : f32
    %103 = vector.broadcast %cst_32 : f32 to vector<32x256xf32>
    %104 = arith.maximumf %102, %103 : vector<32x256xf32>
    %105 = arith.addf %10, %104 : vector<32x256xf32>
    %c0_33 = arith.constant 0 : index
    %c0_34 = arith.constant 0 : index
    %106 = vector.load %arg4[%c0_33, %c0_34] : memref<256x49xf32, #tpu.memory_space<vmem>>, vector<256x49xf32>
    %cst_35 = arith.constant dense<0.000000e+00> : vector<32x49xf32>
    %107 = tpu.matmul %105, %106, %cst_35 {dimension_numbers = #tpu.dot_dimension_numbers<[1], [0], [0], [1], [0, 0, 1, 1], [], []>} : vector<32x256xf32>, vector<256x49xf32>, vector<32x49xf32> -> vector<32x49xf32>
    %c0_36 = arith.constant 0 : index
    %c0_37 = arith.constant 0 : index
    %108 = vector.load %arg5[%c0_36, %c0_37] : memref<96x32xbf16, #tpu.memory_space<vmem>>, vector<96x32xbf16>
    %109 = arith.truncf %107 : vector<32x49xf32> to vector<32x49xbf16>
    %cst_38 = arith.constant dense<0.000000e+00> : vector<96x49xf32>
    %110 = tpu.matmul %108, %109, %cst_38 {dimension_numbers = #tpu.dot_dimension_numbers<[1], [0], [0], [1], [0, 0, 1, 1], [], []>} : vector<96x32xbf16>, vector<32x49xbf16>, vector<96x49xf32> -> vector<96x49xf32>
    %c0_39 = arith.constant 0 : index
    %c0_40 = arith.constant 0 : index
    %111 = vector.load %arg6[%c0_39, %c0_40] : memref<96x1xf32, #tpu.memory_space<vmem>>, vector<96x1xf32>
    %112 = vector.broadcast %111 : vector<96x1xf32> to vector<96x49xf32>
    %113 = arith.addf %110, %112 : vector<96x49xf32>
    %114 = vector.extract_strided_slice %113 {offsets = [0, 0], sizes = [32, 49], strides = [1, 1]} : vector<96x49xf32> to vector<32x49xf32>
    %115 = vector.shape_cast %114 : vector<32x49xf32> to vector<8x4x49xf32>
    %116 = vector.extract_strided_slice %113 {offsets = [32, 0], sizes = [32, 49], strides = [1, 1]} : vector<96x49xf32> to vector<32x49xf32>
    %117 = vector.shape_cast %116 : vector<32x49xf32> to vector<8x4x49xf32>
    %118 = vector.extract_strided_slice %113 {offsets = [64, 0], sizes = [32, 49], strides = [1, 1]} : vector<96x49xf32> to vector<32x49xf32>
    %119 = vector.shape_cast %118 : vector<32x49xf32> to vector<8x4x49xf32>
    "tpu.trace_start"() <{level = 10 : i32, message = "hdn,hdm->hnm"}> : () -> ()
    %cst_41 = arith.constant dense<0.000000e+00> : vector<8x49x49xf32>
    %120 = tpu.matmul %115, %117, %cst_41 {dimension_numbers = #tpu.dot_dimension_numbers<[1], [1], [2], [2], [0, 0, 0, 2, 1, 2], [0], [0]>} : vector<8x4x49xf32>, vector<8x4x49xf32>, vector<8x49x49xf32> -> vector<8x49x49xf32>
    "tpu.trace_stop"() : () -> ()
    %cst_42 = arith.constant 5.000000e-01 : f32
    %121 = vector.broadcast %cst_42 : f32 to vector<8x49x49xf32>
    %122 = arith.mulf %120, %121 : vector<8x49x49xf32>
    %cst_43 = arith.constant dense<0xFF800000> : vector<8x49xf32>
    %123 = vector.multi_reduction <maximumf>, %122, %cst_43 [2] : vector<8x49x49xf32> to vector<8x49xf32>
    %124 = vector.shape_cast %123 : vector<8x49xf32> to vector<8x49x1xf32>
    %125 = vector.broadcast %124 : vector<8x49x1xf32> to vector<8x49x49xf32>
    %126 = arith.subf %122, %125 : vector<8x49x49xf32>
    %127 = math.exp %126 : vector<8x49x49xf32>
    %cst_44 = arith.constant dense<0.000000e+00> : vector<8x49xf32>
    %128 = vector.multi_reduction <add>, %127, %cst_44 [2] : vector<8x49x49xf32> to vector<8x49xf32>
    %129 = vector.shape_cast %128 : vector<8x49xf32> to vector<8x49x1xf32>
    %130 = tpu.reciprocal %129 {approx = true} : vector<8x49x1xf32> -> vector<8x49x1xf32>
    %131 = vector.broadcast %130 : vector<8x49x1xf32> to vector<8x49x49xf32>
    %132 = arith.mulf %127, %131 : vector<8x49x49xf32>
    "tpu.trace_start"() <{level = 10 : i32, message = "hdm,hnm->hdn"}> : () -> ()
    %cst_45 = arith.constant dense<0.000000e+00> : vector<8x4x49xf32>
    %133 = tpu.matmul %119, %132, %cst_45 {dimension_numbers = #tpu.dot_dimension_numbers<[2], [2], [1], [1], [0, 0, 0, 1, 1, 1], [0], [0]>} : vector<8x4x49xf32>, vector<8x49x49xf32>, vector<8x4x49xf32> -> vector<8x4x49xf32>
    "tpu.trace_stop"() : () -> ()
    %134 = vector.shape_cast %133 : vector<8x4x49xf32> to vector<32x49xf32>
    %cst_46 = arith.constant dense<0.000000e+00> : vector<49xf32>
    %135 = vector.multi_reduction <add>, %134, %cst_46 [0] : vector<32x49xf32> to vector<49xf32>
    %136 = vector.shape_cast %135 : vector<49xf32> to vector<1x49xf32>
    %cst_47 = arith.constant 3.200000e+01 : f32
    %137 = vector.broadcast %cst_47 : f32 to vector<1x49xf32>
    %138 = arith.divf %136, %137 : vector<1x49xf32>
    %139 = vector.broadcast %138 : vector<1x49xf32> to vector<32x49xf32>
    %140 = arith.subf %134, %139 : vector<32x49xf32>
    %141 = arith.mulf %140, %140 : vector<32x49xf32>
    %cst_48 = arith.constant dense<0.000000e+00> : vector<49xf32>
    %142 = vector.multi_reduction <add>, %141, %cst_48 [0] : vector<32x49xf32> to vector<49xf32>
    %143 = vector.shape_cast %142 : vector<49xf32> to vector<1x49xf32>
    %cst_49 = arith.constant 3.200000e+01 : f32
    %144 = vector.broadcast %cst_49 : f32 to vector<1x49xf32>
    %145 = arith.divf %143, %144 : vector<1x49xf32>
    %cst_50 = arith.constant 9.99999974E-6 : f32
    %146 = vector.broadcast %cst_50 : f32 to vector<1x49xf32>
    %147 = arith.addf %145, %146 : vector<1x49xf32>
    %148 = math.rsqrt %147 : vector<1x49xf32>
    %149 = vector.broadcast %148 : vector<1x49xf32> to vector<32x49xf32>
    %150 = arith.mulf %140, %149 : vector<32x49xf32>
    %151 = vector.broadcast %5 : vector<32x1xf32> to vector<32x49xf32>
    %152 = arith.mulf %150, %151 : vector<32x49xf32>
    %153 = vector.broadcast %6 : vector<32x1xf32> to vector<32x49xf32>
    %154 = arith.addf %152, %153 : vector<32x49xf32>
    %cst_51 = arith.constant 5.000000e-01 : f32
    %155 = vector.broadcast %cst_51 : f32 to vector<32x49xf32>
    %156 = arith.mulf %155, %154 : vector<32x49xf32>
    %cst_52 = arith.constant 0.707106769 : f32
    %157 = vector.broadcast %cst_52 : f32 to vector<32x49xf32>
    %158 = arith.mulf %154, %157 : vector<32x49xf32>
    %cst_53 = arith.constant 0.000000e+00 : f32
    %159 = vector.broadcast %cst_53 : f32 to vector<32x49xf32>
    %160 = arith.cmpf oge, %158, %159 : vector<32x49xf32>
    %cst_54 = arith.constant 1.000000e+00 : f32
    %cst_55 = arith.constant -1.000000e+00 : f32
    %161 = vector.broadcast %cst_54 : f32 to vector<32x49xf32>
    %162 = vector.broadcast %cst_55 : f32 to vector<32x49xf32>
    %163 = arith.select %160, %161, %162 : vector<32x49xi1>, vector<32x49xf32>
    %164 = math.absf %158 : vector<32x49xf32>
    %cst_56 = arith.constant 0.327591091 : f32
    %165 = vector.broadcast %cst_56 : f32 to vector<32x49xf32>
    %166 = arith.mulf %165, %164 : vector<32x49xf32>
    %cst_57 = arith.constant 1.000000e+00 : f32
    %167 = vector.broadcast %cst_57 : f32 to vector<32x49xf32>
    %168 = arith.addf %167, %166 : vector<32x49xf32>
    %cst_58 = arith.constant 1.000000e+00 : f32
    %169 = vector.broadcast %cst_58 : f32 to vector<32x49xf32>
    %170 = arith.divf %169, %168 : vector<32x49xf32>
    %cst_59 = arith.constant 1.06140542 : f32
    %171 = vector.broadcast %cst_59 : f32 to vector<32x49xf32>
    %172 = arith.mulf %171, %170 : vector<32x49xf32>
    %cst_60 = arith.constant -1.45315206 : f32
    %173 = vector.broadcast %cst_60 : f32 to vector<32x49xf32>
    %174 = arith.addf %172, %173 : vector<32x49xf32>
    %175 = arith.mulf %174, %170 : vector<32x49xf32>
    %cst_61 = arith.constant 1.42141378 : f32
    %176 = vector.broadcast %cst_61 : f32 to vector<32x49xf32>
    %177 = arith.addf %175, %176 : vector<32x49xf32>
    %178 = arith.mulf %177, %170 : vector<32x49xf32>
    %cst_62 = arith.constant -0.284496725 : f32
    %179 = vector.broadcast %cst_62 : f32 to vector<32x49xf32>
    %180 = arith.addf %178, %179 : vector<32x49xf32>
    %181 = arith.mulf %180, %170 : vector<32x49xf32>
    %cst_63 = arith.constant 0.254829586 : f32
    %182 = vector.broadcast %cst_63 : f32 to vector<32x49xf32>
    %183 = arith.addf %181, %182 : vector<32x49xf32>
    %184 = arith.mulf %183, %170 : vector<32x49xf32>
    %cst_64 = arith.constant 0.000000e+00 : f32
    %185 = vector.broadcast %cst_64 : f32 to vector<32x49xf32>
    %186 = arith.subf %185, %164 : vector<32x49xf32>
    %187 = arith.mulf %186, %164 : vector<32x49xf32>
    %188 = math.exp %187 : vector<32x49xf32>
    %189 = arith.mulf %184, %188 : vector<32x49xf32>
    %cst_65 = arith.constant 1.000000e+00 : f32
    %190 = vector.broadcast %cst_65 : f32 to vector<32x49xf32>
    %191 = arith.subf %190, %189 : vector<32x49xf32>
    %192 = arith.mulf %163, %191 : vector<32x49xf32>
    %cst_66 = arith.constant 1.000000e+00 : f32
    %193 = vector.broadcast %cst_66 : f32 to vector<32x49xf32>
    %194 = arith.addf %193, %192 : vector<32x49xf32>
    %195 = arith.mulf %156, %194 : vector<32x49xf32>
    %196 = arith.addf %107, %195 : vector<32x49xf32>
    %c0_67 = arith.constant 0 : index
    %c0_68 = arith.constant 0 : index
    %197 = vector.load %arg7[%c0_67, %c0_68] : memref<32x32xbf16, #tpu.memory_space<vmem>>, vector<32x32xbf16>
    %198 = arith.truncf %196 : vector<32x49xf32> to vector<32x49xbf16>
    %cst_69 = arith.constant dense<0.000000e+00> : vector<32x49xf32>
    %199 = tpu.matmul %197, %198, %cst_69 {dimension_numbers = #tpu.dot_dimension_numbers<[1], [0], [0], [1], [0, 0, 1, 1], [], []>} : vector<32x32xbf16>, vector<32x49xbf16>, vector<32x49xf32> -> vector<32x49xf32>
    %200 = vector.broadcast %4 : vector<32x1xf32> to vector<32x49xf32>
    %201 = arith.addf %199, %200 : vector<32x49xf32>
    %cst_70 = arith.constant dense<0.000000e+00> : vector<49xf32>
    %202 = vector.multi_reduction <add>, %201, %cst_70 [0] : vector<32x49xf32> to vector<49xf32>
    %203 = vector.shape_cast %202 : vector<49xf32> to vector<1x49xf32>
    %cst_71 = arith.constant 3.200000e+01 : f32
    %204 = vector.broadcast %cst_71 : f32 to vector<1x49xf32>
    %205 = arith.divf %203, %204 : vector<1x49xf32>
    %206 = vector.broadcast %205 : vector<1x49xf32> to vector<32x49xf32>
    %207 = arith.subf %201, %206 : vector<32x49xf32>
    %208 = arith.mulf %207, %207 : vector<32x49xf32>
    %cst_72 = arith.constant dense<0.000000e+00> : vector<49xf32>
    %209 = vector.multi_reduction <add>, %208, %cst_72 [0] : vector<32x49xf32> to vector<49xf32>
    %210 = vector.shape_cast %209 : vector<49xf32> to vector<1x49xf32>
    %cst_73 = arith.constant 3.200000e+01 : f32
    %211 = vector.broadcast %cst_73 : f32 to vector<1x49xf32>
    %212 = arith.divf %210, %211 : vector<1x49xf32>
    %cst_74 = arith.constant 9.99999974E-6 : f32
    %213 = vector.broadcast %cst_74 : f32 to vector<1x49xf32>
    %214 = arith.addf %212, %213 : vector<1x49xf32>
    %215 = math.rsqrt %214 : vector<1x49xf32>
    %216 = vector.broadcast %215 : vector<1x49xf32> to vector<32x49xf32>
    %217 = arith.mulf %207, %216 : vector<32x49xf32>
    %218 = vector.broadcast %7 : vector<32x1xf32> to vector<32x49xf32>
    %219 = arith.mulf %217, %218 : vector<32x49xf32>
    %220 = vector.broadcast %8 : vector<32x1xf32> to vector<32x49xf32>
    %221 = arith.addf %219, %220 : vector<32x49xf32>
    %cst_75 = arith.constant 5.000000e-01 : f32
    %222 = vector.broadcast %cst_75 : f32 to vector<32x49xf32>
    %223 = arith.mulf %222, %221 : vector<32x49xf32>
    %cst_76 = arith.constant 0.707106769 : f32
    %224 = vector.broadcast %cst_76 : f32 to vector<32x49xf32>
    %225 = arith.mulf %221, %224 : vector<32x49xf32>
    %cst_77 = arith.constant 0.000000e+00 : f32
    %226 = vector.broadcast %cst_77 : f32 to vector<32x49xf32>
    %227 = arith.cmpf oge, %225, %226 : vector<32x49xf32>
    %cst_78 = arith.constant 1.000000e+00 : f32
    %cst_79 = arith.constant -1.000000e+00 : f32
    %228 = vector.broadcast %cst_78 : f32 to vector<32x49xf32>
    %229 = vector.broadcast %cst_79 : f32 to vector<32x49xf32>
    %230 = arith.select %227, %228, %229 : vector<32x49xi1>, vector<32x49xf32>
    %231 = math.absf %225 : vector<32x49xf32>
    %cst_80 = arith.constant 0.327591091 : f32
    %232 = vector.broadcast %cst_80 : f32 to vector<32x49xf32>
    %233 = arith.mulf %232, %231 : vector<32x49xf32>
    %cst_81 = arith.constant 1.000000e+00 : f32
    %234 = vector.broadcast %cst_81 : f32 to vector<32x49xf32>
    %235 = arith.addf %234, %233 : vector<32x49xf32>
    %cst_82 = arith.constant 1.000000e+00 : f32
    %236 = vector.broadcast %cst_82 : f32 to vector<32x49xf32>
    %237 = arith.divf %236, %235 : vector<32x49xf32>
    %cst_83 = arith.constant 1.06140542 : f32
    %238 = vector.broadcast %cst_83 : f32 to vector<32x49xf32>
    %239 = arith.mulf %238, %237 : vector<32x49xf32>
    %cst_84 = arith.constant -1.45315206 : f32
    %240 = vector.broadcast %cst_84 : f32 to vector<32x49xf32>
    %241 = arith.addf %239, %240 : vector<32x49xf32>
    %242 = arith.mulf %241, %237 : vector<32x49xf32>
    %cst_85 = arith.constant 1.42141378 : f32
    %243 = vector.broadcast %cst_85 : f32 to vector<32x49xf32>
    %244 = arith.addf %242, %243 : vector<32x49xf32>
    %245 = arith.mulf %244, %237 : vector<32x49xf32>
    %cst_86 = arith.constant -0.284496725 : f32
    %246 = vector.broadcast %cst_86 : f32 to vector<32x49xf32>
    %247 = arith.addf %245, %246 : vector<32x49xf32>
    %248 = arith.mulf %247, %237 : vector<32x49xf32>
    %cst_87 = arith.constant 0.254829586 : f32
    %249 = vector.broadcast %cst_87 : f32 to vector<32x49xf32>
    %250 = arith.addf %248, %249 : vector<32x49xf32>
    %251 = arith.mulf %250, %237 : vector<32x49xf32>
    %cst_88 = arith.constant 0.000000e+00 : f32
    %252 = vector.broadcast %cst_88 : f32 to vector<32x49xf32>
    %253 = arith.subf %252, %231 : vector<32x49xf32>
    %254 = arith.mulf %253, %231 : vector<32x49xf32>
    %255 = math.exp %254 : vector<32x49xf32>
    %256 = arith.mulf %251, %255 : vector<32x49xf32>
    %cst_89 = arith.constant 1.000000e+00 : f32
    %257 = vector.broadcast %cst_89 : f32 to vector<32x49xf32>
    %258 = arith.subf %257, %256 : vector<32x49xf32>
    %259 = arith.mulf %230, %258 : vector<32x49xf32>
    %cst_90 = arith.constant 1.000000e+00 : f32
    %260 = vector.broadcast %cst_90 : f32 to vector<32x49xf32>
    %261 = arith.addf %260, %259 : vector<32x49xf32>
    %262 = arith.mulf %223, %261 : vector<32x49xf32>
    %263 = arith.addf %196, %262 : vector<32x49xf32>
    %c0_91 = arith.constant 0 : index
    %c0_92 = arith.constant 0 : index
    %264 = vector.load %arg8[%c0_91, %c0_92] : memref<49x256xf32, #tpu.memory_space<vmem>>, vector<49x256xf32>
    %cst_93 = arith.constant dense<0.000000e+00> : vector<32x256xf32>
    %265 = tpu.matmul %263, %264, %cst_93 {dimension_numbers = #tpu.dot_dimension_numbers<[1], [0], [0], [1], [0, 0, 1, 1], [], []>} : vector<32x49xf32>, vector<49x256xf32>, vector<32x256xf32> -> vector<32x256xf32>
    %266 = arith.addf %105, %265 : vector<32x256xf32>
    %c0_94 = arith.constant 0 : index
    %c0_95 = arith.constant 0 : index
    %c0_96 = arith.constant 0 : index
    %267 = vector.load %arg10[%c0_94, %c0_95, %c0_96] : memref<1x32x256xf32, #tpu.memory_space<vmem>>, vector<1x32x256xf32>
    %268 = vector.shape_cast %267 : vector<1x32x256xf32> to vector<32x256xf32>
    %269 = vector.shape_cast %266 : vector<32x256xf32> to vector<1x32x256xf32>
    tpu.vector_store %arg10[%c0_94, %c0_95, %c0_96], %269 {strides = array<i32>} : memref<1x32x256xf32, #tpu.memory_space<vmem>>, vector<1x32x256xf32>,
    return
  }
  func.func @transform_0(%arg0: i32) -> (i32, i32, i32) {
    %c0_i32 = arith.constant 0 : i32
    %c0_i32_0 = arith.constant 0 : i32
    %c0_i32_1 = arith.constant 0 : i32
    return %arg0, %c0_i32, %c0_i32_0 : i32, i32, i32
  }
  func.func @transform_1(%arg0: i32) -> (i32, i32) {
    %c0_i32 = arith.constant 0 : i32
    %c0_i32_0 = arith.constant 0 : i32
    %c0_i32_1 = arith.constant 0 : i32
    return %c0_i32, %c0_i32_0 : i32, i32
  }
  func.func @transform_2(%arg0: i32) -> (i32, i32) {
    %c0_i32 = arith.constant 0 : i32
    %c0_i32_0 = arith.constant 0 : i32
    %c0_i32_1 = arith.constant 0 : i32
    return %c0_i32, %c0_i32_0 : i32, i32
  }
  func.func @transform_3(%arg0: i32) -> (i32, i32) {
    %c0_i32 = arith.constant 0 : i32
    %c0_i32_0 = arith.constant 0 : i32
    %c0_i32_1 = arith.constant 0 : i32
    return %c0_i32, %c0_i32_0 : i32, i32
  }
  func.func @transform_4(%arg0: i32) -> (i32, i32) {
    %c0_i32 = arith.constant 0 : i32
    %c0_i32_0 = arith.constant 0 : i32
    %c0_i32_1 = arith.constant 0 : i32
    return %c0_i32, %c0_i32_0 : i32, i32
  }
  func.func @transform_5(%arg0: i32) -> (i32, i32) {
    %c0_i32 = arith.constant 0 : i32
    %c0_i32_0 = arith.constant 0 : i32
    %c0_i32_1 = arith.constant 0 : i32
    return %c0_i32, %c0_i32_0 : i32, i32
  }
  func.func @transform_6(%arg0: i32) -> (i32, i32) {
    %c0_i32 = arith.constant 0 : i32
    %c0_i32_0 = arith.constant 0 : i32
    %c0_i32_1 = arith.constant 0 : i32
    return %c0_i32, %c0_i32_0 : i32, i32
  }
  func.func @transform_7(%arg0: i32) -> (i32, i32) {
    %c0_i32 = arith.constant 0 : i32
    %c0_i32_0 = arith.constant 0 : i32
    %c0_i32_1 = arith.constant 0 : i32
    return %c0_i32, %c0_i32_0 : i32, i32
  }
  func.func @transform_8(%arg0: i32) -> (i32, i32) {
    %c0_i32 = arith.constant 0 : i32
    %c0_i32_0 = arith.constant 0 : i32
    %c0_i32_1 = arith.constant 0 : i32
    return %c0_i32, %c0_i32_0 : i32, i32
  }
  func.func @transform_9(%arg0: i32) -> (i32, i32, i32) {
    %c0_i32 = arith.constant 0 : i32
    %c0_i32_0 = arith.constant 0 : i32
    %c0_i32_1 = arith.constant 0 : i32
    return %arg0, %c0_i32, %c0_i32_0 : i32, i32, i32
  }
}

</mosaic_0001>

<bundles_post_ra>
// kernel: adaptive_pool_self_attention.1
= control target key start
LH: loop header
LB: loop body
LE: loop exit
PB: predicated region body
PF: predicated region fallthrough
CT: control target
= control target key end

     0   :  { %s6538_s30 = smov 0   ;;  %s8671_s0 = inlined_call_operand.vmem [shape: f32[2,32,256], index: 0, kind: input, shape index: {}]   ;;  %s8672_s1 = inlined_call_operand.vmem [shape: bf16[32,288], index: 1, kind: input, shape index: {}]   ;;  %s8673_s2 = inlined_call_operand.vmem [shape: f32[32,32], index: 2, kind: input, shape index: {}]   ;;  %s8674_s3 = inlined_call_operand.vmem [shape: f32[256,49], index: 3, kind: input, shape index: {}]   ;;  %s8675_s4 = inlined_call_operand.vmem [shape: bf16[96,32], index: 4, kind: input, shape index: {}]   ;;  %s8676_s5 = inlined_call_operand.vmem [shape: f32[96,1], index: 5, kind: input, shape index: {}]   ;;  %s8677_s6 = inlined_call_operand.vmem [shape: bf16[32,32], index: 6, kind: input, shape index: {}]   ;;  %s8678_s7 = inlined_call_operand.vmem [shape: f32[49,256], index: 7, kind: input, shape index: {}]   ;;  %s8679_s8 = inlined_call_operand.vmem [shape: f32[32,8], index: 8, kind: input, shape index: {}]   ;;  %s8680_s9 = inlined_call_operand.vmem [shape: f32[2,32,256], index: 9, kind: output, shape index: {}]  }
   0x1 LB: > { %s5119_s10 = sadd.s32 4294967295, %s6465_s30   ;;  %p5123_p0 = scmp.ge.s32.totalorder %s6465_s30, 1  ;;  %s6465_s30 = sphi %s6538_s30, %s19_s30  }
   0x2   : > { %p287_p1 = scmp.lt.s32.totalorder %s6465_s30, 3 }
   0x4   : > { %p288_p2 = pnand %p5123_p0, %p287_p1 }
   0x6   : > { %291 = sbr.rel (%p288_p2) target bundleno = 3174 (0xc66), region = 56 }
   0xb   : > { %p323_p3 = scmp.lt.s32.totalorder %s5119_s10, 1  ;;  %s6467_s15 = smov 1   ;;  %v6475_v12 = vmov 0   ;;  %v6150_v13 = vld [vmem:[%s8672_s1 + $0x4] ss:$12 sps:$4 sm:$0xff]   ;;  %v6601_v14 = vld [vmem:[%s8679_s8 + $0x18] sm:$0xff]  ;;  %v8681_v18 = vlaneseq }
   0xc   : > { %s6468_s16 = smov 15   ;;  %s6469_s17 = smov 16   ;;  %817 = vmatprep.mubr.bf16.mxu1 %v6475_v12  ;;  %6119 = vset.pattern.permute.xlu0 %v6475_v12  ;;  %v6606_v15 = vld [vmem:[%s8679_s8 + $0x10] sm:$0xff]  ;;  %v6613_v16 = vld [vmem:[%s8679_s8] sm:$0xff]  ;;  %v6618_v17 = vld [vmem:[%s8679_s8 + $0x8] sm:$0xff] }
   0xd   : > { %s8795_s10 = smov (!%p323_p3, %s5119_s10), 1  ;;  %s6470_s18 = smov 17   ;;  %6120 = vset.pattern.permute.xlu1 %v6475_v12  ;;  %764 = vmatprep.mubr.bf16.mxu0 %v6150_v13  ;;  %v6623_v19 = vand.u32 127, %v8681_v18 }
   0xe   : > { %s5376_s11 = sshll.u32 %s8795_s10, 6  ;;  %s6471_s19 = smov 112  }
   0xf   : > { %s6554_s14 = scalar_lea.vmem %s8671_s0, %s5376_s11  ;;  %s6472_s20 = smov 113   ;;  %v6626_v20 = vadd.s32 128, %v6623_v19  ;;  %v349_v24 = vand.u32 15, %v6623_v19  ;;  %vm488_vm0 = vcmp.lt.s32.totalorder %v6623_v19, 1  ;;  %vm447_vm3 = vcmp.lt.s32.totalorder %v6623_v19, 15 }
  0x10   : > { %v6557_v0 = vld [vmem:[%s6554_s14 + $0x20] sm:$0xff]  ;;  %v6560_v1 = vld [vmem:[%s6554_s14 + $0x30] sm:$0xff]  ;;  %v6571_v5 = vld [vmem:[%s6554_s14 + $0x28] sm:$0xff]  ;;  %s6473_s21 = smov 127   ;;  %s6474_s22 = smov 111   ;;  %vm376_vm7 = vcmp.ge.s32.totalorder %v6623_v19, 16 }
  0x11   : > { %v6563_v2 = vld [vmem:[%s6554_s14] sm:$0xff]  ;;  %v5959_v3 = vpack.i.bf16 %v6560_v1, %v6557_v0  ;;  %v6568_v4 = vld [vmem:[%s6554_s14 + $0x10] sm:$0xff]  ;;  %v6574_v6 = vld [vmem:[%s6554_s14 + $0x38] sm:$0xff]  ;;  %v350_v22 = vand.u32 15, %v6626_v20  ;;  %vm6635_vm2 = vcmp.ne.s32.totalorder %v349_v24, 0  ;;  %vm6677_vm8 = vcmp.ne.s32.totalorder %v349_v24, 15 }
  0x12   : > { %v5969_v7 = vpack.i.bf16 %v6568_v4, %v6563_v2  ;;  %v6579_v8 = vld [vmem:[%s6554_s14 + $0x8] sm:$0xff]  ;;  %v6582_v9 = vld [vmem:[%s6554_s14 + $0x18] sm:$0xff]  ;;  %v5964_v10 = vpack.i.bf16 %v6574_v6, %v6571_v5  ;;  %vm6662_vm5 = vmpackc.low %vm6635_vm2, %vm6635_vm2  ;;  %vm410_vm11 = vcmp.lt.s32.totalorder %v6623_v19, 16  ;;  %vm367_vm13 = vcmp.lt.s32.totalorder %v6623_v19, 17 }
  0x13   : > { %5960 = vrot.lane.b32.xlu0 %v5959_v3, %s6467_s15  ;;  %v5974_v11 = vpack.i.bf16 %v6582_v9, %v6579_v8  ;;  %vm6631_vm1 = vcmp.ne.s32.totalorder %v350_v22, 0  ;;  %vm6666_vm6 = vcmp.ne.s32.totalorder %v350_v22, 15  ;;  %vm6704_vm10 = vmand %vm376_vm7, %vm6677_vm8 }
  0x14   : > { %5970 = vrot.lane.b32.xlu1 %v5969_v7, %s6467_s15  ;;  %vm6655_vm4 = vmpackc.low %vm6631_vm1, %vm6631_vm1 }
  0x15   : > { %vm6696_vm9 = vmpackc.low %vm6666_vm6, %vm6666_vm6 }
  0x16   : > { %vm5149_vm12 = vmpackc.low %vm6704_vm10, %vm6704_vm10 }
  0x17   : > { %5965 = vrot.lane.b32.xlu0 %v5964_v10, %s6467_s15  ;;  %vm6756_vm14 = vmpackc.low %vm376_vm7, %vm376_vm7 }
  0x18   : > { %5975 = vrot.lane.b32.xlu1 %v5974_v11, %s6467_s15  ;;  %vm6774_vm15 = vmand %vm376_vm7, %vm6635_vm2 }
  0x19   : > { %vm5167_vm2 = vmpackc.low %vm6774_vm15, %vm6774_vm15  ;;  %vm1542_vm15 = vcmask 1043456  }
  0x1b   : > { %5980 = vrot.lane.b32.xlu0 %v5959_v3, %s6468_s16 }
  0x1c   : > { %5985 = vrot.lane.b32.xlu1 %v5964_v10, %s6468_s16 }
  0x1f   : > { %5990 = vrot.lane.b32.xlu0 %v5969_v7, %s6468_s16 }
  0x20   : > { %5995 = vrot.lane.b32.xlu1 %v5974_v11, %s6468_s16 }
  0x23   : > { %6000 = vrot.lane.b32.xlu0 %v5959_v3, %s6469_s17 }
  0x24   : > { %6005 = vrot.lane.b32.xlu1 %v5964_v10, %s6469_s17 }
  0x27   : > { %6010 = vrot.lane.b32.xlu0 %v5969_v7, %s6469_s17 }
  0x28   : > { %6015 = vrot.lane.b32.xlu1 %v5974_v11, %s6469_s17 }
  0x2b   : > { %6020 = vrot.lane.b32.xlu0 %v5959_v3, %s6470_s18 }
  0x2c   : > { %6025 = vrot.lane.b32.xlu1 %v5964_v10, %s6470_s18 }
  0x2f   : > { %6030 = vrot.lane.b32.xlu0 %v5969_v7, %s6470_s18 }
  0x30   : > { %6035 = vrot.lane.b32.xlu1 %v5974_v11, %s6470_s18 }
  0x33   : > { %6040 = vrot.lane.b32.xlu0 %v5959_v3, %s6471_s19 }
  0x34   : > { %6045 = vrot.lane.b32.xlu1 %v5964_v10, %s6471_s19 }
  0x37   : > { %6050 = vrot.lane.b32.xlu0 %v5969_v7, %s6471_s19 }
  0x38   : > { %6055 = vrot.lane.b32.xlu1 %v5974_v11, %s6471_s19 }
  0x3b   : > { %6060 = vrot.lane.b32.xlu0 %v5959_v3, %s6472_s20 }
  0x3c   : > { %6065 = vrot.lane.b32.xlu1 %v5964_v10, %s6472_s20 }
  0x3f   : > { %6070 = vrot.lane.b32.xlu0 %v5969_v7, %s6472_s20 }
  0x40   : > { %6075 = vrot.lane.b32.xlu1 %v5974_v11, %s6472_s20 }
  0x43   : > { %6080 = vrot.lane.b32.xlu0 %v5959_v3, %s6473_s21 }
  0x44   : > { %6085 = vrot.lane.b32.xlu1 %v5964_v10, %s6473_s21 }
  0x47   : > { %6090 = vrot.lane.b32.xlu0 %v5969_v7, %s6473_s21 }
  0x48   : > { %6095 = vrot.lane.b32.xlu1 %v5974_v11, %s6473_s21 }
  0x4b   : > { %6100 = vrot.lane.b32.xlu0 %v5959_v3, %s6474_s22 }
  0x4c   : > { %6105 = vrot.lane.b32.xlu1 %v5964_v10, %s6474_s22 }
  0x4f   : > { %6110 = vrot.lane.b32.xlu0 %v5969_v7, %s6474_s22 }
  0x50   : > { %6115 = vrot.lane.b32.xlu1 %v5974_v11, %s6474_s22 }
  0x53   : > { %692 = vperm.xlu0 %6119, %v6601_v14  }
  0x54   : > { %687 = vperm.xlu1 %6120, %v6606_v15  }
  0x57   : > { %677 = vperm.xlu0 %6119, %v6613_v16  }
  0x58   : > { %682 = vperm.xlu1 %6120, %v6618_v17  }
  0x85   : > { %v5961_v21 = vpop.permute.xlu0 %5960 }
  0x86   : > { %v5971_v23 = vpop.permute.xlu1 %5970  ;;  %v5963_v29 = vunpack.i.h.bf16 %v5961_v21  ;;  %v5962_v30 = vunpack.i.l.bf16 %v5961_v21 }
  0x87   : > { %v5973_v25 = vunpack.i.h.bf16 %v5971_v23  ;;  %v5972_v26 = vunpack.i.l.bf16 %v5971_v23 }
  0x89   : > { %v5966_v27 = vpop.permute.xlu0 %5965 }
  0x8a   : > { %v5968_v31 = vunpack.i.h.bf16 %v5966_v27  ;;  %v5967_v32 = vunpack.i.l.bf16 %v5966_v27  ;;  %v5976_v33 = vpop.permute.xlu1 %5975 }
  0x8b   : > { %v5978_v34 = vunpack.i.h.bf16 %v5976_v33  ;;  %v5977_v35 = vunpack.i.l.bf16 %v5976_v33 }
  0x8c   : > { %v491_v37 = vsel %vm488_vm0, %v5962_v30, %v5967_v32  ;;  %v492_v38 = vsel %vm488_vm0, %v5963_v29, %v5968_v31  ;;  %v495_v39 = vsel %vm488_vm0, %v5967_v32, %v5962_v30  ;;  %v496_v40 = vsel %vm488_vm0, %v5968_v31, %v5963_v29 }
  0x8d   : > { %v489_v41 = vsel %vm488_vm0, %v5972_v26, %v5977_v35  ;;  %v490_v42 = vsel %vm488_vm0, %v5973_v25, %v5978_v34  ;;  %v5981_v43 = vpop.permute.xlu0 %5980  ;;  %v5135_v48 = vpack.c.bf16 %v492_v38, %v491_v37  ;;  %v5138_v50 = vpack.c.bf16 %v496_v40, %v495_v39 }
  0x8e   : > { %v5983_v45 = vunpack.i.h.bf16 %v5981_v43  ;;  %v5982_v46 = vunpack.i.l.bf16 %v5981_v43  ;;  %v5986_v47 = vpop.permute.xlu1 %5985  ;;  %v493_v54 = vsel %vm488_vm0, %v5977_v35, %v5972_v26  ;;  %v494_v55 = vsel %vm488_vm0, %v5978_v34, %v5973_v25 }
  0x8f   : > { %v5988_v51 = vunpack.i.h.bf16 %v5986_v47  ;;  %v5987_v52 = vunpack.i.l.bf16 %v5986_v47  ;;  %5136 = vmatprep.subr.msk.bf16.mxu0 %vm6655_vm4, %v5135_v48  ;;  %v5141_v56 = vpack.c.bf16 %v490_v42, %v489_v41  ;;  %v5144_v22 = vpack.c.bf16 %v494_v55, %v493_v54 }
  0x90   : > { %5139 = vmatpush1.bf16.msk.msra.mxu0 %vm6662_vm5, %v5138_v50  ;;  %vm607_vm0 = vcmp.lt.s32.totalorder %v6623_v19, 112 }
  0x91   : > { %v451_v58 = vsel %vm447_vm3, %v5983_v45, %v5988_v51  ;;  %v455_v59 = vsel %vm447_vm3, %v5988_v51, %v5983_v45  ;;  %v450_v60 = vsel %vm447_vm3, %v5982_v46, %v5987_v52  ;;  %v454_v61 = vsel %vm447_vm3, %v5987_v52, %v5982_v46  ;;  %v5991_v62 = vpop.permute.xlu0 %5990  ;;  %5142 = vmatprep.subr.msk.bf16.mxu0 %vm6655_vm4, %v5141_v56 }
  0x92   : > { %v5993_v63 = vunpack.i.h.bf16 %v5991_v62  ;;  %v5992_v3 = vunpack.i.l.bf16 %v5991_v62  ;;  %v5996_v7 = vpop.permute.xlu1 %5995  ;;  %v5147_v11 = vpack.c.bf16 %v451_v58, %v450_v60  ;;  %v5150_v24 = vpack.c.bf16 %v455_v59, %v454_v61 }
  0x93   : > { %v5998_v13 = vunpack.i.h.bf16 %v5996_v7  ;;  %v5997_v21 = vunpack.i.l.bf16 %v5996_v7 }
  0x94   : > { %5145 = vmatpush1.bf16.msk.msra.mxu0 %vm6662_vm5, %v5144_v22 }
  0x95   : > { %v449_v25 = vsel %vm447_vm3, %v5993_v63, %v5998_v13  ;;  %v453_v26 = vsel %vm447_vm3, %v5998_v13, %v5993_v63  ;;  %v448_v27 = vsel %vm447_vm3, %v5992_v3, %v5997_v21  ;;  %v452_v29 = vsel %vm447_vm3, %v5997_v21, %v5992_v3  ;;  %v6001_v30 = vpop.permute.xlu0 %6000  ;;  %5148 = vmatprep.subr.msk.bf16.mxu0 %vm6696_vm9, %v5147_v11 }
  0x96   : > { %v5153_v31 = vpack.c.bf16 %v449_v25, %v448_v27  ;;  %v6003_v32 = vunpack.i.h.bf16 %v6001_v30  ;;  %v6002_v33 = vunpack.i.l.bf16 %v6001_v30  ;;  %v6006_v34 = vpop.permute.xlu1 %6005  ;;  %v5156_v38 = vpack.c.bf16 %v453_v26, %v452_v29 }
  0x97   : > { %v6008_v35 = vunpack.i.h.bf16 %v6006_v34  ;;  %v6007_v37 = vunpack.i.l.bf16 %v6006_v34  ;;  %vm576_vm3 = vcmp.lt.s32.totalorder %v6626_v20, 240 }
  0x98   : > { %5151 = vmatpush1.bf16.msk.msra.mxu0 %vm5149_vm12, %v5150_v24  ;;  %vm6813_vm7 = vmpackc.low %vm576_vm3, %vm576_vm3 }
  0x99   : > { %v418_v39 = vsel %vm410_vm11, %v6008_v35, %v6003_v32  ;;  %v417_v40 = vsel %vm410_vm11, %v6007_v37, %v6002_v33  ;;  %v6011_v41 = vpop.permute.xlu0 %6010  ;;  %v413_v42 = vsel %vm410_vm11, %v6002_v33, %v6007_v37  ;;  %v414_v43 = vsel %vm410_vm11, %v6003_v32, %v6008_v35  ;;  %5154 = vmatprep.subr.msk.bf16.mxu0 %vm6696_vm9, %v5153_v31  ;;  %vm6837_vm10 = vmand %vm576_vm3, %vm6631_vm1 }
  0x9a   : > { %v6013_v45 = vunpack.i.h.bf16 %v6011_v41  ;;  %v6012_v46 = vunpack.i.l.bf16 %v6011_v41  ;;  %v6016_v47 = vpop.permute.xlu1 %6015  ;;  %v430_v48 = vpack.c.bf16 %v414_v43, %v413_v42  ;;  %v5159_v52 = vpack.c.bf16 %v418_v39, %v417_v40  ;;  %vm5182_vm1 = vmpackc.low %vm6837_vm10, %vm6837_vm10 }
  0x9b   : > { %v6018_v50 = vunpack.i.h.bf16 %v6016_v47  ;;  %v6017_v51 = vunpack.i.l.bf16 %v6016_v47 }
  0x9c   : > { %5157 = vmatpush1.bf16.msk.msra.mxu0 %vm5149_vm12, %v5156_v38  ;;  %vm6896_vm12 = vmpackc.low %vm6677_vm8, %vm6677_vm8  ;;  %vm725_vm8 = vcmask 261120  }
  0x9d   : > { %v416_v54 = vsel %vm410_vm11, %v6018_v50, %v6013_v45  ;;  %v415_v55 = vsel %vm410_vm11, %v6017_v51, %v6012_v46  ;;  %v6021_v56 = vpop.permute.xlu0 %6020  ;;  %v411_v58 = vsel %vm410_vm11, %v6012_v46, %v6017_v51  ;;  %v412_v59 = vsel %vm410_vm11, %v6013_v45, %v6018_v50  ;;  %740 = vmatprep.subr.bf16.mxu0 %v430_v48 }
  0x9e   : > { %v6023_v60 = vunpack.i.h.bf16 %v6021_v56  ;;  %v6022_v61 = vunpack.i.l.bf16 %v6021_v56  ;;  %v6026_v62 = vpop.permute.xlu1 %6025  ;;  %v428_v3 = vpack.c.bf16 %v412_v59, %v411_v58  ;;  %v5162_v13 = vpack.c.bf16 %v416_v54, %v415_v55 }
  0x9f   : > { %v6028_v7 = vunpack.i.h.bf16 %v6026_v62  ;;  %v6027_v11 = vunpack.i.l.bf16 %v6026_v62  ;;  %vm529_vm11 = vcmp.lt.s32.totalorder %v6623_v19, 127 }
  0xa0   : > { %5160 = vmatpush1.bf16.msk.msra.mxu0 %vm6756_vm14, %v5159_v52 }
  0xa1   : > { %v371_v21 = vsel %vm367_vm13, %v6023_v60, %v6028_v7  ;;  %v375_v22 = vsel %vm367_vm13, %v6028_v7, %v6023_v60  ;;  %v370_v23 = vsel %vm367_vm13, %v6022_v61, %v6027_v11  ;;  %v374_v24 = vsel %vm367_vm13, %v6027_v11, %v6022_v61  ;;  %v6031_v25 = vpop.permute.xlu0 %6030  ;;  %742 = vmatprep.subr.bf16.mxu0 %v428_v3 }
  0xa2   : > { %v5165_v26 = vpack.c.bf16 %v371_v21, %v370_v23  ;;  %v6033_v27 = vunpack.i.h.bf16 %v6031_v25  ;;  %v6032_v29 = vunpack.i.l.bf16 %v6031_v25  ;;  %v6036_v30 = vpop.permute.xlu1 %6035  ;;  %v5168_v34 = vpack.c.bf16 %v375_v22, %v374_v24 }
  0xa3   : > { %v6038_v31 = vunpack.i.h.bf16 %v6036_v30  ;;  %v6037_v32 = vunpack.i.l.bf16 %v6036_v30 }
  0xa4   : > { %5163 = vmatpush1.bf16.msk.msra.mxu0 %vm6756_vm14, %v5162_v13  ;;  %vm6479_vm14 = vmmov 0  }
  0xa5   : > { %v369_v35 = vsel %vm367_vm13, %v6033_v27, %v6038_v31  ;;  %v373_v37 = vsel %vm367_vm13, %v6038_v31, %v6033_v27  ;;  %v368_v38 = vsel %vm367_vm13, %v6032_v29, %v6037_v32  ;;  %v372_v39 = vsel %vm367_vm13, %v6037_v32, %v6032_v29  ;;  %v6041_v36 = vpop.permute.xlu0 %6040  ;;  %5166 = vmatprep.subr.msk.bf16.mxu0 %vm6655_vm4, %v5165_v26 }
  0xa6   : > { %v5171_v40 = vpack.c.bf16 %v369_v35, %v368_v38  ;;  %v6043_v41 = vunpack.i.h.bf16 %v6041_v36  ;;  %v6042_v42 = vunpack.i.l.bf16 %v6041_v36  ;;  %v6046_v43 = vpop.permute.xlu1 %6045  ;;  %v5174_v47 = vpack.c.bf16 %v373_v37, %v372_v39 }
  0xa7   : > { %v6048_v45 = vunpack.i.h.bf16 %v6046_v43  ;;  %v6047_v46 = vunpack.i.l.bf16 %v6046_v43  ;;  %vm644_vm13 = vcmp.lt.s32.totalorder %v6623_v19, 111 }
  0xa8   : > { %5169 = vmatpush1.bf16.msk.msra.mxu0 %vm5167_vm2, %v5168_v34 }
  0xa9   : > { %v615_v48 = vsel %vm607_vm0, %v6048_v45, %v6043_v41  ;;  %v614_v50 = vsel %vm607_vm0, %v6047_v46, %v6042_v42  ;;  %v6051_v51 = vpop.permute.xlu0 %6050  ;;  %v610_v52 = vsel %vm607_vm0, %v6042_v42, %v6047_v46  ;;  %v611_v54 = vsel %vm607_vm0, %v6043_v41, %v6048_v45  ;;  %5172 = vmatprep.subr.msk.bf16.mxu0 %vm6655_vm4, %v5171_v40 }
  0xaa   : > { %v5177_v55 = vpack.c.bf16 %v615_v48, %v614_v50  ;;  %v6053_v56 = vunpack.i.h.bf16 %v6051_v51  ;;  %v6052_v58 = vunpack.i.l.bf16 %v6051_v51  ;;  %v6056_v59 = vpop.permute.xlu1 %6055  ;;  %v626_v63 = vpack.c.bf16 %v611_v54, %v610_v52 }
  0xab   : > { %v6058_v60 = vunpack.i.h.bf16 %v6056_v59  ;;  %v6057_v61 = vunpack.i.l.bf16 %v6056_v59  ;;  %vm566_vm4 = vcmp.lt.s32.totalorder %v6623_v19, 113  ;;  %v6147_v19 = vld [vmem:[%s8672_s1 + $0x8] ss:$12 sps:$4 sm:$0xff]  }
  0xac   : > { %5175 = vmatpush1.bf16.msk.msra.mxu0 %vm5167_vm2, %v5174_v47  ;;  %vm2786_vm2 = vcmask 400384  }
  0xad   : > { %v613_v3 = vsel %vm607_vm0, %v6058_v60, %v6053_v56  ;;  %v612_v7 = vsel %vm607_vm0, %v6057_v61, %v6052_v58  ;;  %v6061_v44 = vpop.permute.xlu0 %6060  ;;  %v608_v11 = vsel %vm607_vm0, %v6052_v58, %v6057_v61  ;;  %v609_v13 = vsel %vm607_vm0, %v6053_v56, %v6058_v60  ;;  %5178 = vmatprep.subr.msk.bf16.mxu0 %vm6813_vm7, %v5177_v55 }
  0xae   : > { %v6063_v21 = vunpack.i.h.bf16 %v6061_v44  ;;  %v6062_v22 = vunpack.i.l.bf16 %v6061_v44  ;;  %v6066_v23 = vpop.permute.xlu1 %6065  ;;  %v5180_v24 = vpack.c.bf16 %v613_v3, %v612_v7  ;;  %v624_v27 = vpack.c.bf16 %v609_v13, %v608_v11 }
  0xaf   : > { %v6068_v25 = vunpack.i.h.bf16 %v6066_v23  ;;  %v6067_v26 = vunpack.i.l.bf16 %v6066_v23  ;;  %vm1520_vm0 = vcmask 31744  }
  0xb0   : > { %749 = vmatpush2.bf16.msra.mxu0 %v626_v63 }
  0xb1   : > { %v570_v30 = vsel %vm566_vm4, %v6063_v21, %v6068_v25  ;;  %v574_v31 = vsel %vm566_vm4, %v6068_v25, %v6063_v21  ;;  %v569_v32 = vsel %vm566_vm4, %v6062_v22, %v6067_v26  ;;  %v573_v33 = vsel %vm566_vm4, %v6067_v26, %v6062_v22  ;;  %v6071_v28 = vpop.permute.xlu0 %6070  ;;  %5181 = vmatprep.subr.msk.bf16.mxu0 %vm6813_vm7, %v5180_v24 }
  0xb2   : > { %v6073_v34 = vunpack.i.h.bf16 %v6071_v28  ;;  %v6072_v35 = vunpack.i.l.bf16 %v6071_v28  ;;  %v6076_v37 = vpop.permute.xlu1 %6075  ;;  %v5183_v38 = vpack.c.bf16 %v574_v31, %v573_v33  ;;  %v5186_v40 = vpack.c.bf16 %v570_v30, %v569_v32 }
  0xb3   : > { %v6078_v39 = vunpack.i.h.bf16 %v6076_v37  ;;  %v6077_v36 = vunpack.i.l.bf16 %v6076_v37  ;;  %v512_v28 = vpack.c.bf16 %v6574_v6, %v6571_v5 }
  0xb4   : > { %751 = vmatpush2.bf16.msra.mxu0 %v624_v27 }
  0xb5   : > { %v568_v41 = vsel %vm566_vm4, %v6073_v34, %v6078_v39  ;;  %v572_v42 = vsel %vm566_vm4, %v6078_v39, %v6073_v34  ;;  %v567_v43 = vsel %vm566_vm4, %v6072_v35, %v6077_v36  ;;  %v571_v45 = vsel %vm566_vm4, %v6077_v36, %v6072_v35  ;;  %v6081_v46 = vpop.permute.xlu0 %6080  ;;  %5184 = vmatprep.subr.msk.bf16.mxu0 %vm5182_vm1, %v5183_v38 }
  0xb6   : > { %v6083_v47 = vunpack.i.h.bf16 %v6081_v46  ;;  %v6082_v48 = vunpack.i.l.bf16 %v6081_v46  ;;  %v6086_v50 = vpop.permute.xlu1 %6085  ;;  %v5189_v51 = vpack.c.bf16 %v572_v42, %v571_v45  ;;  %v5192_v55 = vpack.c.bf16 %v568_v41, %v567_v43 }
  0xb7   : > { %v6088_v52 = vunpack.i.h.bf16 %v6086_v50  ;;  %v6087_v54 = vunpack.i.l.bf16 %v6086_v50  ;;  %v511_v42 = vpack.c.bf16 %v6560_v1, %v6557_v0 }
  0xb8   : > { %5187 = vmatpush2.bf16.msk.msra.mxu0 %vm6662_vm5, %v5186_v40 }
  0xb9   : > { %v533_v56 = vsel %vm529_vm11, %v6083_v47, %v6088_v52  ;;  %v537_v58 = vsel %vm529_vm11, %v6088_v52, %v6083_v47  ;;  %v532_v59 = vsel %vm529_vm11, %v6082_v48, %v6087_v54  ;;  %v536_v60 = vsel %vm529_vm11, %v6087_v54, %v6082_v48  ;;  %v6091_v61 = vpop.permute.xlu0 %6090  ;;  %5190 = vmatprep.subr.msk.bf16.mxu0 %vm5182_vm1, %v5189_v51 }
  0xba   : > { %v6093_v62 = vunpack.i.h.bf16 %v6091_v61  ;;  %v6092_v63 = vunpack.i.l.bf16 %v6091_v61  ;;  %v6096_v3 = vpop.permute.xlu1 %6095  ;;  %v5195_v7 = vpack.c.bf16 %v537_v58, %v536_v60  ;;  %v5198_v13 = vpack.c.bf16 %v533_v56, %v532_v59 }
  0xbb   : > { %v6098_v44 = vunpack.i.h.bf16 %v6096_v3  ;;  %v6097_v11 = vunpack.i.l.bf16 %v6096_v3  ;;  %v510_v47 = vpack.c.bf16 %v6582_v9, %v6579_v8  ;;  %v509_v48 = vpack.c.bf16 %v6568_v4, %v6563_v2  ;;  %v6148_v8 = vld [vmem:[%s8672_s1] ss:$12 sps:$4 sm:$0xff]   ;;  %v6152_v9 = vld [vmem:[%s8672_s1 + $0x1c] ss:$12 sps:$4 sm:$0xff]   ;;  %v6154_v4 = vld [vmem:[%s8672_s1 + $0x18] ss:$12 sps:$4 sm:$0xff]  }
  0xbc   : > { %5193 = vmatpush2.bf16.msk.msra.mxu0 %vm6662_vm5, %v5192_v55  ;;  %vm6907_vm5 = vmand %vm576_vm3, %vm6666_vm6  ;;  %v6151_v2 = vld [vmem:[%s8672_s1 + $0x20] ss:$12 sps:$4 sm:$0xff]   ;;  %vm2805_vm3 = vcmask 393216  }
  0xbd   : > { %v531_v21 = vsel %vm529_vm11, %v6093_v62, %v6098_v44  ;;  %v535_v22 = vsel %vm529_vm11, %v6098_v44, %v6093_v62  ;;  %v530_v23 = vsel %vm529_vm11, %v6092_v63, %v6097_v11  ;;  %v534_v24 = vsel %vm529_vm11, %v6097_v11, %v6092_v63  ;;  %v6101_v25 = vpop.permute.xlu0 %6100  ;;  %5196 = vmatprep.subr.msk.bf16.mxu0 %vm6696_vm9, %v5195_v7  ;;  %vm5206_vm6 = vmpackc.low %vm6907_vm5, %vm6907_vm5 }
  0xbe   : > { %v6103_v27 = vunpack.i.h.bf16 %v6101_v25  ;;  %v6102_v29 = vunpack.i.l.bf16 %v6101_v25  ;;  %v6106_v30 = vpop.permute.xlu1 %6105  ;;  %v5201_v31 = vpack.c.bf16 %v535_v22, %v534_v24  ;;  %v5204_v33 = vpack.c.bf16 %v531_v21, %v530_v23 }
  0xbf   : > { %v6108_v57 = vunpack.i.h.bf16 %v6106_v30  ;;  %v6107_v32 = vunpack.i.l.bf16 %v6106_v30 }
  0xc0   : > { %5199 = vmatpush2.bf16.msk.msra.mxu0 %vm6896_vm12, %v5198_v13 }
  0xc1   : > { %v6111_v34 = vpop.permute.xlu0 %6110  ;;  %v651_v35 = vsel %vm644_vm13, %v6107_v32, %v6102_v29  ;;  %v652_v20 = vsel %vm644_vm13, %v6108_v57, %v6103_v27  ;;  %v647_v53 = vsel %vm644_vm13, %v6102_v29, %v6107_v32  ;;  %v648_v5 = vsel %vm644_vm13, %v6103_v27, %v6108_v57  ;;  %5202 = vmatprep.subr.msk.bf16.mxu0 %vm6696_vm9, %v5201_v31 }
  0xc2   : > { %v6113_v6 = vunpack.i.h.bf16 %v6111_v34  ;;  %v6112_v37 = vunpack.i.l.bf16 %v6111_v34  ;;  %v6116_v38 = vpop.permute.xlu1 %6115  ;;  %v5207_v39 = vpack.c.bf16 %v652_v20, %v651_v35  ;;  %v5210_v36 = vpack.c.bf16 %v648_v5, %v647_v53 }
  0xc3   : > { %v6118_v40 = vunpack.i.h.bf16 %v6116_v38  ;;  %v6117_v41 = vunpack.i.l.bf16 %v6116_v38  ;;  %vm874_vm9 = vcmask 7168  }
  0xc4   : > { %5208 = vmatprep.subr.msk.bf16.mxu1 %vm5206_vm6, %v5207_v39  ;;  %5205 = vmatpush2.bf16.msk.msra.mxu0 %vm6896_vm12, %v5204_v33 }
  0xc5   : > { %v646_v43 = vsel %vm644_vm13, %v6113_v6, %v6118_v40  ;;  %v650_v10 = vsel %vm644_vm13, %v6118_v40, %v6113_v6  ;;  %v645_v45 = vsel %vm644_vm13, %v6112_v37, %v6117_v41  ;;  %v649_v46 = vsel %vm644_vm13, %v6117_v41, %v6112_v37  ;;  %5211 = vmatpush1.bf16.msk.msra.mxu1 %vm6896_vm12, %v5210_v36 }
  0xc6   : > { %760 = vmatprep.subr.bf16.mxu0 %v512_v28  ;;  %v5213_v0 = vpack.c.bf16 %v650_v10, %v649_v46  ;;  %v5216_v1 = vpack.c.bf16 %v646_v43, %v645_v45 }
  0xc8   : > { %5214 = vmatprep.subr.msk.bf16.mxu1 %vm5206_vm6, %v5213_v0  ;;  %761 = vmatpush2.bf16.msra.mxu0 %v511_v42  ;;  %vm4952_vm6 = vcmask 1040384  }
  0xc9   : > { %5217 = vmatpush1.bf16.msk.msra.mxu1 %vm6896_vm12, %v5216_v1  ;;  %762 = vmatprep.subr.bf16.mxu0 %v510_v47 }
  0xcc   : > { %5218 = vmatmul.mubr.msk.bf16.vlgmr.msra.gmra.mxu1 %vm725_vm8, %v6147_v19  ;;  %763 = vmatpush2.bf16.msra.mxu0 %v509_v48  ;;  %v870_v19 = vld [vmem:[%s8673_s2] sm:$0xff] }
  0xcd   : > { %827 = vmatprep.mubr.bf16.mxu1 %v6475_v12 }
  0xce   : > { %v693_v7 = vpop.permute.xlu0 %692 }
  0xcf   : > { %765 = vmatmul.mubr.bf16.vlgmr.msra.gmra.mxu0 %v6148_v8  ;;  %v688_v59 = vpop.permute.xlu1 %687 }
  0xd0   : > { %774 = vmatprep.mubr.bf16.mxu0 %v6152_v9 }
  0xd2   : > { %v678_v33 = vpop.permute.xlu0 %677 }
  0xd3   : > { %v683_v11 = vpop.permute.xlu1 %682 }
  0xd4   : > { %5219 = vmatmul.mubr.msk.bf16.gmra.mxu1 %vm725_vm8, %v6151_v2 }
  0xd5   : > { %5578 = vmatprep.mubr.msk.f32.mxu1 %vm725_vm8, %v870_v19 }
  0xd7   : > { %775 = vmatmul.mubr.bf16.gmra.mxu0 %v6154_v4 }
 0x18c   : > { %v819_v50 = vpop.f32.mrf.mxu1 }
 0x18e   : > { %v821_v51 = vpop.f32.mrf.mxu1 }
 0x18f   : > { %v766_v52 = vpop.f32.mrf.mxu0 }
 0x190   : > { %v823_v54 = vpop.f32.mrf.mxu1  ;;  %v767_v5 = vadd.f32 %v766_v52, %v678_v33 }
 0x191   : > { %v768_v55 = vpop.f32.mrf.mxu0 }
 0x192   : > { %v825_v56 = vpop.f32.mrf.mxu1  ;;  %v769_v34 = vadd.f32 %v768_v55, %v678_v33  ;;  %v7004_v42 = vadd.f32 %v819_v50, %v767_v5  ;;  %v1139_v33 = vld [vmem:[%s8674_s3 + $0x58] sm:$0xff]  ;;  %v1137_v5 = vld [vmem:[%s8674_s3 + $0x48] sm:$0xff] }
 0x193   : > { %v770_v58 = vpop.f32.mrf.mxu0 }
 0x194   : > { %v829_v60 = vpop.f32.mrf.mxu1  ;;  %v771_v27 = vadd.f32 %v770_v58, %v683_v11  ;;  %v6998_v39 = vadd.f32 %v821_v51, %v769_v34  ;;  %v850_v0 = vmul.f32 %v7004_v42, %v7004_v42  ;;  %v1138_v34 = vld [vmem:[%s8674_s3 + $0x50] sm:$0xff] }
 0x195   : > { %v772_v61 = vpop.f32.mrf.mxu0 }
 0x196   : > { %v831_v62 = vpop.f32.mrf.mxu1  ;;  %v773_v24 = vadd.f32 %v772_v61, %v683_v11  ;;  %v6992_v6 = vadd.f32 %v823_v54, %v771_v27  ;;  %v851_v46 = vmul.f32 %v6998_v39, %v6998_v39  ;;  %v838_v47 = vadd.f32 %v6998_v39, %v7004_v42  ;;  %v873_v61 = vld [vmem:[%s8673_s2 + $0x18] sm:$0xff] }
 0x197   : > { %v776_v63 = vpop.f32.mrf.mxu0  ;;  %v1143_v27 = vld [vmem:[%s8674_s3 + $0x78] sm:$0xff] }
 0x198   : > { %v777_v3 = vadd.f32 %v776_v63, %v688_v59  ;;  %v833_v22 = vpop.f32.mrf.mxu1  ;;  %v6988_v35 = vadd.f32 %v825_v56, %v773_v24  ;;  %v852_v43 = vmul.f32 %v6992_v6, %v6992_v6  ;;  %v858_v1 = vadd.f32 %v851_v46, %v850_v0 }
 0x199   : > { %v778_v44 = vpop.f32.mrf.mxu0  ;;  %v6477_v24 = vmov 1  }
 0x19a   : > { %v6976_v13 = vadd.f32 %v829_v60, %v777_v3  ;;  %v779_v21 = vadd.f32 %v778_v44, %v688_v59  ;;  %v835_v28 = vpop.f32.mrf.mxu1  ;;  %v853_v41 = vmul.f32 %v6988_v35, %v6988_v35  ;;  %v841_v45 = vadd.f32 %v6988_v35, %v6992_v6  ;;  %v871_v59 = vld [vmem:[%s8673_s2 + $0x8] sm:$0xff]  ;;  %v872_v60 = vld [vmem:[%s8673_s2 + $0x10] sm:$0xff] }
 0x19b   : > { %v780_v23 = vpop.f32.mrf.mxu0 }
 0x19c   : > { %v6978_v25 = vadd.f32 %v831_v62, %v779_v21  ;;  %v781_v26 = vadd.f32 %v780_v23, %v693_v7  ;;  %v854_v30 = vmul.f32 %v6976_v13, %v6976_v13  ;;  %v861_v10 = vadd.f32 %v853_v41, %v852_v43  ;;  %v1150_v41 = vld [vmem:[%s8674_s3 + $0xb0] sm:$0xff] }
 0x19d   : > { %v782_v29 = vpop.f32.mrf.mxu0  ;;  %v6476_v23 = vmov 2   ;;  %v1134_v43 = vld [vmem:[%s8674_s3 + $0x30] sm:$0xff] }
 0x19e   : > { %v6982_v31 = vadd.f32 %v833_v22, %v781_v26  ;;  %v783_v49 = vadd.f32 %v782_v29, %v693_v7  ;;  %v844_v57 = vadd.f32 %v6978_v25, %v6976_v13  ;;  %v855_v32 = vmul.f32 %v6978_v25, %v6978_v25  ;;  %v1159_v26 = vld [vmem:[%s8674_s3 + $0xf8] sm:$0xff]  ;;  %v1158_v29 = vld [vmem:[%s8674_s3 + $0xf0] sm:$0xff] }
 0x1a0   : > { %v6990_v20 = vadd.f32 %v835_v28, %v783_v49  ;;  %845 = vadd.xlane.f32.xlu0 %v844_v57  ;;  %v864_v53 = vadd.f32 %v855_v32, %v854_v30  ;;  %v856_v37 = vmul.f32 %v6982_v31, %v6982_v31  ;;  %v1141_v30 = vld [vmem:[%s8674_s3 + $0x68] sm:$0xff]  ;;  %v1156_v49 = vld [vmem:[%s8674_s3 + $0xe0] sm:$0xff]  ;;  %v1155_v32 = vld [vmem:[%s8674_s3 + $0xd8] sm:$0xff] }
 0x1a1   : > { %v1140_v57 = vld [vmem:[%s8674_s3 + $0x60] sm:$0xff]  ;;  %v1154_v28 = vld [vmem:[%s8674_s3 + $0xd0] sm:$0xff] }
 0x1a2   : > { %865 = vadd.xlane.f32.xlu1 %v864_v53  ;;  %v857_v38 = vmul.f32 %v6990_v20, %v6990_v20  ;;  %v847_v36 = vadd.f32 %v6990_v20, %v6982_v31  ;;  %v1153_v53 = vld [vmem:[%s8674_s3 + $0xc8] sm:$0xff] }
 0x1a4   : > { %v867_v40 = vadd.f32 %v857_v38, %v856_v37  ;;  %v1152_v37 = vld [vmem:[%s8674_s3 + $0xc0] sm:$0xff] }
 0x1a5   : > { %v1136_v38 = vld [vmem:[%s8674_s3 + $0x40] sm:$0xff] }
 0x1a6   : > { %848 = vadd.xlane.f32.xlu1 %v847_v36  ;;  %868 = vadd.xlane.f32.xlu0 %v867_v40  ;;  %v1151_v36 = vld [vmem:[%s8674_s3 + $0xb8] sm:$0xff] }
 0x1a7   : > { %v1135_v40 = vld [vmem:[%s8674_s3 + $0x38] sm:$0xff] }
 0x1aa   : > { %862 = vadd.xlane.f32.xlu1 %v861_v10  ;;  %842 = vadd.xlane.f32.xlu0 %v841_v45  ;;  %v1149_v10 = vld [vmem:[%s8674_s3 + $0xa8] sm:$0xff] }
 0x1ae   : > { %859 = vadd.xlane.f32.xlu1 %v858_v1  ;;  %839 = vadd.xlane.f32.xlu0 %v838_v47 }
 0x229   : > { %v846_v48 = vpop.xlane.xlu0 %845 }
 0x22b   : > { %v866_v8 = vpop.xlane.xlu1 %865 }
 0x22c   : > { %v877_v50 = vsel %vm874_vm9, %v846_v48, %v866_v8 }
 0x22f   : > { %v849_v9 = vpop.xlane.xlu1 %848  ;;  %v869_v2 = vpop.xlane.xlu0 %868 }
 0x230   : > { %v878_v4 = vsel %vm874_vm9, %v849_v9, %v869_v2 }
 0x231   : > { %5570 = vmatprep.subr.mxu1 %v878_v4 }
 0x232   : > { %5571 = vmatpush3.msra.mxu1 %v878_v4 }
 0x233   : > { %5572 = vmatprep.subr.mxu1 %v877_v50  ;;  %v863_v51 = vpop.xlane.xlu1 %862  ;;  %v843_v52 = vpop.xlane.xlu0 %842 }
 0x234   : > { %5573 = vmatpush3.msra.mxu1 %v877_v50  ;;  %v876_v54 = vsel %vm874_vm9, %v843_v52, %v863_v51  ;;  %v1133_v51 = vld [vmem:[%s8674_s3 + $0x28] sm:$0xff]  ;;  %v1148_v52 = vld [vmem:[%s8674_s3 + $0xa0] sm:$0xff] }
 0x235   : > { %5574 = vmatprep.subr.mxu1 %v876_v54 }
 0x236   : > { %5575 = vmatpush3.msra.mxu1 %v876_v54  ;;  %v1132_v54 = vld [vmem:[%s8674_s3 + $0x20] sm:$0xff] }
 0x237   : > { %v860_v55 = vpop.xlane.xlu1 %859  ;;  %v840_v56 = vpop.xlane.xlu0 %839 }
 0x238   : > { %v875_v58 = vsel %vm874_vm9, %v840_v56, %v860_v55  ;;  %v1147_v56 = vld [vmem:[%s8674_s3 + $0x98] sm:$0xff] }
 0x239   : > { %5576 = vmatprep.subr.mxu1 %v875_v58 }
 0x23a   : > { %5577 = vmatpush3.msra.mxu1 %v875_v58  ;;  %v1131_v58 = vld [vmem:[%s8674_s3 + $0x18] sm:$0xff] }
 0x23b   : > { %5579 = vmatmul.mubr.msk.f32.vlgmr.msra.gmra.mxu1 %vm725_vm8, %v871_v59  ;;  %5386 = vmatprep.subr.mxu1 %v1159_v26  ;;  %v1146_v59 = vld [vmem:[%s8674_s3 + $0x90] sm:$0xff] }
 0x23c   : > { %5581 = vmatprep.mubr.msk.f32.mxu1 %vm725_vm8, %v872_v60  ;;  %5387 = vmatpush3.msra.mxu1 %v1143_v27  ;;  %v1130_v60 = vld [vmem:[%s8674_s3 + $0x10] sm:$0xff] }
 0x23d   : > { %5388 = vmatprep.subr.mxu1 %v1158_v29 }
 0x23f   : > { %5582 = vmatmul.mubr.msk.f32.gmra.mxu1 %vm725_vm8, %v873_v61 }
 0x2fb   : > { %v7032_v62 = vpop.f32.mrf.mxu1 }
 0x2fc   : > { %v977_v63 = vmul.f32 %v7032_v62, %v7032_v62 }
 0x2fd   : > { %v7036_v3 = vpop.f32.mrf.mxu1 }
 0x2fe   : > { %v976_v7 = vmul.f32 %v7036_v3, %v7036_v3  ;;  %986 = vrot.lane.b32.xlu1 %v977_v63, %s6467_s15 }
 0x2ff   : > { %v7041_v44 = vpop.f32.mrf.mxu1 }
 0x300   : > { %984 = vrot.lane.b32.xlu0 %v976_v7, %s6467_s15  ;;  %v979_v21 = vmul.f32 %v7041_v44, %v7041_v44  ;;  %v1144_v7 = vld [vmem:[%s8674_s3 + $0x80] sm:$0xff] }
 0x301   : > { %v7044_v11 = vpop.f32.mrf.mxu1 }
 0x302   : > { %v978_v22 = vmul.f32 %v7044_v11, %v7044_v11 }
 0x304   : > { %990 = vrot.lane.b32.xlu0 %v979_v21, %s6467_s15  ;;  %988 = vrot.lane.b32.xlu1 %v978_v22, %s6467_s15 }
 0x308   : > { %1012 = vperm.xlu0 %6119, %v7044_v11   ;;  %1002 = vperm.xlu1 %6120, %v7036_v3  }
 0x30c   : > { %1007 = vperm.xlu1 %6120, %v7032_v62   ;;  %6124 = vset.pattern.permute.xlu0 %v6476_v23 }
 0x30d   : > { %1093 = vperm.xlu0 %6124, %v6618_v17  }
 0x310   : > { %6121 = vset.pattern.permute.xlu1 %v6477_v24 }
 0x311   : > { %1065 = vperm.xlu1 %6121, %v6613_v16   ;;  %6125 = vset.pattern.permute.xlu0 %v6477_v24 }
 0x315   : > { %6122 = vset.pattern.permute.xlu1 %v6476_v23 }
 0x316   : > { %1089 = vperm.xlu1 %6122, %v6613_v16   ;;  %v1142_v16 = vld [vmem:[%s8674_s3 + $0x70] sm:$0xff] }
 0x317   : > { %5389 = vmatpush3.msra.mxu1 %v1142_v16 }
 0x31a   : > { %6123 = vset.pattern.permute.xlu1 %v6477_v24 }
 0x31b   : > { %1069 = vperm.xlu1 %6123, %v6618_v17   ;;  %v1157_v17 = vld [vmem:[%s8674_s3 + $0xe8] sm:$0xff] }
 0x31c   : > { %5390 = vmatprep.subr.mxu1 %v1157_v17 }
 0x31d   : > { %5391 = vmatpush3.msra.mxu1 %v1141_v30 }
 0x31e   : > { %5392 = vmatprep.subr.mxu1 %v1156_v49 }
 0x31f   : > { %6126 = vset.pattern.permute.xlu1 %v6475_v12  ;;  %5393 = vmatpush3.msra.mxu1 %v1140_v57 }
 0x320   : > { %1017 = vperm.xlu1 %6126, %v7041_v44   ;;  %5394 = vmatprep.subr.mxu1 %v1155_v32 }
 0x321   : > { %5395 = vmatpush3.msra.mxu1 %v1139_v33 }
 0x322   : > { %5396 = vmatprep.subr.mxu1 %v1154_v28 }
 0x323   : > { %5397 = vmatpush3.msra.mxu1 %v1138_v34 }
 0x324   : > { %6127 = vset.pattern.permute.xlu1 %v6477_v24  ;;  %5398 = vmatprep.subr.mxu1 %v1153_v53 }
 0x325   : > { %1073 = vperm.xlu1 %6127, %v6606_v15   ;;  %5399 = vmatpush3.msra.mxu1 %v1137_v5 }
 0x326   : > { %5400 = vmatprep.subr.mxu1 %v1152_v37 }
 0x327   : > { %5401 = vmatpush3.msra.mxu1 %v1136_v38 }
 0x328   : > { %5402 = vmatprep.subr.mxu1 %v1151_v36 }
 0x329   : > { %5403 = vmatpush3.msra.mxu1 %v1135_v40 }
 0x32a   : > { %5404 = vmatprep.subr.mxu1 %v1150_v41 }
 0x32b   : > { %5405 = vmatpush3.msra.mxu1 %v1134_v43 }
 0x32c   : > { %5406 = vmatprep.subr.mxu1 %v1149_v10 }
 0x32d   : > { %5407 = vmatpush3.msra.mxu1 %v1133_v51 }
 0x32e   : > { %5408 = vmatprep.subr.mxu1 %v1148_v52 }
 0x32f   : > { %5409 = vmatpush3.msra.mxu1 %v1132_v54 }
 0x330   : > { %5410 = vmatprep.subr.mxu1 %v1147_v56 }
 0x331   : > { %5411 = vmatpush3.msra.mxu1 %v1131_v58  ;;  %v6449_v58 = vld [vmem:[%s6554_s14 + $0x18] sm:$0xff] }
 0x332   : > { %5412 = vmatprep.subr.mxu1 %v1146_v59 }
 0x333   : > { %5413 = vmatpush3.msra.mxu1 %v1130_v60  ;;  %v6450_v60 = vld [vmem:[%s6554_s14 + $0x10] sm:$0xff] }
 0x370   : > { %v987_v45 = vpop.permute.xlu1 %986 }
 0x371   : > { %v997_v0 = vsub.f32 %v7032_v62, %v987_v45  ;;  %v1145_v62 = vld [vmem:[%s8674_s3 + $0x88] sm:$0xff] }
 0x372   : > { %v985_v46 = vpop.permute.xlu0 %984  ;;  %5414 = vmatprep.subr.mxu1 %v1145_v62 }
 0x373   : > { %v996_v1 = vsub.f32 %v7036_v3, %v985_v46  ;;  %v1029_v8 = vadd.f32 1e-05, %v997_v0  ;;  %v1129_v3 = vld [vmem:[%s8674_s3 + $0x8] sm:$0xff]  ;;  %v6447_v0 = vld [vmem:[%s6554_s14] sm:$0xff] }
 0x374   : > { %5415 = vmatpush3.msra.mxu1 %v1129_v3  ;;  %v6451_v3 = vld [vmem:[%s6554_s14 + $0x28] sm:$0xff] }
 0x375   : > { %v1028_v47 = vadd.f32 1e-05, %v996_v1  ;;  %5416 = vmatprep.subr.mxu1 %v1144_v7  ;;  %v6448_v1 = vld [vmem:[%s6554_s14 + $0x8] sm:$0xff] }
 0x376   : > { %v991_v19 = vpop.permute.xlu0 %990  ;;  %v989_v48 = vpop.permute.xlu1 %988 }
 0x377   : > { %6163 = vrsqrt.f32 %v1028_v47  ;;  %v999_v9 = vsub.f32 %v7041_v44, %v991_v19  ;;  %v998_v2 = vsub.f32 %v7044_v11, %v989_v48  ;;  %v1128_v44 = vld [vmem:[%s8674_s3] sm:$0xff] }
 0x378   : > { %6165 = vrsqrt.f32 %v1029_v8  ;;  %5417 = vmatpush3.msra.mxu1 %v1128_v44 }
 0x379   : > { %v1030_v4 = vadd.f32 1e-05, %v998_v2  ;;  %v1031_v50 = vadd.f32 1e-05, %v999_v9 }
 0x37b   : > { %6167 = vrsqrt.f32 %v1030_v4 }
 0x37c   : > { %6169 = vrsqrt.f32 %v1031_v50 }
 0x383   : > { %v1003_v21 = vpop.permute.xlu1 %1002  ;;  %v1013_v16 = vpop.permute.xlu0 %1012 }
 0x384   : > { %v6164_v55 = vpop.eup %6163  ;;  %v1021_v30 = vsub.f32 %v6998_v39, %v1003_v21  ;;  %v1024_v34 = vsub.f32 %v6976_v13, %v1013_v16  ;;  %v1025_v53 = vsub.f32 %v6978_v25, %v1013_v16  ;;  %v6453_v16 = vld [vmem:[%s6554_s14 + $0x38] sm:$0xff] }
 0x385   : > { %1038 = vperm.xlu0 %6125, %v6164_v55   ;;  %v6166_v61 = vpop.eup %6165 }
 0x387   : > { %v1008_v22 = vpop.permute.xlu1 %1007 }
 0x388   : > { %v6168_v63 = vpop.eup %6167  ;;  %v1094_v17 = vpop.permute.xlu0 %1093  ;;  %v1022_v32 = vsub.f32 %v6992_v6, %v1008_v22 }
 0x389   : > { %1043 = vperm.xlu0 %6125, %v6166_v61   ;;  %1048 = vperm.xlu1 %6127, %v6168_v63   ;;  %v6170_v11 = vpop.eup %6169 }
 0x38c   : > { %v1066_v26 = vpop.permute.xlu1 %1065 }
 0x38d   : > { %1053 = vperm.xlu0 %6125, %v6170_v11   ;;  %6128 = vset.pattern.permute.xlu1 %v6476_v23 }
 0x38e   : > { %1097 = vperm.xlu1 %6128, %v6606_v15  }
 0x391   : > { %6130 = vset.pattern.permute.xlu0 %v6476_v23  ;;  %v1090_v27 = vpop.permute.xlu1 %1089  ;;  %v1020_v23 = vsub.f32 %v7004_v42, %v1003_v21 }
 0x392   : > { %1101 = vperm.xlu0 %6130, %v6601_v14   ;;  %6129 = vset.pattern.permute.xlu1 %v6477_v24 }
 0x393   : > { %1077 = vperm.xlu1 %6129, %v6601_v14  }
 0x396   : > { %6132 = vset.pattern.permute.xlu0 %v6475_v12  ;;  %v1070_v29 = vpop.permute.xlu1 %1069 }
 0x397   : > { %6131 = vset.pattern.permute.xlu1 %v6475_v12  ;;  %v1023_v12 = vsub.f32 %v6988_v35, %v1008_v22  ;;  %v6452_v22 = vld [vmem:[%s6554_s14 + $0x20] sm:$0xff] }
 0x39b   : > { %v1018_v15 = vpop.permute.xlu1 %1017 }
 0x39c   : > { %v1026_v4 = vsub.f32 %v6982_v31, %v1018_v15  ;;  %v1027_v50 = vsub.f32 %v6990_v20, %v1018_v15  ;;  %v6454_v15 = vld [vmem:[%s6554_s14 + $0x30] sm:$0xff]  ;;  %s332_s14 = scalar_lea.vmem %s8680_s9, %s5376_s11 }
 0x3a0   : > { %v1074_v49 = vpop.permute.xlu1 %1073 }
 0x400   : > { %v1039_v24 = vpop.permute.xlu0 %1038 }
 0x401   : > { %v1056_v57 = vmul.f32 %v1039_v24, %v1020_v23  ;;  %v1057_v14 = vmul.f32 %v1039_v24, %v1021_v30  ;;  %v6155_v30 = vld [vmem:[%s8675_s4] sm:$0xff]   ;;  %v1260_v24 = vld [vmem:[%s8676_s5 + $0x8] sm:$0xff] }
 0x402   : > { %1278 = vperm.xlu0 %6132, %v1260_v24  }
 0x403   : > { %v1080_v33 = vmul.f32 %v1066_v26, %v1056_v57  ;;  %v1081_v28 = vmul.f32 %v1066_v26, %v1057_v14  ;;  %v1263_v57 = vld [vmem:[%s8676_s5 + $0x20] sm:$0xff]  ;;  %v1261_v14 = vld [vmem:[%s8676_s5 + $0x10] sm:$0xff] }
 0x404   : > { %v1044_v5 = vpop.permute.xlu0 %1043  ;;  %v1049_v38 = vpop.permute.xlu1 %1048 }
 0x405   : > { %v1104_v42 = vadd.f32 %v1090_v27, %v1080_v33  ;;  %v1058_v37 = vmul.f32 %v1044_v5, %v1022_v32  ;;  %v1059_v39 = vmul.f32 %v1044_v5, %v1023_v12  ;;  %v1105_v36 = vadd.f32 %v1090_v27, %v1081_v28  ;;  %v1262_v32 = vld [vmem:[%s8676_s5 + $0x18] sm:$0xff]  ;;  %v1264_v12 = vld [vmem:[%s8676_s5 + $0x28] sm:$0xff]  ;;  %v1265_v33 = vld [vmem:[%s8676_s5 + $0x30] sm:$0xff] }
 0x406   : > { %v1060_v40 = vmul.f32 %v1049_v38, %v1024_v34  ;;  %v1061_v41 = vmul.f32 %v1049_v38, %v1025_v53  ;;  %1283 = vperm.xlu0 %6132, %v1261_v14  }
 0x407   : > { %v1112_v43 = vmax.f32 %v1104_v42, 0.0  ;;  %v1082_v6 = vmul.f32 %v1070_v29, %v1058_v37  ;;  %v1083_v10 = vmul.f32 %v1070_v29, %v1059_v39  ;;  %v1113_v35 = vmax.f32 %v1105_v36, 0.0 }
 0x408   : > { %v1084_v45 = vmul.f32 %v1074_v49, %v1060_v40  ;;  %v1085_v46 = vmul.f32 %v1074_v49, %v1061_v41  ;;  %v1054_v8 = vpop.permute.xlu0 %1053  ;;  %v1259_v49 = vld [vmem:[%s8676_s5] sm:$0xff] }
 0x409   : > { %v7183_v13 = vadd.f32 %v6447_v0, %v1112_v43  ;;  %v7186_v25 = vadd.f32 %v6448_v1, %v1113_v35  ;;  %v1098_v47 = vpop.permute.xlu1 %1097  ;;  %v1107_v19 = vadd.f32 %v1094_v17, %v1083_v10  ;;  %v1106_v48 = vadd.f32 %v1094_v17, %v1082_v6  ;;  %1273 = vperm.xlu1 %6131, %v1259_v49   ;;  %v6156_v35 = vld [vmem:[%s8675_s4 + $0x8] sm:$0xff]  }
 0x40a   : > { %v1108_v9 = vadd.f32 %v1098_v47, %v1084_v45  ;;  %v1109_v2 = vadd.f32 %v1098_v47, %v1085_v46  ;;  %v1062_v55 = vmul.f32 %v1054_v8, %v1026_v4  ;;  %v1063_v56 = vmul.f32 %v1054_v8, %v1027_v50  ;;  %1298 = vperm.xlu0 %6132, %v1264_v12   ;;  %v6157_v45 = vld [vmem:[%s8675_s4 + $0x10] sm:$0xff]   ;;  %v6158_v46 = vld [vmem:[%s8675_s4 + $0x18] sm:$0xff]  }
 0x40b   : > { %8736 = vst [vmem:[#allocation2_spill] sm:$0xff] %v7183_v13  ;;  %8737 = vst [vmem:[#allocation3_spill] sm:$0xff] %v7186_v25  ;;  %1224 = vmatprep.mubr.f32.mxu1 %v7186_v25  ;;  %v1115_v51 = vmax.f32 %v1107_v19, 0.0  ;;  %v1114_v52 = vmax.f32 %v1106_v48, 0.0  ;;  %v8682_v0 = vmov 0.0  }
 0x40c   : > { %1225 = vmatmul.mubr.f32.vlgmr.msra.gmra.mxu1 %v7183_v13  ;;  %v1117_v54 = vmax.f32 %v1109_v2, 0.0  ;;  %v1116_v62 = vmax.f32 %v1108_v9, 0.0  ;;  %5600 = vmatprep.subr.mxu0 %v8682_v0 }
 0x40d   : > { %v7193_v59 = vadd.f32 %v6449_v58, %v1115_v51  ;;  %v7196_v61 = vadd.f32 %v6450_v60, %v1114_v52  ;;  %v1102_v31 = vpop.permute.xlu0 %1101  ;;  %1293 = vperm.xlu1 %6131, %v1263_v57   ;;  %5602 = vmatprep.mubr.msk.f32.mxu0 %vm6479_vm14, %v8682_v0 }
 0x40e   : > { %v1078_v63 = vpop.permute.xlu1 %1077  ;;  %v7199_v20 = vadd.f32 %v6451_v3, %v1117_v54  ;;  %v7205_v26 = vadd.f32 %v6452_v22, %v1116_v62  ;;  %1303 = vperm.xlu0 %6132, %v1265_v33   ;;  %v6159_v54 = vld [vmem:[%s8675_s4 + $0x20] sm:$0xff]   ;;  %v1266_v3 = vld [vmem:[%s8676_s5 + $0x38] sm:$0xff] }
 0x40f   : > { %8738 = vst [vmem:[#allocation4_spill] sm:$0xff] %v7193_v59  ;;  %8739 = vst [vmem:[#allocation5_spill] sm:$0xff] %v7196_v61  ;;  %v1086_v7 = vmul.f32 %v1078_v63, %v1062_v55  ;;  %v1087_v44 = vmul.f32 %v1078_v63, %v1063_v56  ;;  %1229 = vmatprep.mubr.f32.mxu1 %v7193_v59  ;;  %v6160_v55 = vld [vmem:[%s8675_s4 + $0x28] sm:$0xff]  }
 0x410   : > { %8740 = vst [vmem:[#allocation6_spill] sm:$0xff] %v7199_v20  ;;  %1230 = vmatmul.mubr.f32.gmra.mxu1 %v7196_v61  ;;  %8741 = vst [vmem:[#allocation7_spill] sm:$0xff] %v7205_v26 }
 0x411   : > { %v1110_v11 = vadd.f32 %v1102_v31, %v1086_v7  ;;  %v1111_v21 = vadd.f32 %v1102_v31, %v1087_v44  ;;  %1234 = vmatprep.mubr.f32.mxu1 %v7199_v20  ;;  %1288 = vperm.xlu1 %6131, %v1262_v32  }
 0x413   : > { %v1118_v27 = vmax.f32 %v1110_v11, 0.0  ;;  %v1119_v29 = vmax.f32 %v1111_v21, 0.0 }
 0x414   : > { %1235 = vmatmul.mubr.f32.gmra.mxu1 %v7205_v26 }
 0x415   : > { %v7209_v17 = vadd.f32 %v6453_v16, %v1119_v29  ;;  %v7212_v23 = vadd.f32 %v6454_v15, %v1118_v27 }
 0x417   : > { %8742 = vst [vmem:[#allocation8_spill] sm:$0xff] %v7209_v17  ;;  %8743 = vst [vmem:[#allocation9_spill] sm:$0xff] %v7212_v23  ;;  %1239 = vmatprep.mubr.f32.mxu1 %v7209_v17 }
 0x418   : > { %1240 = vmatmul.mubr.f32.gmra.mxu1 %v7212_v23 }
 0x419   : > { %5588 = vmatprep.mubr.msk.bf16.mxu1 %vm725_vm8, %v6155_v30 }
 0x47d   : > { %v1279_v56 = vpop.permute.xlu0 %1278 }
 0x481   : > { %v1284_v62 = vpop.permute.xlu0 %1283 }
 0x484   : > { %v1274_v47 = vpop.permute.xlu1 %1273 }
 0x485   : > { %v1299_v21 = vpop.permute.xlu0 %1298 }
 0x488   : > { %v1294_v50 = vpop.permute.xlu1 %1293 }
 0x489   : > { %v1304_v29 = vpop.permute.xlu0 %1303 }
 0x48c   : > { %v1289_v7 = vpop.permute.xlu1 %1288 }
 0x4cc   : > { %v5418_v28 = vpop.f32.mrf.mxu1 }
 0x4ce   : > { %v5419_v34 = vpop.f32.mrf.mxu1 }
 0x4cf   : > { %v7247_v43 = vadd.f32 %v5419_v34, %v5418_v28 }
 0x4d0   : > { %v5421_v53 = vpop.f32.mrf.mxu1 }
 0x4d1   : > { %8747 = vst [vmem:[#allocation13_spill] sm:$0xff] %v7247_v43 }
 0x4d2   : > { %v5422_v5 = vpop.f32.mrf.mxu1 }
 0x4d3   : > { %v7241_v36 = vadd.f32 %v5422_v5, %v5421_v53 }
 0x4d4   : > { %v5424_v42 = vpop.f32.mrf.mxu1 }
 0x4d5   : > { %8744 = vst [vmem:[#allocation10_spill] sm:$0xff] %v7241_v36  ;;  %v1257_v10 = vpack.c.bf16 %v7241_v36, %v7247_v43 }
 0x4d6   : > { %v5425_v37 = vpop.f32.mrf.mxu1 }
 0x4d7   : > { %v7243_v40 = vadd.f32 %v5425_v37, %v5424_v42 }
 0x4d8   : > { %v5427_v39 = vpop.f32.mrf.mxu1 }
 0x4d9   : > { %8745 = vst [vmem:[#allocation11_spill] sm:$0xff] %v7243_v40 }
 0x4da   : > { %v5428_v38 = vpop.f32.mrf.mxu1 }
 0x4db   : > { %v7245_v41 = vadd.f32 %v5428_v38, %v5427_v39 }
 0x4dd   : > { %8746 = vst [vmem:[#allocation12_spill] sm:$0xff] %v7245_v41  ;;  %v1258_v6 = vpack.c.bf16 %v7245_v41, %v7243_v40 }
 0x4df   : > { %5584 = vmatprep.subr.bf16.mxu1 %v1258_v6 }
 0x4e0   : > { %5585 = vmatpush3.bf16.msra.mxu1 %v1258_v6 }
 0x4e1   : > { %5586 = vmatprep.subr.bf16.mxu1 %v1257_v10 }
 0x4e4   : > { %5587 = vmatpush3.bf16.msra.mxu1 %v1257_v10 }
 0x4e5   : > { %5928 = vmatprep.subr.mxu1 %v8682_v0 }
 0x4e7   : > { %5589 = vmatmul.mubr.msk.bf16.vlgmr.msra.gmra.mxu1 %vm725_vm8, %v6156_v35 }
 0x4e8   : > { %5592 = vmatprep.mubr.msk.bf16.mxu1 %vm725_vm8, %v6157_v45 }
 0x4ef   : > { %5593 = vmatmul.mubr.msk.bf16.gmra.mxu1 %vm725_vm8, %v6158_v46 }
 0x4f0   : > { %5596 = vmatprep.mubr.msk.bf16.mxu1 %vm725_vm8, %v6159_v54 }
 0x4f7   : > { %5597 = vmatmul.mubr.msk.bf16.gmra.mxu1 %vm725_vm8, %v6160_v55 }
 0x4f8   : > { %5617 = vmatprep.mubr.msk.f32.mxu1 %vm6479_vm14, %v8682_v0 }
 0x5a7   : > { %v5590_v1 = vpop.f32.mrf.mxu1 }
 0x5a8   : > { %v1422_v63 = vadd.f32 %v5590_v1, %v1284_v62 }
 0x5a9   : > { %v1413_v19 = vpop.f32.mrf.mxu1 }
 0x5aa   : > { %v1414_v48 = vadd.f32 %v1413_v19, %v1274_v47  ;;  %v1466_v31 = vcombine.high %v1422_v63, %v1422_v63 }
 0x5ab   : > { %v5591_v8 = vpop.f32.mrf.mxu1 }
 0x5ac   : > { %v1464_v9 = vcombine.high %v1414_v48, %v1414_v48  ;;  %1488 = vxpose.xlu1.b32.start.end [1/1] (short) (narrow) %v1414_v48, 56  ;;  %v1425_v44 = vadd.f32 %v5591_v8, %v1289_v7 }
 0x5ad   : > { %v1416_v2 = vpop.f32.mrf.mxu1 }
 0x5ae   : > { %1645 = vxpose.xlu0.b32.start.end [1/1] (short) (narrow) %v1464_v9, 56  ;;  %v1417_v58 = vadd.f32 %v1416_v2, %v1279_v56  ;;  %v1467_v11 = vcombine.high %v1425_v44, %v1425_v44 }
 0x5af   : > { %v7269_v4 = vpop.f32.mrf.mxu1 }
 0x5b0   : > { %v1465_v60 = vcombine.high %v1417_v58, %v1417_v58  ;;  %v1438_v39 = vadd.f32 %v7269_v4, %v1304_v29 }
 0x5b1   : > { %v1429_v51 = vpop.f32.mrf.mxu1 }
 0x5b2   : > { %v1430_v52 = vadd.f32 %v1429_v51, %v1294_v50  ;;  %v1478_v51 = vcombine.high %v1438_v39, %v1438_v39 }
 0x5b3   : > { %v7288_v22 = vpop.f32.mrf.mxu1 }
 0x5b4   : > { %5601 = vmatpush3.msk.msra.mxu0 %vm1542_vm15, %v1430_v52  ;;  %5929 = vmatpush3.msk.msra.mxu1 %vm1542_vm15, %v1430_v52  ;;  %v1476_v34 = vcombine.high %v1430_v52, %v1430_v52 }
 0x5b5   : > { %5646 = vmatprep.subr.mxu0 %v8682_v0  ;;  %5623 = vmatprep.subr.mxu1 %v8682_v0  ;;  %v1432_v27 = vpop.f32.mrf.mxu1 }
 0x5b6   : > { %v1433_v16 = vadd.f32 %v1432_v27, %v1299_v21 }
 0x5b8   : > { %v1477_v38 = vcombine.high %v1433_v16, %v1433_v16 }
 0x5c5   : > { %1800 = vxpose.xlu1.b32.start.end [1/1] (short) (narrow) %v1417_v58, 56 }
 0x5c7   : > { %1955 = vxpose.xlu0.b32.start.end [1/1] (short) (narrow) %v1465_v60, 56 }
 0x5e0   : > { %2110 = vxpose.xlu0.b32.start.end [1/1] (short) (narrow) %v1422_v63, 56 }
 0x5f9   : > { %2265 = vxpose.xlu0.b32.start.end [1/1] (short) (narrow) %v1466_v31, 56 }
 0x5fb   : > { %1308 = vperm.xlu1 %6131, %v1266_v3  }
 0x612   : > { %2575 = vxpose.xlu0.b32.start.end [1/1] (short) (narrow) %v1467_v11, 56 }
 0x624   : > { %2420 = vxpose.xlu1.b32.start.end [1/1] (short) (narrow) %v1425_v44, 56 }
 0x628   : > { %v1504_v15 = vpop.trf.xlu1 }
 0x629   : > { %5603 = vmatmul.mubr.msk.f32.vlgmr.msra.gmra.mxu0 %vm1520_vm0, %v1504_v15 }
 0x62a   : > { %5647 = vmatpush3.msk.msra.mxu0 %vm1542_vm15, %v1433_v16  ;;  %v1661_v30 = vpop.trf.xlu0  ;;  %5605 = vmatprep.mubr.msk.f32.mxu0 %vm6479_vm14, %v8682_v0 }
 0x62b   : > { %5692 = vmatprep.subr.mxu0 %v8682_v0 }
 0x62c   : > { %v1505_v49 = vpop.trf.xlu1 }
 0x62d   : > { %5606 = vmatmul.mubr.msk.f32.gmra.mxu0 %vm1520_vm0, %v1505_v49 }
 0x62e   : > { %v1662_v24 = vpop.trf.xlu0  ;;  %5608 = vmatprep.mubr.msk.f32.mxu0 %vm6479_vm14, %v8682_v0 }
 0x630   : > { %v1506_v57 = vpop.trf.xlu1 }
 0x631   : > { %5609 = vmatmul.mubr.msk.f32.gmra.mxu0 %vm1520_vm0, %v1506_v57 }
 0x632   : > { %v1663_v14 = vpop.trf.xlu0  ;;  %5611 = vmatprep.mubr.msk.f32.mxu0 %vm6479_vm14, %v8682_v0 }
 0x634   : > { %v1507_v32 = vpop.trf.xlu1 }
 0x635   : > { %5612 = vmatmul.mubr.msk.f32.gmra.mxu0 %vm1520_vm0, %v1507_v32 }
 0x636   : > { %v1664_v12 = vpop.trf.xlu0  ;;  %5614 = vmatprep.mubr.msk.f32.mxu0 %vm6479_vm14, %v8682_v0 }
 0x638   : > { %v1508_v33 = vpop.trf.xlu1 }
 0x639   : > { %5615 = vmatmul.mubr.msk.f32.gmra.mxu0 %vm1520_vm0, %v1508_v33 }
 0x63a   : > { %v1665_v28 = vpop.trf.xlu0  ;;  %5648 = vmatprep.mubr.msk.f32.mxu0 %vm6479_vm14, %v8682_v0 }
 0x63c   : > { %v1509_v53 = vpop.trf.xlu1 }
 0x63d   : > { %5618 = vmatmul.mubr.msk.f32.vlgmr.msra.gmra.mxu1 %vm1520_vm0, %v1509_v53 }
 0x63e   : > { %5624 = vmatpush3.msk.msra.mxu1 %vm1542_vm15, %v1476_v34  ;;  %v1666_v5 = vpop.trf.xlu0  ;;  %5620 = vmatprep.mubr.msk.f32.mxu1 %vm6479_vm14, %v8682_v0 }
 0x63f   : > { %5669 = vmatprep.subr.mxu1 %v8682_v0 }
 0x640   : > { %v1510_v42 = vpop.trf.xlu1 }
 0x641   : > { %5621 = vmatmul.mubr.msk.f32.gmra.mxu1 %vm1520_vm0, %v1510_v42 }
 0x642   : > { %v1667_v37 = vpop.trf.xlu0  ;;  %5625 = vmatprep.mubr.msk.f32.mxu1 %vm6479_vm14, %v8682_v0 }
 0x644   : > { %v1816_v6 = vpop.trf.xlu1 }
 0x645   : > { %5626 = vmatmul.mubr.msk.f32.vlgmr.msra.gmra.mxu1 %vm1520_vm0, %v1661_v30  ;;  %5649 = vmatmul.mubr.msk.f32.vlgmr.msra.gmra.mxu0 %vm1520_vm0, %v1816_v6 }
 0x646   : > { %5670 = vmatpush3.msk.msra.mxu1 %vm1542_vm15, %v1477_v38  ;;  %5693 = vmatpush3.msk.msra.mxu0 %vm1542_vm15, %v1438_v39  ;;  %v1971_v10 = vpop.trf.xlu0 }
 0x647   : > { %5628 = vmatprep.mubr.msk.f32.mxu1 %vm6479_vm14, %v8682_v0  ;;  %5651 = vmatprep.mubr.msk.f32.mxu0 %vm6479_vm14, %v8682_v0 }
 0x648   : > { %v1817_v35 = vpop.trf.xlu1  ;;  %5715 = vmatprep.subr.mxu1 %v8682_v0  ;;  %5738 = vmatprep.subr.mxu0 %v8682_v0 }
 0x649   : > { %5629 = vmatmul.mubr.msk.f32.gmra.mxu1 %vm1520_vm0, %v1662_v24  ;;  %5652 = vmatmul.mubr.msk.f32.gmra.mxu0 %vm1520_vm0, %v1817_v35 }
 0x64a   : > { %v1972_v45 = vpop.trf.xlu0  ;;  %5631 = vmatprep.mubr.msk.f32.mxu1 %vm6479_vm14, %v8682_v0  ;;  %5654 = vmatprep.mubr.msk.f32.mxu0 %vm6479_vm14, %v8682_v0 }
 0x64c   : > { %v1818_v46 = vpop.trf.xlu1 }
 0x64d   : > { %5632 = vmatmul.mubr.msk.f32.gmra.mxu1 %vm1520_vm0, %v1663_v14  ;;  %5655 = vmatmul.mubr.msk.f32.gmra.mxu0 %vm1520_vm0, %v1818_v46 }
 0x64e   : > { %v1973_v1 = vpop.trf.xlu0  ;;  %5634 = vmatprep.mubr.msk.f32.mxu1 %vm6479_vm14, %v8682_v0  ;;  %5657 = vmatprep.mubr.msk.f32.mxu0 %vm6479_vm14, %v8682_v0 }
 0x650   : > { %v1819_v47 = vpop.trf.xlu1 }
 0x651   : > { %5635 = vmatmul.mubr.msk.f32.gmra.mxu1 %vm1520_vm0, %v1664_v12  ;;  %5658 = vmatmul.mubr.msk.f32.gmra.mxu0 %vm1520_vm0, %v1819_v47 }
 0x652   : > { %v1974_v19 = vpop.trf.xlu0  ;;  %5637 = vmatprep.mubr.msk.f32.mxu1 %vm6479_vm14, %v8682_v0  ;;  %5660 = vmatprep.mubr.msk.f32.mxu0 %vm6479_vm14, %v8682_v0 }
 0x654   : > { %v1820_v48 = vpop.trf.xlu1 }
 0x655   : > { %5638 = vmatmul.mubr.msk.f32.gmra.mxu1 %vm1520_vm0, %v1665_v28  ;;  %5661 = vmatmul.mubr.msk.f32.gmra.mxu0 %vm1520_vm0, %v1820_v48 }
 0x656   : > { %v1975_v8 = vpop.trf.xlu0  ;;  %5640 = vmatprep.mubr.msk.f32.mxu1 %vm6479_vm14, %v8682_v0  ;;  %5663 = vmatprep.mubr.msk.f32.mxu0 %vm6479_vm14, %v8682_v0 }
 0x658   : > { %v1821_v9 = vpop.trf.xlu1 }
 0x659   : > { %5641 = vmatmul.mubr.msk.f32.gmra.mxu1 %vm1520_vm0, %v1666_v5  ;;  %5664 = vmatmul.mubr.msk.f32.gmra.mxu0 %vm1520_vm0, %v1821_v9 }
 0x65a   : > { %v1976_v2 = vpop.trf.xlu0  ;;  %5643 = vmatprep.mubr.msk.f32.mxu1 %vm6479_vm14, %v8682_v0  ;;  %5666 = vmatprep.mubr.msk.f32.mxu0 %vm6479_vm14, %v8682_v0 }
 0x65c   : > { %v1822_v4 = vpop.trf.xlu1 }
 0x65d   : > { %5644 = vmatmul.mubr.msk.f32.gmra.mxu1 %vm1520_vm0, %v1667_v37  ;;  %5667 = vmatmul.mubr.msk.f32.gmra.mxu0 %vm1520_vm0, %v1822_v4 }
 0x65e   : > { %v1977_v50 = vpop.trf.xlu0  ;;  %5671 = vmatprep.mubr.msk.f32.mxu1 %vm6479_vm14, %v8682_v0  ;;  %5694 = vmatprep.mubr.msk.f32.mxu0 %vm6479_vm14, %v8682_v0 }
 0x661   : > { %5672 = vmatmul.mubr.msk.f32.vlgmr.msra.gmra.mxu1 %vm1520_vm0, %v1971_v10  ;;  %v7478_v10 = vpop.f32.mrf.mxu1 }
 0x662   : > { %5716 = vmatpush3.msk.msra.mxu1 %vm1542_vm15, %v1478_v51  ;;  %v2126_v52 = vpop.trf.xlu0  ;;  %5674 = vmatprep.mubr.msk.f32.mxu1 %vm6479_vm14, %v8682_v0  ;;  %8748 = vst [vmem:[#allocation14_spill] sm:$0xff] %v7478_v10 }
 0x663   : > { %5695 = vmatmul.mubr.msk.f32.vlgmr.msra.gmra.mxu0 %vm1520_vm0, %v2126_v52  ;;  %5761 = vmatprep.subr.mxu1 %v8682_v0  ;;  %v7484_v47 = vpop.f32.mrf.mxu1 }
 0x664   : > { %5697 = vmatprep.mubr.msk.f32.mxu0 %vm6479_vm14, %v8682_v0  ;;  %8749 = vst [vmem:[#allocation15_spill] sm:$0xff] %v7484_v47 }
 0x665   : > { %5675 = vmatmul.mubr.msk.f32.gmra.mxu1 %vm1520_vm0, %v1972_v45 }
 0x666   : > { %v2127_v54 = vpop.trf.xlu0  ;;  %5677 = vmatprep.mubr.msk.f32.mxu1 %vm6479_vm14, %v8682_v0 }
 0x667   : > { %5698 = vmatmul.mubr.msk.f32.gmra.mxu0 %vm1520_vm0, %v2127_v54 }
 0x668   : > { %5700 = vmatprep.mubr.msk.f32.mxu0 %vm6479_vm14, %v8682_v0 }
 0x669   : > { %5678 = vmatmul.mubr.msk.f32.gmra.mxu1 %vm1520_vm0, %v1973_v1 }
 0x66a   : > { %v2128_v55 = vpop.trf.xlu0  ;;  %5680 = vmatprep.mubr.msk.f32.mxu1 %vm6479_vm14, %v8682_v0 }
 0x66b   : > { %5701 = vmatmul.mubr.msk.f32.gmra.mxu0 %vm1520_vm0, %v2128_v55 }
 0x66c   : > { %5703 = vmatprep.mubr.msk.f32.mxu0 %vm6479_vm14, %v8682_v0 }
 0x66d   : > { %5681 = vmatmul.mubr.msk.f32.gmra.mxu1 %vm1520_vm0, %v1974_v19 }
 0x66e   : > { %v2129_v56 = vpop.trf.xlu0  ;;  %5683 = vmatprep.mubr.msk.f32.mxu1 %vm6479_vm14, %v8682_v0 }
 0x66f   : > { %5704 = vmatmul.mubr.msk.f32.gmra.mxu0 %vm1520_vm0, %v2129_v56 }
 0x670   : > { %5706 = vmatprep.mubr.msk.f32.mxu0 %vm6479_vm14, %v8682_v0 }
 0x671   : > { %5684 = vmatmul.mubr.msk.f32.gmra.mxu1 %vm1520_vm0, %v1975_v8 }
 0x672   : > { %v2130_v58 = vpop.trf.xlu0  ;;  %5686 = vmatprep.mubr.msk.f32.mxu1 %vm6479_vm14, %v8682_v0 }
 0x673   : > { %5707 = vmatmul.mubr.msk.f32.gmra.mxu0 %vm1520_vm0, %v2130_v58 }
 0x674   : > { %5709 = vmatprep.mubr.msk.f32.mxu0 %vm6479_vm14, %v8682_v0 }
 0x675   : > { %5687 = vmatmul.mubr.msk.f32.gmra.mxu1 %vm1520_vm0, %v1976_v2  ;;  %v7490_v2 = vpop.f32.mrf.mxu1 }
 0x676   : > { %v2131_v60 = vpop.trf.xlu0  ;;  %v1309_v62 = vpop.permute.xlu1 %1308  ;;  %5689 = vmatprep.mubr.msk.f32.mxu1 %vm6479_vm14, %v8682_v0  ;;  %8750 = vst [vmem:[#allocation16_spill] sm:$0xff] %v7490_v2 }
 0x677   : > { %v1441_v63 = vadd.f32 %v7288_v22, %v1309_v62  ;;  %5710 = vmatmul.mubr.msk.f32.gmra.mxu0 %vm1520_vm0, %v2131_v60  ;;  %v7496_v54 = vpop.f32.mrf.mxu1 }
 0x678   : > { %5712 = vmatprep.mubr.msk.f32.mxu0 %vm6479_vm14, %v8682_v0  ;;  %8751 = vst [vmem:[#allocation17_spill] sm:$0xff] %v7496_v54 }
 0x679   : > { %5690 = vmatmul.mubr.msk.f32.gmra.mxu1 %vm1520_vm0, %v1977_v50  ;;  %5739 = vmatpush3.msk.msra.mxu0 %vm1542_vm15, %v1441_v63  ;;  %v1479_v3 = vcombine.high %v1441_v63, %v1441_v63 }
 0x67a   : > { %v2132_v31 = vpop.trf.xlu0  ;;  %5717 = vmatprep.mubr.msk.f32.mxu1 %vm6479_vm14, %v8682_v0  ;;  %5784 = vmatprep.subr.mxu0 %v8682_v0 }
 0x67b   : > { %5713 = vmatmul.mubr.msk.f32.gmra.mxu0 %vm1520_vm0, %v2132_v31 }
 0x67c   : > { %5740 = vmatprep.mubr.msk.f32.mxu0 %vm6479_vm14, %v8682_v0 }
 0x67e   : > { %v2281_v7 = vpop.trf.xlu0 }
 0x67f   : > { %5718 = vmatmul.mubr.msk.f32.vlgmr.msra.gmra.mxu1 %vm1520_vm0, %v2281_v7 }
 0x680   : > { %5762 = vmatpush3.msk.msra.mxu1 %vm1542_vm15, %v1479_v3  ;;  %5720 = vmatprep.mubr.msk.f32.mxu1 %vm6479_vm14, %v8682_v0 }
 0x681   : > { %5801 = vmatprep.subr.mxu1 %v8682_v0 }
 0x682   : > { %v2282_v44 = vpop.trf.xlu0 }
 0x683   : > { %5721 = vmatmul.mubr.msk.f32.gmra.mxu1 %vm1520_vm0, %v2282_v44 }
 0x684   : > { %5723 = vmatprep.mubr.msk.f32.mxu1 %vm6479_vm14, %v8682_v0 }
 0x686   : > { %v2283_v11 = vpop.trf.xlu0 }
 0x687   : > { %5724 = vmatmul.mubr.msk.f32.gmra.mxu1 %vm1520_vm0, %v2283_v11 }
 0x688   : > { %5726 = vmatprep.mubr.msk.f32.mxu1 %vm6479_vm14, %v8682_v0 }
 0x68a   : > { %v2284_v21 = vpop.trf.xlu0 }
 0x68b   : > { %5727 = vmatmul.mubr.msk.f32.gmra.mxu1 %vm1520_vm0, %v2284_v21 }
 0x68c   : > { %5729 = vmatprep.mubr.msk.f32.mxu1 %vm6479_vm14, %v8682_v0 }
 0x68e   : > { %v2285_v22 = vpop.trf.xlu0 }
 0x68f   : > { %5730 = vmatmul.mubr.msk.f32.gmra.mxu1 %vm1520_vm0, %v2285_v22 }
 0x690   : > { %5732 = vmatprep.mubr.msk.f32.mxu1 %vm6479_vm14, %v8682_v0 }
 0x692   : > { %v2286_v27 = vpop.trf.xlu0 }
 0x693   : > { %5733 = vmatmul.mubr.msk.f32.gmra.mxu1 %vm1520_vm0, %v2286_v27 }
 0x694   : > { %5735 = vmatprep.mubr.msk.f32.mxu1 %vm6479_vm14, %v8682_v0 }
 0x696   : > { %v2287_v29 = vpop.trf.xlu0 }
 0x697   : > { %5736 = vmatmul.mubr.msk.f32.gmra.mxu1 %vm1520_vm0, %v2287_v29 }
 0x698   : > { %5763 = vmatprep.mubr.msk.f32.mxu1 %vm6479_vm14, %v8682_v0 }
 0x69a   : > { %v2591_v16 = vpop.trf.xlu0 }
 0x69b   : > { %5764 = vmatmul.mubr.msk.f32.vlgmr.msra.gmra.mxu1 %vm1520_vm0, %v2591_v16 }
 0x69c   : > { %5766 = vmatprep.mubr.msk.f32.mxu1 %vm6479_vm14, %v8682_v0 }
 0x69e   : > { %v2592_v15 = vpop.trf.xlu0 }
 0x69f   : > { %5767 = vmatmul.mubr.msk.f32.gmra.mxu1 %vm1520_vm0, %v2592_v15 }
 0x6a0   : > { %v2436_v30 = vpop.trf.xlu1  ;;  %5769 = vmatprep.mubr.msk.f32.mxu1 %vm6479_vm14, %v8682_v0 }
 0x6a1   : > { %5741 = vmatmul.mubr.msk.f32.vlgmr.msra.gmra.mxu0 %vm1520_vm0, %v2436_v30 }
 0x6a2   : > { %v2593_v49 = vpop.trf.xlu0  ;;  %5743 = vmatprep.mubr.msk.f32.mxu0 %vm6479_vm14, %v8682_v0 }
 0x6a3   : > { %5770 = vmatmul.mubr.msk.f32.gmra.mxu1 %vm1520_vm0, %v2593_v49 }
 0x6a4   : > { %v2437_v24 = vpop.trf.xlu1  ;;  %5772 = vmatprep.mubr.msk.f32.mxu1 %vm6479_vm14, %v8682_v0 }
 0x6a5   : > { %5744 = vmatmul.mubr.msk.f32.gmra.mxu0 %vm1520_vm0, %v2437_v24 }
 0x6a6   : > { %v2594_v57 = vpop.trf.xlu0  ;;  %5746 = vmatprep.mubr.msk.f32.mxu0 %vm6479_vm14, %v8682_v0 }
 0x6a7   : > { %5773 = vmatmul.mubr.msk.f32.gmra.mxu1 %vm1520_vm0, %v2594_v57 }
 0x6a8   : > { %v2438_v14 = vpop.trf.xlu1  ;;  %5775 = vmatprep.mubr.msk.f32.mxu1 %vm6479_vm14, %v8682_v0 }
 0x6a9   : > { %5747 = vmatmul.mubr.msk.f32.gmra.mxu0 %vm1520_vm0, %v2438_v14 }
 0x6aa   : > { %v2595_v32 = vpop.trf.xlu0  ;;  %5749 = vmatprep.mubr.msk.f32.mxu0 %vm6479_vm14, %v8682_v0 }
 0x6ab   : > { %5776 = vmatmul.mubr.msk.f32.gmra.mxu1 %vm1520_vm0, %v2595_v32 }
 0x6ac   : > { %v2439_v12 = vpop.trf.xlu1  ;;  %5778 = vmatprep.mubr.msk.f32.mxu1 %vm6479_vm14, %v8682_v0 }
 0x6ad   : > { %5750 = vmatmul.mubr.msk.f32.gmra.mxu0 %vm1520_vm0, %v2439_v12 }
 0x6ae   : > { %v2596_v33 = vpop.trf.xlu0  ;;  %5752 = vmatprep.mubr.msk.f32.mxu0 %vm6479_vm14, %v8682_v0 }
 0x6af   : > { %5779 = vmatmul.mubr.msk.f32.gmra.mxu1 %vm1520_vm0, %v2596_v33 }
 0x6b0   : > { %v2440_v28 = vpop.trf.xlu1  ;;  %5781 = vmatprep.mubr.msk.f32.mxu1 %vm6479_vm14, %v8682_v0 }
 0x6b1   : > { %5753 = vmatmul.mubr.msk.f32.gmra.mxu0 %vm1520_vm0, %v2440_v28 }
 0x6b2   : > { %v2597_v34 = vpop.trf.xlu0  ;;  %5755 = vmatprep.mubr.msk.f32.mxu0 %vm6479_vm14, %v8682_v0 }
 0x6b3   : > { %5782 = vmatmul.mubr.msk.f32.gmra.mxu1 %vm1520_vm0, %v2597_v34 }
 0x6b4   : > { %v2441_v53 = vpop.trf.xlu1  ;;  %5815 = vmatprep.mubr.msk.f32.mxu1 %vm6479_vm14, %v8682_v0 }
 0x6b5   : > { %5756 = vmatmul.mubr.msk.f32.gmra.mxu0 %vm1520_vm0, %v2441_v53 }
 0x6b6   : > { %5758 = vmatprep.mubr.msk.f32.mxu0 %vm6479_vm14, %v8682_v0 }
 0x6b8   : > { %v2442_v5 = vpop.trf.xlu1 }
 0x6b9   : > { %5759 = vmatmul.mubr.msk.f32.gmra.mxu0 %vm1520_vm0, %v2442_v5 }
 0x6ba   : > { %5798 = vmatprep.mubr.msk.f32.mxu0 %vm6479_vm14, %v8682_v0 }
 0x6e9   : > { %v1611_v42 = vpop.f32.mrf.mxu0 }
 0x6ea   : > { %v7474_v37 = vmul.f32 0.5, %v1611_v42 }
 0x6eb   : > { %v5604_v39 = vpop.f32.mrf.mxu0 }
 0x6ec   : > { %v2787_v38 = vsel %vm2786_vm2, %v7474_v37, -inf }
 0x6ed   : > { %2788 = vmax.xlane.f32.xlu0 %v2787_v38  ;;  %v1616_v6 = vpop.f32.mrf.mxu0 }
 0x6ee   : > { %v7480_v35 = vmul.f32 0.5, %v1616_v6 }
 0x6ef   : > { %v5607_v45 = vpop.f32.mrf.mxu0 }
 0x6f0   : > { %v2790_v46 = vsel %vm2786_vm2, %v7480_v35, -inf }
 0x6f1   : > { %2791 = vmax.xlane.f32.xlu0 %v2790_v46  ;;  %v1621_v1 = vpop.f32.mrf.mxu0 }
 0x6f2   : > { %v7486_v19 = vmul.f32 0.5, %v1621_v1 }
 0x6f3   : > { %v5610_v48 = vpop.f32.mrf.mxu0 }
 0x6f4   : > { %v2793_v8 = vsel %vm2786_vm2, %v7486_v19, -inf }
 0x6f5   : > { %2794 = vmax.xlane.f32.xlu0 %v2793_v8  ;;  %v1626_v9 = vpop.f32.mrf.mxu0 }
 0x6f6   : > { %v7492_v4 = vmul.f32 0.5, %v1626_v9 }
 0x6f7   : > { %v5613_v50 = vpop.f32.mrf.mxu0 }
 0x6f8   : > { %v2796_v51 = vsel %vm2786_vm2, %v7492_v4, -inf }
 0x6f9   : > { %2797 = vmax.xlane.f32.xlu0 %v2796_v51  ;;  %v1631_v52 = vpop.f32.mrf.mxu0 }
 0x6fa   : > { %v7498_v55 = vmul.f32 0.5, %v1631_v52 }
 0x6fb   : > { %v5616_v56 = vpop.f32.mrf.mxu0 }
 0x6fc   : > { %v2799_v58 = vsel %vm2786_vm2, %v7498_v55, -inf }
 0x6fd   : > { %2800 = vmax.xlane.f32.xlu0 %v2799_v58  ;;  %v1636_v60 = vpop.f32.mrf.mxu1 }
 0x6fe   : > { %v7502_v62 = vmul.f32 0.5, %v1636_v60 }
 0x6ff   : > { %v5619_v63 = vpop.f32.mrf.mxu1 }
 0x700   : > { %v2802_v31 = vsel %vm2786_vm2, %v7502_v62, -inf }
 0x701   : > { %2803 = vmax.xlane.f32.xlu0 %v2802_v31  ;;  %v1641_v3 = vpop.f32.mrf.mxu1 }
 0x702   : > { %v7510_v16 = vmul.f32 0.5, %v1641_v3 }
 0x703   : > { %v5622_v7 = vpop.f32.mrf.mxu1 }
 0x704   : > { %v2806_v28 = vsel %vm2805_vm3, %v7510_v16, -inf }
 0x705   : > { %v1766_v44 = vpop.f32.mrf.mxu1  ;;  %v1921_v11 = vpop.f32.mrf.mxu0 }
 0x706   : > { %v7506_v21 = vmul.f32 0.5, %v1766_v44  ;;  %v7508_v22 = vmul.f32 0.5, %v1921_v11 }
 0x707   : > { %v5627_v27 = vpop.f32.mrf.mxu1  ;;  %v5650_v29 = vpop.f32.mrf.mxu0 }
 0x708   : > { %v2809_v15 = vsel %vm2786_vm2, %v7506_v21, -inf  ;;  %v2830_v30 = vsel %vm2786_vm2, %v7508_v22, -inf }
 0x709   : > { %2810 = vmax.xlane.f32.xlu1 %v2809_v15  ;;  %v1771_v49 = vpop.f32.mrf.mxu1  ;;  %2831 = vmax.xlane.f32.xlu0 %v2830_v30  ;;  %v1926_v24 = vpop.f32.mrf.mxu0 }
 0x70a   : > { %v7516_v57 = vmul.f32 0.5, %v1771_v49  ;;  %v7518_v14 = vmul.f32 0.5, %v1926_v24 }
 0x70b   : > { %v5630_v32 = vpop.f32.mrf.mxu1  ;;  %v5653_v12 = vpop.f32.mrf.mxu0 }
 0x70c   : > { %v2812_v33 = vsel %vm2786_vm2, %v7516_v57, -inf  ;;  %v2833_v42 = vsel %vm2786_vm2, %v7518_v14, -inf }
 0x70d   : > { %2813 = vmax.xlane.f32.xlu1 %v2812_v33  ;;  %v1776_v34 = vpop.f32.mrf.mxu1  ;;  %2807 = vmax.xlane.f32.xlu0 %v2806_v28  ;;  %v1931_v53 = vpop.f32.mrf.mxu0 }
 0x70e   : > { %v7524_v5 = vmul.f32 0.5, %v1776_v34  ;;  %v7528_v39 = vmul.f32 0.5, %v1931_v53 }
 0x70f   : > { %v5633_v38 = vpop.f32.mrf.mxu1  ;;  %v5656_v6 = vpop.f32.mrf.mxu0 }
 0x710   : > { %v2815_v45 = vsel %vm2786_vm2, %v7524_v5, -inf  ;;  %v2836_v8 = vsel %vm2786_vm2, %v7528_v39, -inf }
 0x711   : > { %2816 = vmax.xlane.f32.xlu1 %v2815_v45  ;;  %v1781_v46 = vpop.f32.mrf.mxu1  ;;  %2834 = vmax.xlane.f32.xlu0 %v2833_v42  ;;  %v1936_v1 = vpop.f32.mrf.mxu0 }
 0x712   : > { %v7532_v48 = vmul.f32 0.5, %v1781_v46  ;;  %v7536_v9 = vmul.f32 0.5, %v1936_v1 }
 0x713   : > { %v5636_v50 = vpop.f32.mrf.mxu1  ;;  %v5659_v51 = vpop.f32.mrf.mxu0 }
 0x714   : > { %v2818_v52 = vsel %vm2786_vm2, %v7532_v48, -inf  ;;  %v2839_v63 = vsel %vm2786_vm2, %v7536_v9, -inf }
 0x715   : > { %2819 = vmax.xlane.f32.xlu1 %v2818_v52  ;;  %v1786_v56 = vpop.f32.mrf.mxu1  ;;  %2837 = vmax.xlane.f32.xlu0 %v2836_v8  ;;  %v1941_v58 = vpop.f32.mrf.mxu0 }
 0x716   : > { %v7540_v60 = vmul.f32 0.5, %v1786_v56  ;;  %v7544_v31 = vmul.f32 0.5, %v1941_v58 }
 0x717   : > { %v5639_v3 = vpop.f32.mrf.mxu1  ;;  %v5662_v7 = vpop.f32.mrf.mxu0 }
 0x718   : > { %v2821_v44 = vsel %vm2786_vm2, %v7540_v60, -inf  ;;  %v2842_v29 = vsel %vm2786_vm2, %v7544_v31, -inf }
 0x719   : > { %2822 = vmax.xlane.f32.xlu1 %v2821_v44  ;;  %v1791_v11 = vpop.f32.mrf.mxu1  ;;  %2840 = vmax.xlane.f32.xlu0 %v2839_v63  ;;  %v1946_v27 = vpop.f32.mrf.mxu0 }
 0x71a   : > { %v7550_v15 = vmul.f32 0.5, %v1946_v27  ;;  %v7564_v8 = vmul.f32 0.5, %v1791_v11 }
 0x71b   : > { %v5642_v30 = vpop.f32.mrf.mxu1  ;;  %v5665_v49 = vpop.f32.mrf.mxu0 }
 0x71c   : > { %v2845_v33 = vsel %vm2786_vm2, %v7550_v15, -inf  ;;  %v2824_v44 = vsel %vm2786_vm2, %v7564_v8, -inf }
 0x71d   : > { %v1796_v24 = vpop.f32.mrf.mxu1  ;;  %2843 = vmax.xlane.f32.xlu0 %v2842_v29  ;;  %v1951_v32 = vpop.f32.mrf.mxu0 }
 0x71e   : > { %v7552_v12 = vmul.f32 0.5, %v1796_v24  ;;  %v7556_v28 = vmul.f32 0.5, %v1951_v32 }
 0x71f   : > { %v5645_v34 = vpop.f32.mrf.mxu1  ;;  %v5668_v53 = vpop.f32.mrf.mxu0 }
 0x720   : > { %v2827_v42 = vsel %vm2805_vm3, %v7552_v12, -inf  ;;  %v2848_v45 = vsel %vm2805_vm3, %v7556_v28, -inf }
 0x721   : > { %2828 = vmax.xlane.f32.xlu1 %v2827_v42  ;;  %v2076_v38 = vpop.f32.mrf.mxu1  ;;  %2846 = vmax.xlane.f32.xlu0 %v2845_v33 }
 0x722   : > { %v7560_v6 = vmul.f32 0.5, %v2076_v38 }
 0x723   : > { %v5673_v46 = vpop.f32.mrf.mxu1  ;;  %v2231_v1 = vpop.f32.mrf.mxu0 }
 0x724   : > { %v2851_v50 = vsel %vm2786_vm2, %v7560_v6, -inf  ;;  %v7570_v58 = vmul.f32 0.5, %v2231_v1 }
 0x725   : > { %2852 = vmax.xlane.f32.xlu1 %v2851_v50  ;;  %v2081_v51 = vpop.f32.mrf.mxu1  ;;  %2849 = vmax.xlane.f32.xlu0 %v2848_v45  ;;  %v5696_v52 = vpop.f32.mrf.mxu0 }
 0x726   : > { %v7568_v56 = vmul.f32 0.5, %v2081_v51  ;;  %v2872_v30 = vsel %vm2786_vm2, %v7570_v58, -inf }
 0x727   : > { %v5676_v63 = vpop.f32.mrf.mxu1  ;;  %v2236_v3 = vpop.f32.mrf.mxu0 }
 0x728   : > { %v2854_v7 = vsel %vm2786_vm2, %v7568_v56, -inf  ;;  %v7580_v49 = vmul.f32 0.5, %v2236_v3 }
 0x729   : > { %2855 = vmax.xlane.f32.xlu1 %v2854_v7  ;;  %v2086_v11 = vpop.f32.mrf.mxu1  ;;  %2825 = vmax.xlane.f32.xlu0 %v2824_v44  ;;  %v5699_v27 = vpop.f32.mrf.mxu0 }
 0x72a   : > { %v7576_v29 = vmul.f32 0.5, %v2086_v11  ;;  %v2875_v38 = vsel %vm2786_vm2, %v7580_v49, -inf }
 0x72b   : > { %v5679_v24 = vpop.f32.mrf.mxu1  ;;  %v2241_v32 = vpop.f32.mrf.mxu0 }
 0x72c   : > { %v2857_v33 = vsel %vm2786_vm2, %v7576_v29, -inf  ;;  %v7588_v45 = vmul.f32 0.5, %v2241_v32 }
 0x72d   : > { %2858 = vmax.xlane.f32.xlu1 %v2857_v33  ;;  %v2091_v34 = vpop.f32.mrf.mxu1  ;;  %2873 = vmax.xlane.f32.xlu0 %v2872_v30  ;;  %v5702_v53 = vpop.f32.mrf.mxu0 }
 0x72e   : > { %v7584_v42 = vmul.f32 0.5, %v2091_v34  ;;  %v2878_v3 = vsel %vm2786_vm2, %v7588_v45, -inf }
 0x72f   : > { %v5682_v46 = vpop.f32.mrf.mxu1  ;;  %v2246_v1 = vpop.f32.mrf.mxu0 }
 0x730   : > { %v2860_v50 = vsel %vm2786_vm2, %v7584_v42, -inf  ;;  %v7596_v7 = vmul.f32 0.5, %v2246_v1 }
 0x731   : > { %2861 = vmax.xlane.f32.xlu1 %v2860_v50  ;;  %v2096_v51 = vpop.f32.mrf.mxu1  ;;  %2876 = vmax.xlane.f32.xlu0 %v2875_v38  ;;  %v5705_v52 = vpop.f32.mrf.mxu0 }
 0x732   : > { %v7592_v63 = vmul.f32 0.5, %v2096_v51  ;;  %v2881_v33 = vsel %vm2786_vm2, %v7596_v7, -inf }
 0x733   : > { %v5685_v44 = vpop.f32.mrf.mxu1  ;;  %v2251_v11 = vpop.f32.mrf.mxu0 }
 0x734   : > { %v2863_v27 = vsel %vm2786_vm2, %v7592_v63, -inf  ;;  %v7604_v34 = vmul.f32 0.5, %v2251_v11 }
 0x735   : > { %2864 = vmax.xlane.f32.xlu1 %v2863_v27  ;;  %v2101_v30 = vpop.f32.mrf.mxu1  ;;  %2879 = vmax.xlane.f32.xlu0 %v2878_v3  ;;  %v5708_v24 = vpop.f32.mrf.mxu0 }
 0x736   : > { %v7600_v32 = vmul.f32 0.5, %v2101_v30  ;;  %v2884_v52 = vsel %vm2786_vm2, %v7604_v34, -inf }
 0x737   : > { %v5688_v53 = vpop.f32.mrf.mxu1  ;;  %v2256_v38 = vpop.f32.mrf.mxu0 }
 0x738   : > { %v2866_v46 = vsel %vm2786_vm2, %v7600_v32, -inf  ;;  %v7612_v3 = vmul.f32 0.5, %v2256_v38 }
 0x739   : > { %2867 = vmax.xlane.f32.xlu1 %v2866_v46  ;;  %v2106_v1 = vpop.f32.mrf.mxu1  ;;  %2882 = vmax.xlane.f32.xlu0 %v2881_v33  ;;  %v5711_v50 = vpop.f32.mrf.mxu0 }
 0x73a   : > { %v7608_v51 = vmul.f32 0.5, %v2106_v1  ;;  %v2887_v24 = vsel %vm2786_vm2, %v7612_v3, -inf }
 0x73b   : > { %v5691_v44 = vpop.f32.mrf.mxu1  ;;  %v2261_v27 = vpop.f32.mrf.mxu0 }
 0x73c   : > { %v2869_v11 = vsel %vm2805_vm3, %v7608_v51, -inf  ;;  %v7618_v33 = vmul.f32 0.5, %v2261_v27 }
 0x73d   : > { %2870 = vmax.xlane.f32.xlu1 %v2869_v11  ;;  %2885 = vmax.xlane.f32.xlu0 %v2884_v52  ;;  %v5714_v30 = vpop.f32.mrf.mxu0 }
 0x73e   : > { %v2890_v50 = vsel %vm2805_vm3, %v7618_v33, -inf }
 0x73f   : > { %v2386_v53 = vpop.f32.mrf.mxu1 }
 0x740   : > { %v7620_v46 = vmul.f32 0.5, %v2386_v53 }
 0x741   : > { %v5719_v1 = vpop.f32.mrf.mxu1  ;;  %2888 = vmax.xlane.f32.xlu0 %v2887_v24 }
 0x742   : > { %v2893_v38 = vsel %vm2786_vm2, %v7620_v46, -inf }
 0x743   : > { %2894 = vmax.xlane.f32.xlu1 %v2893_v38  ;;  %v2391_v44 = vpop.f32.mrf.mxu1 }
 0x744   : > { %v7626_v52 = vmul.f32 0.5, %v2391_v44 }
 0x745   : > { %v5722_v11 = vpop.f32.mrf.mxu1  ;;  %2891 = vmax.xlane.f32.xlu0 %v2890_v50 }
 0x746   : > { %v2896_v27 = vsel %vm2786_vm2, %v7626_v52, -inf }
 0x747   : > { %2897 = vmax.xlane.f32.xlu1 %v2896_v27  ;;  %v2396_v30 = vpop.f32.mrf.mxu1 }
 0x748   : > { %v7630_v53 = vmul.f32 0.5, %v2396_v30 }
 0x749   : > { %v5725_v24 = vpop.f32.mrf.mxu1 }
 0x74a   : > { %v2899_v1 = vsel %vm2786_vm2, %v7630_v53, -inf }
 0x74b   : > { %2900 = vmax.xlane.f32.xlu1 %v2899_v1  ;;  %v2401_v18 = vpop.f32.mrf.mxu1 }
 0x74c   : > { %v7634_v0 = vmul.f32 0.5, %v2401_v18 }
 0x74d   : > { %v5728_v38 = vpop.f32.mrf.mxu1 }
 0x74e   : > { %v2902_v44 = vsel %vm2786_vm2, %v7634_v0, -inf }
 0x74f   : > { %2903 = vmax.xlane.f32.xlu1 %v2902_v44  ;;  %v2406_v50 = vpop.f32.mrf.mxu1 }
 0x750   : > { %v7638_v11 = vmul.f32 0.5, %v2406_v50 }
 0x751   : > { %v5731_v27 = vpop.f32.mrf.mxu1 }
 0x752   : > { %v2905_v30 = vsel %vm2786_vm2, %v7638_v11, -inf }
 0x753   : > { %2906 = vmax.xlane.f32.xlu1 %v2905_v30  ;;  %v2411_v24 = vpop.f32.mrf.mxu1 }
 0x754   : > { %v7642_v17 = vmul.f32 0.5, %v2411_v24 }
 0x755   : > { %v5734_v1 = vpop.f32.mrf.mxu1 }
 0x756   : > { %v2908_v18 = vsel %vm2786_vm2, %v7642_v17, -inf }
 0x757   : > { %2909 = vmax.xlane.f32.xlu1 %v2908_v18  ;;  %v2416_v38 = vpop.f32.mrf.mxu1 }
 0x758   : > { %v7646_v23 = vmul.f32 0.5, %v2416_v38 }
 0x759   : > { %v5737_v44 = vpop.f32.mrf.mxu1 }
 0x75a   : > { %v2911_v50 = vsel %vm2805_vm3, %v7646_v23, -inf }
 0x75b   : > { %2912 = vmax.xlane.f32.xlu1 %v2911_v50  ;;  %v2696_v27 = vpop.f32.mrf.mxu1 }
 0x75c   : > { %v7650_v20 = vmul.f32 0.5, %v2696_v27 }
 0x75d   : > { %v5765_v30 = vpop.f32.mrf.mxu1 }
 0x75e   : > { %8752 = vst [vmem:[#allocation18_spill] sm:$0xff] %v7650_v20  ;;  %v2935_v24 = vsel %vm2786_vm2, %v7650_v20, -inf }
 0x75f   : > { %2936 = vmax.xlane.f32.xlu1 %v2935_v24  ;;  %v2701_v1 = vpop.f32.mrf.mxu1 }
 0x760   : > { %v7654_v26 = vmul.f32 0.5, %v2701_v1 }
 0x761   : > { %v2541_v18 = vpop.f32.mrf.mxu0  ;;  %v5768_v59 = vpop.f32.mrf.mxu1 }
 0x762   : > { %v7656_v38 = vmul.f32 0.5, %v2541_v18  ;;  %v2938_v44 = vsel %vm2786_vm2, %v7654_v26, -inf }
 0x763   : > { %2939 = vmax.xlane.f32.xlu1 %v2938_v44  ;;  %v5742_v50 = vpop.f32.mrf.mxu0  ;;  %v2706_v61 = vpop.f32.mrf.mxu1 }
 0x764   : > { %v7660_v27 = vmul.f32 0.5, %v2706_v61  ;;  %v2914_v30 = vsel %vm2786_vm2, %v7656_v38, -inf }
 0x765   : > { %v5771_v25 = vpop.f32.mrf.mxu1  ;;  %2915 = vmax.xlane.f32.xlu0 %v2914_v30  ;;  %v2546_v24 = vpop.f32.mrf.mxu0 }
 0x766   : > { %v7664_v1 = vmul.f32 0.5, %v2546_v24  ;;  %v2941_v59 = vsel %vm2786_vm2, %v7660_v27, -inf }
 0x767   : > { %2942 = vmax.xlane.f32.xlu1 %v2941_v59  ;;  %v5745_v18 = vpop.f32.mrf.mxu0  ;;  %v2711_v13 = vpop.f32.mrf.mxu1 }
 0x768   : > { %v7668_v36 = vmul.f32 0.5, %v2711_v13  ;;  %v2917_v61 = vsel %vm2786_vm2, %v7664_v1, -inf }
 0x769   : > { %v5774_v44 = vpop.f32.mrf.mxu1  ;;  %2918 = vmax.xlane.f32.xlu0 %v2917_v61  ;;  %v2551_v50 = vpop.f32.mrf.mxu0 }
 0x76a   : > { %v7672_v43 = vmul.f32 0.5, %v2551_v50  ;;  %v2944_v25 = vsel %vm2786_vm2, %v7668_v36, -inf }
 0x76b   : > { %2945 = vmax.xlane.f32.xlu1 %v2944_v25  ;;  %v5748_v30 = vpop.f32.mrf.mxu0  ;;  %v2716_v24 = vpop.f32.mrf.mxu1 }
 0x76c   : > { %v7676_v41 = vmul.f32 0.5, %v2716_v24  ;;  %v2920_v13 = vsel %vm2786_vm2, %v7672_v43, -inf }
 0x76d   : > { %v5777_v59 = vpop.f32.mrf.mxu1  ;;  %2921 = vmax.xlane.f32.xlu0 %v2920_v13  ;;  %v2556_v18 = vpop.f32.mrf.mxu0 }
 0x76e   : > { %8753 = vst [vmem:[#allocation19_spill] sm:$0xff] %v7676_v41  ;;  %v7680_v40 = vmul.f32 0.5, %v2556_v18  ;;  %v2947_v61 = vsel %vm2786_vm2, %v7676_v41, -inf }
 0x76f   : > { %2948 = vmax.xlane.f32.xlu1 %v2947_v61  ;;  %v5751_v44 = vpop.f32.mrf.mxu0  ;;  %v2721_v50 = vpop.f32.mrf.mxu1 }
 0x770   : > { %v7684_v2 = vmul.f32 0.5, %v2721_v50  ;;  %v2923_v25 = vsel %vm2786_vm2, %v7680_v40, -inf }
 0x771   : > { %v5780_v30 = vpop.f32.mrf.mxu1  ;;  %2924 = vmax.xlane.f32.xlu0 %v2923_v25  ;;  %v2561_v24 = vpop.f32.mrf.mxu0 }
 0x772   : > { %8754 = vst [vmem:[#allocation20_spill] sm:$0xff] %v7684_v2  ;;  %v7688_v10 = vmul.f32 0.5, %v2561_v24  ;;  %v2950_v13 = vsel %vm2786_vm2, %v7684_v2, -inf }
 0x773   : > { %2951 = vmax.xlane.f32.xlu1 %v2950_v13  ;;  %v5754_v59 = vpop.f32.mrf.mxu0  ;;  %v2726_v18 = vpop.f32.mrf.mxu1 }
 0x774   : > { %v7692_v54 = vmul.f32 0.5, %v2726_v18  ;;  %v2926_v61 = vsel %vm2786_vm2, %v7688_v10, -inf }
 0x775   : > { %2927 = vmax.xlane.f32.xlu0 %v2926_v61  ;;  %v2566_v44 = vpop.f32.mrf.mxu0  ;;  %v5783_v50 = vpop.f32.mrf.mxu1 }
 0x776   : > { %8755 = vst [vmem:[#allocation21_spill] sm:$0xff] %v7692_v54  ;;  %v7696_v47 = vmul.f32 0.5, %v2566_v44  ;;  %v2789_v25 = vpop.xlane.xlu0 %2788  ;;  %v2953_v30 = vsel %vm2805_vm3, %v7692_v54, -inf }
 0x777   : > { %v2956_v24 = vsub.f32 %v7474_v37, %v2789_v25  ;;  %2954 = vmax.xlane.f32.xlu1 %v2953_v30  ;;  %v5757_v13 = vpop.f32.mrf.mxu0 }
 0x778   : > { %v2929_v59 = vsel %vm2786_vm2, %v7696_v47, -inf }
 0x779   : > { %v3012_v18 = vmul.f32 1.442695, %v2956_v24  ;;  %2930 = vmax.xlane.f32.xlu0 %v2929_v59  ;;  %v2571_v2 = vpop.f32.mrf.mxu0 }
 0x77a   : > { %v7703_v41 = vmul.f32 0.5, %v2571_v2  ;;  %v2792_v61 = vpop.xlane.xlu0 %2791 }
 0x77b   : > { %6171 = vpow2.f32 %v3012_v18  ;;  %v2957_v44 = vsub.f32 %v7480_v35, %v2792_v61  ;;  %v5760_v50 = vpop.f32.mrf.mxu0 }
 0x77c   : > { %v2932_v54 = vsel %vm2805_vm3, %v7703_v41, -inf }
 0x77d   : > { %v3014_v20 = vmul.f32 1.442695, %v2957_v44  ;;  %2933 = vmax.xlane.f32.xlu0 %v2932_v54 }
 0x77e   : > { %v2795_v37 = vpop.xlane.xlu0 %2794 }
 0x77f   : > { %6173 = vpow2.f32 %v3014_v20  ;;  %v2958_v25 = vsub.f32 %v7486_v19, %v2795_v37 }
 0x781   : > { %v3016_v30 = vmul.f32 1.442695, %v2958_v25 }
 0x782   : > { %v2798_v24 = vpop.xlane.xlu0 %2797 }
 0x783   : > { %6175 = vpow2.f32 %v3016_v30  ;;  %v2959_v2 = vsub.f32 %v7492_v4, %v2798_v24 }
 0x785   : > { %v3018_v13 = vmul.f32 1.442695, %v2959_v2 }
 0x786   : > { %v2801_v59 = vpop.xlane.xlu0 %2800 }
 0x787   : > { %6177 = vpow2.f32 %v3018_v13  ;;  %v2960_v35 = vsub.f32 %v7498_v55, %v2801_v59 }
 0x788   : > { %v7711_v18 = vpop.eup %6171 }
 0x789   : > { %v3020_v61 = vmul.f32 1.442695, %v2960_v35  ;;  %v3124_v54 = vsel %vm2786_vm2, %v7711_v18, 0.0 }
 0x78a   : > { %v2804_v44 = vpop.xlane.xlu0 %2803  ;;  %3125 = vadd.xlane.f32.xlu0 %v3124_v54 }
 0x78b   : > { %6179 = vpow2.f32 %v3020_v61  ;;  %v2961_v20 = vsub.f32 %v7502_v62, %v2804_v44 }
 0x78c   : > { %v7716_v19 = vpop.eup %6173 }
 0x78d   : > { %v3022_v50 = vmul.f32 1.442695, %v2961_v20  ;;  %v3127_v4 = vsel %vm2786_vm2, %v7716_v19, 0.0 }
 0x78e   : > { %3128 = vadd.xlane.f32.xlu0 %v3127_v4 }
 0x78f   : > { %6181 = vpow2.f32 %v3022_v50 }
 0x790   : > { %v7720_v55 = vpop.eup %6175 }
 0x791   : > { %v3130_v37 = vsel %vm2786_vm2, %v7720_v55, 0.0 }
 0x792   : > { %v2832_v25 = vpop.xlane.xlu0 %2831  ;;  %3131 = vadd.xlane.f32.xlu0 %v3130_v37  ;;  %v2811_v30 = vpop.xlane.xlu1 %2810 }
 0x793   : > { %v2970_v24 = vsub.f32 %v7508_v22, %v2832_v25  ;;  %v2963_v44 = vsub.f32 %v7506_v21, %v2811_v30 }
 0x794   : > { %v7725_v2 = vpop.eup %6177 }
 0x795   : > { %v3040_v62 = vmul.f32 1.442695, %v2970_v24  ;;  %v3133_v13 = vsel %vm2786_vm2, %v7725_v2, 0.0  ;;  %v3026_v24 = vmul.f32 1.442695, %v2963_v44 }
 0x796   : > { %v2808_v59 = vpop.xlane.xlu0 %2807  ;;  %3134 = vadd.xlane.f32.xlu0 %v3133_v13  ;;  %v2814_v35 = vpop.xlane.xlu1 %2813 }
 0x797   : > { %6183 = vpow2.f32 %v3040_v62  ;;  %v2962_v61 = vsub.f32 %v7510_v16, %v2808_v59  ;;  %v2964_v62 = vsub.f32 %v7516_v57, %v2814_v35 }
 0x798   : > { %v7730_v54 = vpop.eup %6179 }
 0x799   : > { %v3024_v20 = vmul.f32 1.442695, %v2962_v61  ;;  %v3136_v22 = vsel %vm2786_vm2, %v7730_v54, 0.0  ;;  %v3028_v59 = vmul.f32 1.442695, %v2964_v62 }
 0x79a   : > { %v2835_v50 = vpop.xlane.xlu0 %2834  ;;  %3137 = vadd.xlane.f32.xlu0 %v3136_v22  ;;  %v2817_v4 = vpop.xlane.xlu1 %2816 }
 0x79b   : > { %6185 = vpow2.f32 %v3024_v20  ;;  %v2971_v37 = vsub.f32 %v7518_v14, %v2835_v50  ;;  %v2965_v61 = vsub.f32 %v7524_v5, %v2817_v4 }
 0x79c   : > { %v7736_v25 = vpop.eup %6181 }
 0x79d   : > { %v3042_v16 = vmul.f32 1.442695, %v2971_v37  ;;  %v3139_v13 = vsel %vm2786_vm2, %v7736_v25, 0.0  ;;  %v3030_v44 = vmul.f32 1.442695, %v2965_v61 }
 0x79e   : > { %v7741_v21 = vpop.xlane.xlu0 %2837  ;;  %3140 = vadd.xlane.f32.xlu0 %v3139_v13  ;;  %v2820_v30 = vpop.xlane.xlu1 %2819 }
 0x79f   : > { %6187 = vpow2.f32 %v3042_v16  ;;  %v2966_v57 = vsub.f32 %v7532_v48, %v2820_v30 }
 0x7a0   : > { %6189 = vpow2.f32 %v3026_v24 }
 0x7a1   : > { %6191 = vpow2.f32 %v3028_v59  ;;  %v3032_v24 = vmul.f32 1.442695, %v2966_v57 }
 0x7a2   : > { %v7744_v20 = vpop.xlane.xlu0 %2840  ;;  %v2823_v22 = vpop.xlane.xlu1 %2822  ;;  %6193 = vpow2.f32 %v3030_v44 }
 0x7a3   : > { %v2967_v5 = vsub.f32 %v7540_v60, %v2823_v22  ;;  %6195 = vpow2.f32 %v3032_v24 }
 0x7a4   : > { %v7746_v14 = vpop.eup %6183 }
 0x7a5   : > { %8756 = vst [vmem:[#allocation22_spill] sm:$0xff] %v7746_v14  ;;  %v3166_v35 = vsel %vm2786_vm2, %v7746_v14, 0.0  ;;  %v3034_v13 = vmul.f32 1.442695, %v2967_v5 }
 0x7a6   : > { %v7751_v50 = vpop.xlane.xlu0 %2843  ;;  %3167 = vadd.xlane.f32.xlu1 %v3166_v35 }
 0x7a7   : > { %6197 = vpow2.f32 %v3034_v13 }
 0x7a8   : > { %v7753_v37 = vpop.eup %6185 }
 0x7a9   : > { %v3142_v4 = vsel %vm2805_vm3, %v7753_v37, 0.0 }
 0x7aa   : > { %v7758_v62 = vpop.xlane.xlu0 %2846  ;;  %3143 = vadd.xlane.f32.xlu0 %v3142_v4  ;;  %v2829_v48 = vpop.xlane.xlu1 %2828 }
 0x7ab   : > { %v2969_v44 = vsub.f32 %v7552_v12, %v2829_v48 }
 0x7ac   : > { %v7760_v16 = vpop.eup %6187 }
 0x7ad   : > { %8757 = vst [vmem:[#allocation23_spill] sm:$0xff] %v7760_v16  ;;  %v3169_v30 = vsel %vm2786_vm2, %v7760_v16, 0.0  ;;  %v7764_v59 = vpop.eup %6189  ;;  %v3038_v5 = vmul.f32 1.442695, %v2969_v44 }
 0x7ae   : > { %8758 = vst [vmem:[#allocation24_spill] sm:$0xff] %v7764_v59  ;;  %v7766_v61 = vpop.xlane.xlu0 %2849  ;;  %3170 = vadd.xlane.f32.xlu1 %v3169_v30  ;;  %v2853_v60 = vpop.xlane.xlu1 %2852  ;;  %v3145_v57 = vsel %vm2786_vm2, %v7764_v59, 0.0 }
 0x7af   : > { %v7771_v35 = vpop.eup %6191  ;;  %v2977_v4 = vsub.f32 %v7560_v6, %v2853_v60 }
 0x7b0   : > { %8759 = vst [vmem:[#allocation25_spill] sm:$0xff] %v7771_v35  ;;  %v3148_v30 = vsel %vm2786_vm2, %v7771_v35, 0.0  ;;  %v7777_v16 = vpop.eup %6193 }
 0x7b1   : > { %8760 = vst [vmem:[#allocation26_spill] sm:$0xff] %v7777_v16  ;;  %v3054_v48 = vmul.f32 1.442695, %v2977_v4 }
 0x7b2   : > { %v2826_v22 = vpop.xlane.xlu0 %2825  ;;  %3146 = vadd.xlane.f32.xlu1 %v3145_v57  ;;  %v2856_v13 = vpop.xlane.xlu1 %2855  ;;  %v3151_v57 = vsel %vm2786_vm2, %v7777_v16, 0.0 }
 0x7b3   : > { %v2968_v24 = vsub.f32 %v7564_v8, %v2826_v22  ;;  %v7783_v8 = vpop.eup %6195  ;;  %v2978_v60 = vsub.f32 %v7568_v56, %v2856_v13 }
 0x7b4   : > { %v3154_v22 = vsel %vm2786_vm2, %v7783_v8, 0.0 }
 0x7b5   : > { %v3036_v14 = vmul.f32 1.442695, %v2968_v24  ;;  %v7791_v24 = vpop.eup %6197 }
 0x7b6   : > { %v7779_v12 = vpop.xlane.xlu0 %2873  ;;  %3149 = vadd.xlane.f32.xlu1 %v3148_v30  ;;  %v2859_v6 = vpop.xlane.xlu1 %2858  ;;  %v3056_v30 = vmul.f32 1.442695, %v2978_v60 }
 0x7b7   : > { %6199 = vpow2.f32 %v3036_v14  ;;  %v1267_v14 = vld [vmem:[%s8676_s5 + $0x40] sm:$0xff]  ;;  %v2979_v16 = vsub.f32 %v7576_v29, %v2859_v6  ;;  %v2973_v6 = vsub.f32 %v7536_v9, %v7744_v20 }
 0x7b8   : > { %6201 = vpow2.f32 %v3038_v5 }
 0x7b9   : > { %6203 = vpow2.f32 %v3054_v48  ;;  %v3157_v48 = vsel %vm2786_vm2, %v7791_v24, 0.0 }
 0x7ba   : > { %v2877_v44 = vpop.xlane.xlu0 %2876  ;;  %3152 = vadd.xlane.f32.xlu1 %v3151_v57  ;;  %v2862_v56 = vpop.xlane.xlu1 %2861 }
 0x7be   : > { %v2880_v5 = vpop.xlane.xlu0 %2879  ;;  %3155 = vadd.xlane.f32.xlu1 %v3154_v22 }
 0x7bf   : > { %v2986_v4 = vsub.f32 %v7588_v45, %v2880_v5 }
 0x7c0   : > { %1313 = vperm.xlu0 %6132, %v1267_v14   ;;  %v2972_v14 = vsub.f32 %v7528_v39, %v7741_v21  ;;  %v2980_v39 = vsub.f32 %v7584_v42, %v2862_v56 }
 0x7c1   : > { %v3072_v57 = vmul.f32 1.442695, %v2986_v4  ;;  %v2865_v4 = vpop.xlane.xlu1 %2864 }
 0x7c2   : > { %v2883_v13 = vpop.xlane.xlu0 %2882  ;;  %3158 = vadd.xlane.f32.xlu1 %v3157_v48  ;;  %v3046_v48 = vmul.f32 1.442695, %v2973_v6  ;;  %v3060_v9 = vmul.f32 1.442695, %v2980_v39 }
 0x7c3   : > { %6205 = vpow2.f32 %v3072_v57  ;;  %v2987_v59 = vsub.f32 %v7596_v7, %v2883_v13  ;;  %v3058_v57 = vmul.f32 1.442695, %v2979_v16 }
 0x7c4   : > { %v7797_v35 = vpop.eup %6199  ;;  %6207 = vpow2.f32 %v3056_v30 }
 0x7c5   : > { %v3074_v22 = vmul.f32 1.442695, %v2987_v59  ;;  %v3160_v45 = vsel %vm2786_vm2, %v7797_v35, 0.0  ;;  %v7802_v60 = vpop.eup %6201  ;;  %v3044_v59 = vmul.f32 1.442695, %v2972_v14  ;;  %v2868_v13 = vpop.xlane.xlu1 %2867  ;;  %v2975_v14 = vsub.f32 %v7550_v15, %v7758_v62 }
 0x7c6   : > { %v2886_v5 = vpop.xlane.xlu0 %2885  ;;  %3161 = vadd.xlane.f32.xlu1 %v3160_v45  ;;  %v3163_v30 = vsel %vm2805_vm3, %v7802_v60, 0.0  ;;  %v7809_v29 = vpop.eup %6203  ;;  %v2985_v45 = vsub.f32 %v7580_v49, %v2877_v44 }
 0x7c7   : > { %6209 = vpow2.f32 %v3074_v22  ;;  %v2988_v7 = vsub.f32 %v7604_v34, %v2886_v5  ;;  %v3187_v16 = vsel %vm2786_vm2, %v7809_v29, 0.0  ;;  %v2974_v34 = vsub.f32 %v7544_v31, %v7751_v50 }
 0x7c8   : > { %6211 = vpow2.f32 %v3058_v57  ;;  %v2984_v5 = vsub.f32 %v7570_v58, %v7779_v12  ;;  %v3070_v57 = vmul.f32 1.442695, %v2985_v45 }
 0x7c9   : > { %v3076_v21 = vmul.f32 1.442695, %v2988_v7  ;;  %6213 = vpow2.f32 %v3044_v59  ;;  %v3048_v56 = vmul.f32 1.442695, %v2974_v34  ;;  %v2871_v31 = vpop.xlane.xlu1 %2870  ;;  %v3050_v7 = vmul.f32 1.442695, %v2975_v14 }
 0x7ca   : > { %3164 = vadd.xlane.f32.xlu1 %v3163_v30  ;;  %v2889_v50 = vpop.xlane.xlu0 %2888  ;;  %v2976_v30 = vsub.f32 %v7556_v28, %v7766_v61  ;;  %v3068_v62 = vmul.f32 1.442695, %v2984_v5  ;;  %v2981_v59 = vsub.f32 %v7592_v63, %v2865_v4 }
 0x7cb   : > { %6215 = vpow2.f32 %v3076_v21  ;;  %v2989_v39 = vsub.f32 %v7612_v3, %v2889_v50 }
 0x7cc   : > { %6217 = vpow2.f32 %v3046_v48  ;;  %v3052_v6 = vmul.f32 1.442695, %v2976_v30  ;;  %v3062_v28 = vmul.f32 1.442695, %v2981_v59 }
 0x7cd   : > { %6219 = vpow2.f32 %v3060_v9  ;;  %v2895_v15 = vpop.xlane.xlu1 %2894  ;;  %v3078_v48 = vmul.f32 1.442695, %v2989_v39  ;;  %v2982_v9 = vsub.f32 %v7600_v32, %v2868_v13 }
 0x7ce   : > { %3188 = vadd.xlane.f32.xlu1 %v3187_v16  ;;  %6221 = vpow2.f32 %v3048_v56  ;;  %v2892_v21 = vpop.xlane.xlu0 %2891  ;;  %v2991_v59 = vsub.f32 %v7620_v46, %v2895_v15 }
 0x7cf   : > { %6223 = vpow2.f32 %v3070_v57  ;;  %v2990_v61 = vsub.f32 %v7618_v33, %v2892_v21  ;;  %v3064_v57 = vmul.f32 1.442695, %v2982_v9 }
 0x7d0   : > { %v7818_v22 = vpop.eup %6205  ;;  %6225 = vpow2.f32 %v3050_v7  ;;  %v3082_v21 = vmul.f32 1.442695, %v2991_v59 }
 0x7d1   : > { %v3214_v42 = vsel %vm2786_vm2, %v7818_v22, 0.0  ;;  %v7823_v20 = vpop.eup %6207  ;;  %6227 = vpow2.f32 %v3068_v62  ;;  %v2898_v34 = vpop.xlane.xlu1 %2897 }
 0x7d2   : > { %3215 = vadd.xlane.f32.xlu1 %v3214_v42  ;;  %v3190_v49 = vsel %vm2786_vm2, %v7823_v20, 0.0  ;;  %6229 = vpow2.f32 %v3052_v6  ;;  %v3080_v42 = vmul.f32 1.442695, %v2990_v61 }
 0x7d3   : > { %6231 = vpow2.f32 %v3062_v28 }
 0x7d4   : > { %v7831_v44 = vpop.eup %6209  ;;  %6233 = vpow2.f32 %v3078_v48 }
 0x7d5   : > { %v3217_v58 = vsel %vm2786_vm2, %v7831_v44, 0.0  ;;  %v7838_v12 = vpop.eup %6211  ;;  %v2901_v5 = vpop.xlane.xlu1 %2900  ;;  %6235 = vpow2.f32 %v3080_v42 }
 0x7d6   : > { %3191 = vadd.xlane.f32.xlu1 %v3190_v49  ;;  %v7841_v16 = vpop.eup %6213  ;;  %v3193_v63 = vsel %vm2786_vm2, %v7838_v12, 0.0  ;;  %v2983_v49 = vsub.f32 %v7608_v51, %v2871_v31  ;;  %6237 = vpow2.f32 %v3064_v57 }
 0x7d7   : > { %v3172_v3 = vsel %vm2786_vm2, %v7841_v16, 0.0 }
 0x7d8   : > { %v7846_v4 = vpop.eup %6215  ;;  %v3066_v62 = vmul.f32 1.442695, %v2983_v49 }
 0x7d9   : > { %v7850_v45 = vpop.eup %6217  ;;  %v3220_v33 = vsel %vm2786_vm2, %v7846_v4, 0.0 }
 0x7da   : > { %3218 = vadd.xlane.f32.xlu1 %v3217_v58  ;;  %v7855_v56 = vpop.eup %6219  ;;  %v3175_v14 = vsel %vm2786_vm2, %v7850_v45, 0.0  ;;  %v2904_v58 = vpop.xlane.xlu1 %2903  ;;  %6239 = vpow2.f32 %v3066_v62 }
 0x7db   : > { %v7859_v50 = vpop.eup %6221  ;;  %v3196_v32 = vsel %vm2786_vm2, %v7855_v56, 0.0  ;;  %6241 = vpow2.f32 %v3082_v21 }
 0x7dc   : > { %v7864_v13 = vpop.eup %6223  ;;  %v3178_v7 = vsel %vm2786_vm2, %v7859_v50, 0.0 }
 0x7dd   : > { %v7868_v30 = vpop.eup %6225  ;;  %v3211_v51 = vsel %vm2786_vm2, %v7864_v13, 0.0 }
 0x7de   : > { %3194 = vadd.xlane.f32.xlu1 %v3193_v63  ;;  %v7873_v31 = vpop.eup %6227  ;;  %v3181_v6 = vsel %vm2786_vm2, %v7868_v30, 0.0  ;;  %v2907_v48 = vpop.xlane.xlu1 %2906 }
 0x7df   : > { %3173 = vadd.xlane.f32.xlu0 %v3172_v3  ;;  %v7877_v39 = vpop.eup %6229  ;;  %v3208_v28 = vsel %vm2786_vm2, %v7873_v31, 0.0 }
 0x7e0   : > { %v7881_v61 = vpop.eup %6231  ;;  %v3184_v15 = vsel %vm2805_vm3, %v7877_v39, 0.0 }
 0x7e1   : > { %v7887_v63 = vpop.eup %6233  ;;  %v3199_v3 = vsel %vm2786_vm2, %v7881_v61, 0.0 }
 0x7e2   : > { %3221 = vadd.xlane.f32.xlu1 %v3220_v33  ;;  %v7891_v9 = vpop.eup %6235  ;;  %v3223_v33 = vsel %vm2786_vm2, %v7887_v63, 0.0 }
 0x7e3   : > { %3176 = vadd.xlane.f32.xlu0 %v3175_v14  ;;  %v2992_v14 = vsub.f32 %v7626_v52, %v2898_v34  ;;  %v3226_v57 = vsel %vm2805_vm3, %v7891_v9, 0.0  ;;  %v7900_v49 = vpop.eup %6237 }
 0x7e5   : > { %v3084_v59 = vmul.f32 1.442695, %v2992_v14 }
 0x7e6   : > { %3197 = vadd.xlane.f32.xlu1 %v3196_v32  ;;  %v2910_v32 = vpop.xlane.xlu1 %2909 }
 0x7e7   : > { %3179 = vadd.xlane.f32.xlu0 %v3178_v7  ;;  %v7905_v21 = vpop.eup %6239 }
 0x7ea   : > { %3212 = vadd.xlane.f32.xlu1 %v3211_v51  ;;  %v2913_v34 = vpop.xlane.xlu1 %2912 }
 0x7eb   : > { %3182 = vadd.xlane.f32.xlu0 %v3181_v6  ;;  %v3202_v6 = vsel %vm2786_vm2, %v7900_v49, 0.0 }
 0x7ee   : > { %v7883_v46 = vpop.xlane.xlu0 %2915  ;;  %3209 = vadd.xlane.f32.xlu1 %v3208_v28 }
 0x7ef   : > { %3185 = vadd.xlane.f32.xlu0 %v3184_v15  ;;  %v2993_v15 = vsub.f32 %v7630_v53, %v2901_v5  ;;  %v2994_v53 = vsub.f32 %v7634_v0, %v2904_v58 }
 0x7f2   : > { %v7893_v42 = vpop.xlane.xlu0 %2918  ;;  %3200 = vadd.xlane.f32.xlu1 %v3199_v3 }
 0x7f3   : > { %3224 = vadd.xlane.f32.xlu0 %v3223_v33  ;;  %v7911_v33 = vpop.eup %6241 }
 0x7f6   : > { %v2922_v7 = vpop.xlane.xlu0 %2921  ;;  %3227 = vadd.xlane.f32.xlu1 %v3226_v57  ;;  %v3086_v57 = vmul.f32 1.442695, %v2993_v15 }
 0x7f7   : > { %v3000_v62 = vsub.f32 %v7672_v43, %v2922_v7  ;;  %v3205_v43 = vsel %vm2805_vm3, %v7905_v21, 0.0 }
 0x7f9   : > { %v3100_v51 = vmul.f32 1.442695, %v3000_v62  ;;  %v3229_v62 = vsel %vm2786_vm2, %v7911_v33, 0.0 }
 0x7fa   : > { %v2925_v28 = vpop.xlane.xlu0 %2924  ;;  %3203 = vadd.xlane.f32.xlu1 %v3202_v6 }
 0x7fb   : > { %6243 = vpow2.f32 %v3100_v51  ;;  %v3001_v52 = vsub.f32 %v7680_v40, %v2925_v28  ;;  %v7916_v40 = vpop.xlane.xlu1 %2936  ;;  %v1268_v51 = vld [vmem:[%s8676_s5 + $0x48] sm:$0xff] }
 0x7fc   : > { %6245 = vpow2.f32 %v3084_v59 }
 0x7fd   : > { %v3102_v3 = vmul.f32 1.442695, %v3001_v52  ;;  %v3088_v52 = vmul.f32 1.442695, %v2994_v53 }
 0x7fe   : > { %v2928_v14 = vpop.xlane.xlu0 %2927  ;;  %3206 = vadd.xlane.f32.xlu1 %v3205_v43 }
 0x7ff   : > { %6247 = vpow2.f32 %v3102_v3  ;;  %v3002_v7 = vsub.f32 %v7688_v10, %v2928_v14  ;;  %v2940_v28 = vpop.xlane.xlu1 %2939  ;;  %v2995_v10 = vsub.f32 %v7638_v11, %v2907_v48  ;;  %v2996_v48 = vsub.f32 %v7642_v17, %v2910_v32 }
 0x800   : > { %6249 = vpow2.f32 %v3086_v57 }
 0x801   : > { %v3104_v5 = vmul.f32 1.442695, %v3002_v7  ;;  %v3090_v0 = vmul.f32 1.442695, %v2995_v10 }
 0x802   : > { %3230 = vadd.xlane.f32.xlu1 %v3229_v62  ;;  %v2931_v59 = vpop.xlane.xlu0 %2930 }
 0x803   : > { %6251 = vpow2.f32 %v3104_v5  ;;  %v2943_v7 = vpop.xlane.xlu1 %2942  ;;  %v3003_v11 = vsub.f32 %v7696_v47, %v2931_v59  ;;  %v2997_v47 = vsub.f32 %v7646_v23, %v2913_v34  ;;  %v3006_v59 = vsub.f32 %v7654_v26, %v2940_v28 }
 0x804   : > { %6253 = vpow2.f32 %v3088_v52 }
 0x805   : > { %6255 = vpow2.f32 %v3090_v0 }
 0x806   : > { %v2934_v43 = vpop.xlane.xlu0 %2933 }
 0x807   : > { %v3004_v58 = vsub.f32 %v7703_v41, %v2934_v43  ;;  %v2999_v41 = vsub.f32 %v7664_v1, %v7893_v42  ;;  %v2946_v10 = vpop.xlane.xlu1 %2945  ;;  %v3094_v1 = vmul.f32 1.442695, %v2997_v47  ;;  %v3007_v42 = vsub.f32 %v7660_v27, %v2943_v7 }
 0x808   : > { %v7922_v6 = vpop.eup %6243  ;;  %v3008_v28 = vsub.f32 %v7668_v36, %v2946_v10 }
 0x809   : > { %1318 = vperm.xlu0 %6132, %v1268_v51   ;;  %v3256_v15 = vsel %vm2786_vm2, %v7922_v6, 0.0  ;;  %v7927_v3 = vpop.eup %6245  ;;  %v3108_v62 = vmul.f32 1.442695, %v3004_v58  ;;  %v3106_v51 = vmul.f32 1.442695, %v3003_v11  ;;  %v2998_v11 = vsub.f32 %v7656_v38, %v7883_v46  ;;  %v8762_v46 = vld [vmem:[#allocation19_spill] sm:$0xff] }
 0x80a   : > { %3257 = vadd.xlane.f32.xlu1 %v3256_v15  ;;  %v3232_v14 = vsel %vm2786_vm2, %v7927_v3, 0.0  ;;  %v3092_v15 = vmul.f32 1.442695, %v2996_v48  ;;  %v3098_v43 = vmul.f32 1.442695, %v2999_v41 }
 0x80b   : > { %6257 = vpow2.f32 %v3108_v62  ;;  %v2949_v58 = vpop.xlane.xlu1 %2948  ;;  %v3114_v26 = vmul.f32 1.442695, %v3007_v42  ;;  %v8761_v62 = vld [vmem:[#allocation18_spill] sm:$0xff]  ;;  %v3096_v41 = vmul.f32 1.442695, %v2998_v11 }
 0x80c   : > { %v7932_v57 = vpop.eup %6247  ;;  %6259 = vpow2.f32 %v3106_v51  ;;  %v3116_v38 = vmul.f32 1.442695, %v3008_v28  ;;  %v8764_v28 = vld [vmem:[#allocation21_spill] sm:$0xff] }
 0x80d   : > { %v3259_v53 = vsel %vm2786_vm2, %v7932_v57, 0.0  ;;  %v7938_v5 = vpop.eup %6249  ;;  %6261 = vpow2.f32 %v3092_v15  ;;  %v3009_v15 = vsub.f32 %v8762_v46, %v2949_v58 }
 0x80e   : > { %3233 = vadd.xlane.f32.xlu1 %v3232_v14  ;;  %v3235_v17 = vsel %vm2786_vm2, %v7938_v5, 0.0  ;;  %v3112_v14 = vmul.f32 1.442695, %v3006_v59  ;;  %6263 = vpow2.f32 %v3098_v43  ;;  %v8763_v43 = vld [vmem:[#allocation20_spill] sm:$0xff] }
 0x80f   : > { %6265 = vpow2.f32 %v3094_v1  ;;  %v2952_v51 = vpop.xlane.xlu1 %2951 }
 0x810   : > { %v7947_v32 = vpop.eup %6251  ;;  %6267 = vpow2.f32 %v3112_v14  ;;  %v3010_v1 = vsub.f32 %v8763_v43, %v2952_v51 }
 0x811   : > { %v3262_v23 = vsel %vm2786_vm2, %v7947_v32, 0.0  ;;  %v7955_v34 = vpop.eup %6253  ;;  %6269 = vpow2.f32 %v3114_v26 }
 0x812   : > { %3260 = vadd.xlane.f32.xlu1 %v3259_v53  ;;  %v3238_v27 = vsel %vm2786_vm2, %v7955_v34, 0.0  ;;  %v7964_v7 = vpop.eup %6255  ;;  %v3005_v53 = vsub.f32 %v8761_v62, %v7916_v40  ;;  %6271 = vpow2.f32 %v3096_v41  ;;  %v3118_v40 = vmul.f32 1.442695, %v3009_v15 }
 0x813   : > { %v7942_v52 = vpop.xlane.xlu0 %3125  ;;  %v3241_v36 = vsel %vm2786_vm2, %v7964_v7, 0.0  ;;  %6273 = vpow2.f32 %v3116_v38  ;;  %v2955_v58 = vpop.xlane.xlu1 %2954  ;;  %v3120_v26 = vmul.f32 1.442695, %v3010_v1 }
 0x814   : > { %v3110_v47 = vmul.f32 1.442695, %v3005_v53 }
 0x816   : > { %3236 = vadd.xlane.f32.xlu1 %v3235_v17  ;;  %6275 = vpow2.f32 %v3110_v47 }
 0x817   : > { %v7950_v0 = vpop.xlane.xlu0 %3128  ;;  %6277 = vpow2.f32 %v3118_v40 }
 0x818   : > { %v7971_v10 = vpop.eup %6257  ;;  %6279 = vpow2.f32 %v3120_v26 }
 0x819   : > { %v7973_v59 = vpop.eup %6259  ;;  %v3268_v42 = vsel %vm2805_vm3, %v7971_v10, 0.0 }
 0x81a   : > { %3263 = vadd.xlane.f32.xlu1 %v3262_v23  ;;  %v7978_v23 = vpop.eup %6261  ;;  %v3265_v14 = vsel %vm2786_vm2, %v7973_v59, 0.0 }
 0x81b   : > { %v7960_v48 = vpop.xlane.xlu0 %3131  ;;  %v7982_v11 = vpop.eup %6263  ;;  %v3244_v53 = vsel %vm2786_vm2, %v7978_v23, 0.0 }
 0x81c   : > { %v7987_v41 = vpop.eup %6265  ;;  %v3253_v51 = vsel %vm2786_vm2, %v7982_v11, 0.0 }
 0x81d   : > { %v7991_v38 = vpop.eup %6267  ;;  %v3247_v15 = vsel %vm2805_vm3, %v7987_v41, 0.0 }
 0x81e   : > { %3239 = vadd.xlane.f32.xlu1 %v3238_v27  ;;  %v3011_v27 = vsub.f32 %v8764_v28, %v2955_v58  ;;  %8765 = vst [vmem:[#allocation18_spill] sm:$0xff] %v7991_v38  ;;  %v3274_v40 = vsel %vm2786_vm2, %v7991_v38, 0.0  ;;  %v8768_v38 = vmov 0.0  }
 0x81f   : > { %v3135_v17 = vpop.xlane.xlu0 %3134 }
 0x820   : > { %v3122_v46 = vmul.f32 1.442695, %v3011_v27 }
 0x822   : > { %3242 = vadd.xlane.f32.xlu1 %v3241_v36  ;;  %v7995_v36 = vpop.eup %6269  ;;  %6281 = vpow2.f32 %v3122_v46 }
 0x823   : > { %v3138_v62 = vpop.xlane.xlu0 %3137  ;;  %8766 = vst [vmem:[#allocation19_spill] sm:$0xff] %v7995_v36  ;;  %v7999_v43 = vpop.eup %6271  ;;  %v3277_v1 = vsel %vm2786_vm2, %v7995_v36, 0.0 }
 0x824   : > { %v3250_v26 = vsel %vm2786_vm2, %v7999_v43, 0.0 }
 0x826   : > { %3269 = vadd.xlane.f32.xlu1 %v3268_v42  ;;  %v8003_v42 = vpop.eup %6273 }
 0x827   : > { %v3141_v47 = vpop.xlane.xlu0 %3140  ;;  %v8009_v28 = vpop.eup %6275  ;;  %v3280_v27 = vsel %vm2786_vm2, %v8003_v42, 0.0 }
 0x828   : > { %3266 = vadd.xlane.f32.xlu0 %v3265_v14  ;;  %8767 = vst [vmem:[#allocation20_spill] sm:$0xff] %v8009_v28  ;;  %v3271_v46 = vsel %vm2786_vm2, %v8009_v28, 0.0 }
 0x82a   : > { %3245 = vadd.xlane.f32.xlu1 %v3244_v53  ;;  %v8013_v53 = vpop.eup %6277 }
 0x82c   : > { %3254 = vadd.xlane.f32.xlu0 %v3253_v51 }
 0x82e   : > { %3248 = vadd.xlane.f32.xlu1 %v3247_v15  ;;  %v3283_v15 = vsel %vm2786_vm2, %v8013_v53, 0.0 }
 0x82f   : > { %v8005_v58 = vpop.xlane.xlu1 %3167 }
 0x830   : > { %3275 = vadd.xlane.f32.xlu0 %v3274_v40  ;;  %v8021_v40 = vpop.eup %6279 }
 0x832   : > { %3278 = vadd.xlane.f32.xlu1 %v3277_v1 }
 0x833   : > { %v3144_v14 = vpop.xlane.xlu0 %3143 }
 0x834   : > { %6283 = vrcp.f32 %v3144_v14  ;;  %3251 = vadd.xlane.f32.xlu0 %v3250_v26  ;;  %v3286_v14 = vsel %vm2786_vm2, %v8021_v40, 0.0 }
 0x835   : > { %6285 = vrcp.f32 %v3141_v47  ;;  %v8027_v47 = vpop.eup %6281 }
 0x836   : > { %3281 = vadd.xlane.f32.xlu1 %v3280_v27  ;;  %6287 = vrcp.f32 %v3138_v62 }
 0x837   : > { %v8015_v51 = vpop.xlane.xlu1 %3170  ;;  %6289 = vrcp.f32 %v3135_v17 }
 0x838   : > { %3272 = vadd.xlane.f32.xlu0 %v3271_v46  ;;  %v3289_v46 = vsel %vm2805_vm3, %v8027_v47, 0.0  ;;  %6291 = vrcp.f32 %v7960_v48 }
 0x839   : > { %6293 = vrcp.f32 %v7950_v0 }
 0x83a   : > { %3284 = vadd.xlane.f32.xlu1 %v3283_v15  ;;  %6295 = vrcp.f32 %v7942_v52 }
 0x83b   : > { %v8023_v1 = vpop.xlane.xlu1 %3146 }
 0x83e   : > { %3287 = vadd.xlane.f32.xlu1 %v3286_v14 }
 0x83f   : > { %v3150_v26 = vpop.xlane.xlu1 %3149 }
 0x841   : > { %v6284_v27 = vpop.eup %6283 }
 0x842   : > { %3290 = vadd.xlane.f32.xlu1 %v3289_v46  ;;  %v3354_v62 = vmul.f32 %v6284_v27, %v7753_v37  ;;  %v6286_v15 = vpop.eup %6285  ;;  %v1270_v46 = vld [vmem:[%s8676_s5 + $0x58] sm:$0xff] }
 0x843   : > { %v3153_v28 = vpop.xlane.xlu1 %3152  ;;  %v3353_v17 = vmul.f32 %v6286_v15, %v7736_v25  ;;  %v6288_v14 = vpop.eup %6287 }
 0x844   : > { %5785 = vmatpush3.xpose.msk.msra.mxu0 %vm2786_vm2, %v3354_v62  ;;  %v3352_v37 = vmul.f32 %v6288_v14, %v7730_v54  ;;  %v6290_v48 = vpop.eup %6289  ;;  %v1269_v54 = vld [vmem:[%s8676_s5 + $0x50] sm:$0xff] }
 0x845   : > { %5786 = vmatprep.subr.mxu0 %v8768_v38  ;;  %v3351_v25 = vmul.f32 %v6290_v48, %v7725_v2  ;;  %v6292_v0 = vpop.eup %6291  ;;  %v1314_v48 = vpop.permute.xlu0 %1313 }
 0x846   : > { %v3350_v52 = vmul.f32 %v6292_v0, %v7720_v55  ;;  %v6294_v15 = vpop.eup %6293 }
 0x847   : > { %v3156_v36 = vpop.xlane.xlu1 %3155  ;;  %v3349_v2 = vmul.f32 %v6294_v15, %v7716_v19  ;;  %v6296_v14 = vpop.eup %6295 }
 0x848   : > { %5787 = vmatpush3.xpose.msk.msra.mxu0 %vm2786_vm2, %v3353_v17  ;;  %v3348_v55 = vmul.f32 %v6296_v14, %v7711_v18 }
 0x849   : > { %5788 = vmatprep.subr.mxu0 %v8768_v38 }
 0x84b   : > { %v3159_v27 = vpop.xlane.xlu1 %3158 }
 0x84c   : > { %5789 = vmatpush3.xpose.msk.msra.mxu0 %vm2786_vm2, %v3352_v37 }
 0x84d   : > { %5790 = vmatprep.subr.mxu0 %v8768_v38 }
 0x84e   : > { %1328 = vperm.xlu0 %6132, %v1270_v46  }
 0x84f   : > { %v3162_v62 = vpop.xlane.xlu1 %3161 }
 0x850   : > { %5791 = vmatpush3.xpose.msk.msra.mxu0 %vm2786_vm2, %v3351_v25  ;;  %v8769_v25 = vld [vmem:[#allocation15_spill] sm:$0xff] }
 0x851   : > { %5792 = vmatprep.subr.mxu0 %v8768_v38  ;;  %v1446_v0 = vadd.f32 %v8769_v25, %v1314_v48 }
 0x853   : > { %1323 = vperm.xlu1 %6131, %v1269_v54   ;;  %v3165_v17 = vpop.xlane.xlu1 %3164 }
 0x854   : > { %6297 = vrcp.f32 %v3165_v17  ;;  %5793 = vmatpush3.xpose.msk.msra.mxu0 %vm2786_vm2, %v3350_v52 }
 0x855   : > { %5794 = vmatprep.subr.mxu0 %v8768_v38  ;;  %6299 = vrcp.f32 %v3162_v62 }
 0x856   : > { %6301 = vrcp.f32 %v3159_v27 }
 0x857   : > { %v8056_v37 = vpop.xlane.xlu1 %3188  ;;  %6303 = vrcp.f32 %v3156_v36 }
 0x858   : > { %5795 = vmatpush3.xpose.msk.msra.mxu0 %vm2786_vm2, %v3349_v2  ;;  %6305 = vrcp.f32 %v3153_v28 }
 0x859   : > { %5796 = vmatprep.subr.mxu0 %v8768_v38  ;;  %6307 = vrcp.f32 %v3150_v26 }
 0x85a   : > { %6309 = vrcp.f32 %v8023_v1  ;;  %v8770_v1 = vld [vmem:[#allocation26_spill] sm:$0xff] }
 0x85b   : > { %v8061_v46 = vpop.xlane.xlu1 %3215 }
 0x85c   : > { %5797 = vmatpush3.xpose.msk.msra.mxu0 %vm2786_vm2, %v3348_v55 }
 0x85d   : > { %5818 = vmatprep.subr.mxu0 %v8768_v38 }
 0x85f   : > { %5799 = vmatmul.mubr.msk.f32.vlgmr.msra.gmra.mxu0 %vm2786_vm2, %v1446_v0  ;;  %v8067_v19 = vpop.xlane.xlu1 %3191 }
 0x860   : > { %5832 = vmatprep.mubr.msk.f32.mxu0 %vm6479_vm14, %v8768_v38 }
 0x861   : > { %v6298_v62 = vpop.eup %6297 }
 0x862   : > { %v3361_v18 = vmul.f32 %v6298_v62, %v7802_v60  ;;  %v6300_v27 = vpop.eup %6299 }
 0x863   : > { %v8072_v54 = vpop.xlane.xlu1 %3218  ;;  %v3360_v36 = vmul.f32 %v6300_v27, %v7797_v35  ;;  %v6302_v52 = vpop.eup %6301  ;;  %v8771_v27 = vld [vmem:[#allocation25_spill] sm:$0xff] }
 0x864   : > { %5802 = vmatpush3.xpose.msk.msra.mxu1 %vm2786_vm2, %v3361_v18  ;;  %v3359_v60 = vmul.f32 %v6302_v52, %v7791_v24  ;;  %v6304_v28 = vpop.eup %6303 }
 0x865   : > { %5803 = vmatprep.subr.mxu1 %v8768_v38  ;;  %v3358_v35 = vmul.f32 %v6304_v28, %v7783_v8  ;;  %v6306_v26 = vpop.eup %6305  ;;  %v8772_v28 = vld [vmem:[#allocation24_spill] sm:$0xff] }
 0x866   : > { %v3357_v25 = vmul.f32 %v6306_v26, %v8770_v1  ;;  %v6308_v24 = vpop.eup %6307  ;;  %v1484_v1 = vcombine.high %v1446_v0, %v1446_v0 }
 0x867   : > { %v8077_v15 = vpop.xlane.xlu1 %3194  ;;  %v6310_v8 = vpop.eup %6309 }
 0x868   : > { %v3174_v17 = vpop.xlane.xlu0 %3173  ;;  %5804 = vmatpush3.xpose.msk.msra.mxu1 %vm2786_vm2, %v3360_v36  ;;  %v3356_v36 = vmul.f32 %v6308_v24, %v8771_v27 }
 0x869   : > { %5805 = vmatprep.subr.mxu1 %v8768_v38 }
 0x86b   : > { %v8083_v2 = vpop.xlane.xlu1 %3221 }
 0x86c   : > { %v3177_v14 = vpop.xlane.xlu0 %3176  ;;  %5806 = vmatpush3.xpose.msk.msra.mxu1 %vm2786_vm2, %v3359_v60 }
 0x86d   : > { %5807 = vmatprep.subr.mxu1 %v8768_v38 }
 0x86f   : > { %v3198_v48 = vpop.xlane.xlu1 %3197 }
 0x870   : > { %v3180_v55 = vpop.xlane.xlu0 %3179  ;;  %5808 = vmatpush3.xpose.msk.msra.mxu1 %vm2786_vm2, %v3358_v35  ;;  %v3355_v35 = vmul.f32 %v6310_v8, %v8772_v28 }
 0x871   : > { %5809 = vmatprep.subr.mxu1 %v8768_v38 }
 0x873   : > { %v8091_v62 = vpop.xlane.xlu1 %3212 }
 0x874   : > { %v3183_v18 = vpop.xlane.xlu0 %3182  ;;  %5810 = vmatpush3.xpose.msk.msra.mxu1 %vm2786_vm2, %v3357_v25 }
 0x875   : > { %5811 = vmatprep.subr.mxu1 %v8768_v38 }
 0x877   : > { %v8096_v52 = vpop.xlane.xlu1 %3209 }
 0x878   : > { %v3186_v60 = vpop.xlane.xlu0 %3185  ;;  %5812 = vmatpush3.xpose.msk.msra.mxu1 %vm2786_vm2, %v3356_v36 }
 0x879   : > { %6311 = vrcp.f32 %v3186_v60  ;;  %5813 = vmatprep.subr.mxu1 %v8768_v38 }
 0x87a   : > { %6313 = vrcp.f32 %v3183_v18 }
 0x87b   : > { %v3201_v26 = vpop.xlane.xlu1 %3200  ;;  %6315 = vrcp.f32 %v3180_v55 }
 0x87c   : > { %5814 = vmatpush3.xpose.msk.msra.mxu1 %vm2786_vm2, %v3355_v35  ;;  %6317 = vrcp.f32 %v3177_v14  ;;  %v3225_v28 = vpop.xlane.xlu0 %3224 }
 0x87d   : > { %5835 = vmatprep.subr.mxu1 %v8768_v38  ;;  %6319 = vrcp.f32 %v3174_v17 }
 0x87f   : > { %5816 = vmatmul.mubr.msk.f32.vlgmr.msra.gmra.mxu1 %vm2786_vm2, %v1484_v1  ;;  %v3228_v25 = vpop.xlane.xlu1 %3227 }
 0x880   : > { %5849 = vmatprep.mubr.msk.f32.mxu1 %vm6479_vm14, %v8768_v38 }
 0x883   : > { %v3204_v24 = vpop.xlane.xlu1 %3203 }
 0x886   : > { %v6312_v27 = vpop.eup %6311 }
 0x887   : > { %v3207_v36 = vpop.xlane.xlu1 %3206  ;;  %v3368_v18 = vmul.f32 %v6312_v27, %v7877_v39  ;;  %v6314_v8 = vpop.eup %6313 }
 0x888   : > { %6321 = vrcp.f32 %v3207_v36  ;;  %v3367_v0 = vmul.f32 %v6314_v8, %v7868_v30  ;;  %v6316_v55 = vpop.eup %6315  ;;  %v8774_v36 = vld [vmem:[#allocation22_spill] sm:$0xff] }
 0x889   : > { %5819 = vmatpush3.xpose.msk.msra.mxu0 %vm2786_vm2, %v3368_v18  ;;  %6323 = vrcp.f32 %v3204_v24  ;;  %v3366_v17 = vmul.f32 %v6316_v55, %v7859_v50  ;;  %v6318_v14 = vpop.eup %6317 }
 0x88a   : > { %5820 = vmatprep.subr.mxu0 %v8768_v38  ;;  %6325 = vrcp.f32 %v8015_v51  ;;  %v3365_v51 = vmul.f32 %v6318_v14, %v7850_v45  ;;  %v6320_v60 = vpop.eup %6319 }
 0x88b   : > { %6327 = vrcp.f32 %v3201_v26  ;;  %v8114_v39 = vpop.xlane.xlu1 %3230  ;;  %v3364_v26 = vmul.f32 %v6320_v60, %v7841_v16 }
 0x88c   : > { %6329 = vrcp.f32 %v8005_v58 }
 0x88d   : > { %5821 = vmatpush3.xpose.msk.msra.mxu0 %vm2786_vm2, %v3367_v0  ;;  %6331 = vrcp.f32 %v3198_v48 }
 0x88e   : > { %5822 = vmatprep.subr.mxu0 %v8768_v38  ;;  %6333 = vrcp.f32 %v3228_v25  ;;  %v8773_v25 = vld [vmem:[#allocation23_spill] sm:$0xff] }
 0x88f   : > { %6335 = vrcp.f32 %v8077_v15 }
 0x890   : > { %6337 = vrcp.f32 %v3225_v28 }
 0x891   : > { %5823 = vmatpush3.xpose.msk.msra.mxu0 %vm2786_vm2, %v3366_v17  ;;  %6339 = vrcp.f32 %v8067_v19 }
 0x892   : > { %5824 = vmatprep.subr.mxu0 %v8768_v38  ;;  %6341 = vrcp.f32 %v8083_v2  ;;  %v1319_v2 = vpop.permute.xlu0 %1318 }
 0x893   : > { %v8119_v30 = vpop.xlane.xlu1 %3257  ;;  %6343 = vrcp.f32 %v8056_v37  ;;  %v8775_v37 = vld [vmem:[#allocation17_spill] sm:$0xff] }
 0x894   : > { %6345 = vrcp.f32 %v8072_v54  ;;  %v1449_v0 = vadd.f32 %v8775_v37, %v1319_v2 }
 0x895   : > { %v6322_v35 = vpop.eup %6321  ;;  %5825 = vmatpush3.xpose.msk.msra.mxu0 %vm2786_vm2, %v3365_v51  ;;  %6347 = vrcp.f32 %v8061_v46 }
 0x896   : > { %5826 = vmatprep.subr.mxu0 %v8768_v38  ;;  %v3375_v50 = vmul.f32 %v6322_v35, %v7905_v21  ;;  %v6324_v58 = vpop.eup %6323  ;;  %6349 = vrcp.f32 %v8091_v62 }
 0x897   : > { %v8126_v48 = vpop.xlane.xlu1 %3233  ;;  %v6326_v1 = vpop.eup %6325  ;;  %v3374_v45 = vmul.f32 %v6324_v58, %v7900_v49  ;;  %6351 = vrcp.f32 %v8096_v52  ;;  %v1485_v52 = vcombine.high %v1449_v0, %v1449_v0 }
 0x898   : > { %5836 = vmatpush3.xpose.msk.msra.mxu1 %vm2786_vm2, %v3375_v50  ;;  %v6328_v21 = vpop.eup %6327  ;;  %v3363_v16 = vmul.f32 %v6326_v1, %v8773_v25 }
 0x899   : > { %5827 = vmatpush3.xpose.msk.msra.mxu0 %vm2786_vm2, %v3364_v26  ;;  %5837 = vmatprep.subr.mxu1 %v8768_v38  ;;  %v6330_v24 = vpop.eup %6329  ;;  %v3373_v49 = vmul.f32 %v6328_v21, %v7881_v61 }
 0x89a   : > { %5828 = vmatprep.subr.mxu0 %v8768_v38  ;;  %v6332_v19 = vpop.eup %6331  ;;  %v3362_v18 = vmul.f32 %v6330_v24, %v8774_v36 }
 0x89b   : > { %v8136_v15 = vpop.xlane.xlu1 %3260  ;;  %v6334_v8 = vpop.eup %6333  ;;  %v3372_v55 = vmul.f32 %v6332_v19, %v7855_v56 }
 0x89c   : > { %5838 = vmatpush3.xpose.msk.msra.mxu1 %vm2786_vm2, %v3374_v45  ;;  %v6336_v61 = vpop.eup %6335  ;;  %v3382_v17 = vmul.f32 %v6334_v8, %v7891_v9 }
 0x89d   : > { %5829 = vmatpush3.xpose.msk.msra.mxu0 %vm2786_vm2, %v3363_v16  ;;  %5839 = vmatprep.subr.mxu1 %v8768_v38  ;;  %v6338_v14 = vpop.eup %6337  ;;  %v3371_v56 = vmul.f32 %v6336_v61, %v7838_v12 }
 0x89e   : > { %5830 = vmatprep.subr.mxu0 %v8768_v38  ;;  %v6340_v46 = vpop.eup %6339  ;;  %v3381_v51 = vmul.f32 %v6338_v14, %v7887_v63 }
 0x89f   : > { %v8146_v27 = vpop.xlane.xlu1 %3236  ;;  %v6342_v60 = vpop.eup %6341  ;;  %v3370_v12 = vmul.f32 %v6340_v46, %v7823_v20 }
 0x8a0   : > { %5840 = vmatpush3.xpose.msk.msra.mxu1 %vm2786_vm2, %v3373_v49  ;;  %v6344_v28 = vpop.eup %6343  ;;  %v3380_v62 = vmul.f32 %v6342_v60, %v7846_v4 }
 0x8a1   : > { %5831 = vmatpush3.xpose.msk.msra.mxu0 %vm2786_vm2, %v3362_v18  ;;  %5841 = vmatprep.subr.mxu1 %v8768_v38  ;;  %v6346_v50 = vpop.eup %6345  ;;  %v3369_v63 = vmul.f32 %v6344_v28, %v7809_v29 }
 0x8a2   : > { %5852 = vmatprep.subr.mxu0 %v8768_v38  ;;  %v3379_v58 = vmul.f32 %v6346_v50, %v7831_v44  ;;  %v6348_v26 = vpop.eup %6347 }
 0x8a3   : > { %v8156_v54 = vpop.xlane.xlu1 %3263  ;;  %v3378_v29 = vmul.f32 %v6348_v26, %v7818_v22  ;;  %v6350_v1 = vpop.eup %6349  ;;  %v6481_v26 = vmov 5  }
 0x8a4   : > { %5833 = vmatmul.mubr.msk.f32.vlgmr.msra.gmra.mxu0 %vm2786_vm2, %v1449_v0  ;;  %5842 = vmatpush3.xpose.msk.msra.mxu1 %vm2786_vm2, %v3372_v55  ;;  %v3377_v45 = vmul.f32 %v6350_v1, %v7864_v13  ;;  %v6352_v21 = vpop.eup %6351 }
 0x8a5   : > { %5853 = vmatpush3.xpose.msk.msra.mxu0 %vm2786_vm2, %v3382_v17  ;;  %5843 = vmatprep.subr.mxu1 %v8768_v38  ;;  %v3376_v22 = vmul.f32 %v6352_v21, %v7873_v31 }
 0x8a6   : > { %5854 = vmatprep.subr.mxu0 %v8768_v38  ;;  %5866 = vmatprep.mubr.msk.f32.mxu0 %vm6479_vm14, %v8768_v38 }
 0x8a7   : > { %v3240_v9 = vpop.xlane.xlu1 %3239  ;;  %6136 = vset.pattern.permute.xlu0 %v6481_v26 }
 0x8a8   : > { %5844 = vmatpush3.xpose.msk.msra.mxu1 %vm2786_vm2, %v3371_v56 }
 0x8a9   : > { %5855 = vmatpush3.xpose.msk.msra.mxu0 %vm2786_vm2, %v3381_v51  ;;  %5845 = vmatprep.subr.mxu1 %v8768_v38 }
 0x8aa   : > { %5856 = vmatprep.subr.mxu0 %v8768_v38 }
 0x8ab   : > { %v3243_v35 = vpop.xlane.xlu1 %3242 }
 0x8ac   : > { %5846 = vmatpush3.xpose.msk.msra.mxu1 %vm2786_vm2, %v3370_v12 }
 0x8ad   : > { %5857 = vmatpush3.xpose.msk.msra.mxu0 %vm2786_vm2, %v3380_v62  ;;  %5847 = vmatprep.subr.mxu1 %v8768_v38 }
 0x8ae   : > { %5858 = vmatprep.subr.mxu0 %v8768_v38 }
 0x8af   : > { %v3270_v20 = vpop.xlane.xlu1 %3269 }
 0x8b0   : > { %5848 = vmatpush3.xpose.msk.msra.mxu1 %vm2786_vm2, %v3369_v63  ;;  %v6480_v63 = vmov 4  }
 0x8b1   : > { %5859 = vmatpush3.xpose.msk.msra.mxu0 %vm2786_vm2, %v3379_v58  ;;  %5869 = vmatprep.subr.mxu1 %v8768_v38  ;;  %v3267_v13 = vpop.xlane.xlu0 %3266  ;;  %v8266_v58 = vld [vmem:[%s8679_s8 + $0x10] sm:$0xff] }
 0x8b2   : > { %5860 = vmatprep.subr.mxu0 %v8768_v38  ;;  %6133 = vset.pattern.permute.xlu1 %v6480_v63 }
 0x8b3   : > { %5850 = vmatmul.mubr.msk.f32.vlgmr.msra.gmra.mxu1 %vm2786_vm2, %v1485_v52  ;;  %v3246_v4 = vpop.xlane.xlu1 %3245  ;;  %4248 = vperm.xlu1 %6133, %v8266_v58  }
 0x8b4   : > { %5883 = vmatprep.mubr.msk.f32.mxu1 %vm6479_vm14, %v8768_v38 }
 0x8b5   : > { %5861 = vmatpush3.xpose.msk.msra.mxu0 %vm2786_vm2, %v3378_v29  ;;  %v3255_v31 = vpop.xlane.xlu0 %3254 }
 0x8b6   : > { %5862 = vmatprep.subr.mxu0 %v8768_v38 }
 0x8b7   : > { %v3249_v44 = vpop.xlane.xlu1 %3248 }
 0x8b8   : > { %6353 = vrcp.f32 %v3249_v44 }
 0x8b9   : > { %5863 = vmatpush3.xpose.msk.msra.mxu0 %vm2786_vm2, %v3377_v45  ;;  %6355 = vrcp.f32 %v3246_v4  ;;  %v3276_v61 = vpop.xlane.xlu0 %3275  ;;  %v8777_v4 = vld [vmem:[#allocation16_spill] sm:$0xff]  ;;  %v8778_v45 = vld [vmem:[#allocation19_spill] sm:$0xff] }
 0x8ba   : > { %5864 = vmatprep.subr.mxu0 %v8768_v38  ;;  %6357 = vrcp.f32 %v3243_v35 }
 0x8bb   : > { %v8195_v25 = vpop.xlane.xlu1 %3278  ;;  %6359 = vrcp.f32 %v3270_v20 }
 0x8bc   : > { %6361 = vrcp.f32 %v3240_v9 }
 0x8bd   : > { %5865 = vmatpush3.xpose.msk.msra.mxu0 %vm2786_vm2, %v3376_v22  ;;  %6363 = vrcp.f32 %v3267_v13  ;;  %v3252_v17 = vpop.xlane.xlu0 %3251  ;;  %v8779_v22 = vld [vmem:[#allocation18_spill] sm:$0xff]  ;;  %v8780_v13 = vld [vmem:[#allocation20_spill] sm:$0xff] }
 0x8be   : > { %5886 = vmatprep.subr.mxu0 %v8768_v38  ;;  %6365 = vrcp.f32 %v8146_v27 }
 0x8bf   : > { %v8200_v16 = vpop.xlane.xlu1 %3281  ;;  %6367 = vrcp.f32 %v8156_v54 }
 0x8c0   : > { %6369 = vrcp.f32 %v8126_v48  ;;  %v8776_v48 = vld [vmem:[#allocation14_spill] sm:$0xff] }
 0x8c1   : > { %6371 = vrcp.f32 %v8136_v15 }
 0x8c2   : > { %6373 = vrcp.f32 %v8114_v39 }
 0x8c3   : > { %v3285_v24 = vpop.xlane.xlu1 %3284  ;;  %6375 = vrcp.f32 %v8119_v30 }
 0x8c5   : > { %v6354_v49 = vpop.eup %6353 }
 0x8c6   : > { %v3389_v19 = vmul.f32 %v6354_v49, %v7987_v41  ;;  %v6356_v2 = vpop.eup %6355 }
 0x8c7   : > { %v3288_v36 = vpop.xlane.xlu1 %3287  ;;  %v3388_v18 = vmul.f32 %v6356_v2, %v7978_v23  ;;  %v6358_v8 = vpop.eup %6357 }
 0x8c8   : > { %5870 = vmatpush3.xpose.msk.msra.mxu1 %vm2786_vm2, %v3389_v19  ;;  %v6360_v41 = vpop.eup %6359  ;;  %v3387_v27 = vmul.f32 %v6358_v8, %v7964_v7  ;;  %v8305_v19 = vld [vmem:[%s8679_s8 + $0x8] sm:$0xff] }
 0x8c9   : > { %5871 = vmatprep.subr.mxu1 %v8768_v38  ;;  %v6362_v0 = vpop.eup %6361  ;;  %v3396_v23 = vmul.f32 %v6360_v41, %v7971_v10 }
 0x8ca   : > { %v6364_v15 = vpop.eup %6363  ;;  %v3386_v39 = vmul.f32 %v6362_v0, %v7955_v34 }
 0x8cb   : > { %v3291_v37 = vpop.xlane.xlu1 %3290  ;;  %v6366_v7 = vpop.eup %6365  ;;  %v3395_v10 = vmul.f32 %v6364_v15, %v7973_v59 }
 0x8cc   : > { %5872 = vmatpush3.xpose.msk.msra.mxu1 %vm2786_vm2, %v3388_v18  ;;  %6377 = vrcp.f32 %v3291_v37  ;;  %v6368_v30 = vpop.eup %6367  ;;  %v3385_v34 = vmul.f32 %v6366_v7, %v7938_v5 }
 0x8cd   : > { %5873 = vmatprep.subr.mxu1 %v8768_v38  ;;  %6379 = vrcp.f32 %v3255_v31  ;;  %v6370_v14 = vpop.eup %6369  ;;  %v3394_v56 = vmul.f32 %v6368_v30, %v7947_v32 }
 0x8ce   : > { %6381 = vrcp.f32 %v3288_v36  ;;  %v6372_v59 = vpop.eup %6371  ;;  %v3384_v46 = vmul.f32 %v6370_v14, %v7927_v3 }
 0x8cf   : > { %v1324_v55 = vpop.permute.xlu1 %1323  ;;  %6383 = vrcp.f32 %v3252_v17  ;;  %v6374_v9 = vpop.eup %6373  ;;  %v3393_v5 = vmul.f32 %v6372_v59, %v7932_v57 }
 0x8d0   : > { %v1454_v54 = vadd.f32 %v8776_v48, %v1324_v55  ;;  %5874 = vmatpush3.xpose.msk.msra.mxu1 %vm2786_vm2, %v3387_v27  ;;  %6385 = vrcp.f32 %v3285_v24  ;;  %v6376_v51 = vpop.eup %6375  ;;  %v3383_v32 = vmul.f32 %v6374_v9, %v7911_v33  ;;  %v3273_v33 = vpop.xlane.xlu0 %3272 }
 0x8d1   : > { %5875 = vmatprep.subr.mxu1 %v8768_v38  ;;  %6387 = vrcp.f32 %v8200_v16  ;;  %v3392_v12 = vmul.f32 %v6376_v51, %v7922_v6 }
 0x8d2   : > { %5867 = vmatmul.mubr.msk.f32.vlgmr.msra.gmra.mxu0 %vm2786_vm2, %v1454_v54  ;;  %v1486_v3 = vcombine.high %v1454_v54, %v1454_v54  ;;  %6389 = vrcp.f32 %v8195_v25 }
 0x8d3   : > { %5887 = vmatpush3.xpose.msk.msra.mxu0 %vm2786_vm2, %v3396_v23  ;;  %5900 = vmatprep.mubr.msk.f32.mxu0 %vm6479_vm14, %v8768_v38  ;;  %6391 = vrcp.f32 %v3276_v61 }
 0x8d4   : > { %5876 = vmatpush3.xpose.msk.msra.mxu1 %vm2786_vm2, %v3386_v39  ;;  %5888 = vmatprep.subr.mxu0 %v8768_v38  ;;  %v1329_v20 = vpop.permute.xlu0 %1328  ;;  %6393 = vrcp.f32 %v3273_v33 }
 0x8d5   : > { %5877 = vmatprep.subr.mxu1 %v8768_v38  ;;  %v1457_v29 = vadd.f32 %v8777_v4, %v1329_v20 }
 0x8d7   : > { %5889 = vmatpush3.xpose.msk.msra.mxu0 %vm2786_vm2, %v3395_v10  ;;  %v1487_v49 = vcombine.high %v1457_v29, %v1457_v29 }
 0x8d8   : > { %5878 = vmatpush3.xpose.msk.msra.mxu1 %vm2786_vm2, %v3385_v34  ;;  %5890 = vmatprep.subr.mxu0 %v8768_v38 }
 0x8d9   : > { %5879 = vmatprep.subr.mxu1 %v8768_v38  ;;  %v6378_v60 = vpop.eup %6377 }
 0x8da   : > { %v6380_v57 = vpop.eup %6379  ;;  %v3403_v28 = vmul.f32 %v6378_v60, %v8027_v47 }
 0x8db   : > { %5891 = vmatpush3.xpose.msk.msra.mxu0 %vm2786_vm2, %v3394_v56  ;;  %v6382_v35 = vpop.eup %6381  ;;  %v3391_v62 = vmul.f32 %v6380_v57, %v7982_v11 }
 0x8dc   : > { %5880 = vmatpush3.xpose.msk.msra.mxu1 %vm2786_vm2, %v3384_v46  ;;  %5892 = vmatprep.subr.mxu0 %v8768_v38  ;;  %v6384_v6 = vpop.eup %6383  ;;  %v3402_v47 = vmul.f32 %v6382_v35, %v8021_v40  ;;  %v6161_v35 = vld [vmem:[%s8677_s6] sm:$0xff]  }
 0x8dd   : > { %5881 = vmatprep.subr.mxu1 %v8768_v38  ;;  %v6386_v50 = vpop.eup %6385  ;;  %v3390_v11 = vmul.f32 %v6384_v6, %v7999_v43  ;;  %v8274_v43 = vld [vmem:[%s8679_s8] sm:$0xff] }
 0x8de   : > { %v3401_v40 = vmul.f32 %v6386_v50, %v8013_v53  ;;  %v6388_v52 = vpop.eup %6387  ;;  %4326 = vperm.xlu0 %6136, %v8274_v43   ;;  %v8283_v53 = vld [vmem:[%s8679_s8 + $0x18] sm:$0xff] }
 0x8df   : > { %5893 = vmatpush3.xpose.msk.msra.mxu0 %vm2786_vm2, %v3393_v5  ;;  %4251 = vperm.xlu1 %6133, %v8283_v53   ;;  %v3400_v1 = vmul.f32 %v6388_v52, %v8003_v42  ;;  %v6390_v44 = vpop.eup %6389 }
 0x8e0   : > { %5882 = vmatpush3.xpose.msk.msra.mxu1 %vm2786_vm2, %v3383_v32  ;;  %5894 = vmatprep.subr.mxu0 %v8768_v38  ;;  %v3399_v21 = vmul.f32 %v6390_v44, %v8778_v45  ;;  %v6392_v25 = vpop.eup %6391 }
 0x8e1   : > { %5903 = vmatprep.subr.mxu1 %v8768_v38  ;;  %v3398_v16 = vmul.f32 %v6392_v25, %v8779_v22  ;;  %v6394_v42 = vpop.eup %6393 }
 0x8e2   : > { %v3397_v24 = vmul.f32 %v6394_v42, %v8780_v13  ;;  %v6482_v42 = vmov 3  }
 0x8e3   : > { %5895 = vmatpush3.xpose.msk.msra.mxu0 %vm2786_vm2, %v3392_v12  ;;  %5884 = vmatmul.mubr.msk.f32.vlgmr.msra.gmra.mxu1 %vm2786_vm2, %v1486_v3 }
 0x8e4   : > { %5904 = vmatpush3.xpose.msk.msra.mxu1 %vm2786_vm2, %v3403_v28  ;;  %5896 = vmatprep.subr.mxu0 %v8768_v38 }
 0x8e5   : > { %5905 = vmatprep.subr.mxu1 %v8768_v38  ;;  %5917 = vmatprep.mubr.msk.f32.mxu1 %vm6479_vm14, %v8768_v38 }
 0x8e6   : > { %6134 = vset.pattern.permute.xlu1 %v6481_v26  ;;  %6139 = vset.pattern.permute.xlu0 %v6482_v42 }
 0x8e7   : > { %5897 = vmatpush3.xpose.msk.msra.mxu0 %vm2786_vm2, %v3391_v62  ;;  %4332 = vperm.xlu1 %6134, %v8266_v58  }
 0x8e8   : > { %5906 = vmatpush3.xpose.msk.msra.mxu1 %vm2786_vm2, %v3402_v47  ;;  %5898 = vmatprep.subr.mxu0 %v8768_v38 }
 0x8e9   : > { %5907 = vmatprep.subr.mxu1 %v8768_v38  ;;  %4656 = vperm.xlu0 %6139, %v8305_v19  }
 0x8eb   : > { %5899 = vmatpush3.xpose.msk.msra.mxu0 %vm2786_vm2, %v3390_v11  ;;  %4335 = vperm.xlu1 %6134, %v8283_v53  }
 0x8ec   : > { %5908 = vmatpush3.xpose.msk.msra.mxu1 %vm2786_vm2, %v3401_v40 }
 0x8ed   : > { %5909 = vmatprep.subr.mxu1 %v8768_v38 }
 0x8ee   : > { %5901 = vmatmul.mubr.msk.f32.vlgmr.msra.gmra.mxu0 %vm2786_vm2, %v1457_v29 }
 0x8ef   : > { %6135 = vset.pattern.permute.xlu1 %v6480_v63  ;;  %5924 = vmatprep.mubr.msk.bf16.mxu0 %vm725_vm8, %v6161_v35 }
 0x8f0   : > { %5910 = vmatpush3.xpose.msk.msra.mxu1 %vm2786_vm2, %v3400_v1  ;;  %4242 = vperm.xlu1 %6135, %v8274_v43  }
 0x8f1   : > { %5911 = vmatprep.subr.mxu1 %v8768_v38 }
 0x8f4   : > { %5912 = vmatpush3.xpose.msk.msra.mxu1 %vm2786_vm2, %v3399_v21  ;;  %4245 = vperm.xlu1 %6135, %v8305_v19  }
 0x8f5   : > { %5913 = vmatprep.subr.mxu1 %v8768_v38 }
 0x8f8   : > { %5914 = vmatpush3.xpose.msk.msra.mxu1 %vm2786_vm2, %v3398_v16  ;;  %6137 = vset.pattern.permute.xlu1 %v6481_v26 }
 0x8f9   : > { %5915 = vmatprep.subr.mxu1 %v8768_v38  ;;  %4329 = vperm.xlu1 %6137, %v8305_v19  }
 0x8fc   : > { %5916 = vmatpush3.xpose.msk.msra.mxu1 %vm2786_vm2, %v3397_v24 }
 0x8fd   : > { %6138 = vset.pattern.permute.xlu1 %v6482_v42 }
 0x8fe   : > { %4652 = vperm.xlu1 %6138, %v8274_v43  }
 0x8ff   : > { %5918 = vmatmul.mubr.msk.f32.vlgmr.msra.gmra.mxu1 %vm2786_vm2, %v1487_v49 }
 0x902   : > { %4660 = vperm.xlu1 %6138, %v8266_v58  }
 0x906   : > { %4664 = vperm.xlu1 %6138, %v8283_v53  }
 0x91f   : > { %v3493_v2 = vpop.f32.mrf.mxu0 }
 0x921   : > { %v5800_v36 = vpop.f32.mrf.mxu0 }
 0x93f   : > { %v3586_v31 = vpop.f32.mrf.mxu1 }
 0x940   : > { %v4156_v39 = vcombine.low %v3493_v2, %v3586_v31 }
 0x941   : > { %v5817_v18 = vpop.f32.mrf.mxu1 }
 0x942   : > { %v4164_v30 = vsel %vm2786_vm2, %v4156_v39, 0.0 }
 0x959   : > { %v4327_v42 = vpop.permute.xlu0 %4326 }
 0x964   : > { %v3679_v8 = vpop.f32.mrf.mxu0 }
 0x966   : > { %v5834_v37 = vpop.f32.mrf.mxu0 }
 0x973   : > { %v3772_v41 = vpop.f32.mrf.mxu1 }
 0x974   : > { %v4157_v15 = vcombine.low %v3679_v8, %v3772_v41 }
 0x975   : > { %v5851_v27 = vpop.f32.mrf.mxu1 }
 0x976   : > { %v4165_v10 = vsel %vm2786_vm2, %v4157_v15, 0.0 }
 0x977   : > { %v4166_v34 = vadd.f32 %v4165_v10, %v4164_v30  ;;  %v6485_v30 = vmov 839922192  }
 0x992   : > { %v3865_v0 = vpop.f32.mrf.mxu0 }
 0x994   : > { %v5868_v55 = vpop.f32.mrf.mxu0 }
 0x9a3   : > { %v3958_v61 = vpop.f32.mrf.mxu1 }
 0x9a4   : > { %v4158_v7 = vcombine.low %v3865_v0, %v3958_v61 }
 0x9a5   : > { %v5885_v48 = vpop.f32.mrf.mxu1 }
 0x9a6   : > { %v4167_v17 = vsel %vm2786_vm2, %v4158_v7, 0.0 }
 0x9a7   : > { %v4168_v59 = vadd.f32 %v4167_v17, %v4166_v34  ;;  %v4254_v17 = vunpack.c.l.s4 %v6485_v30 }
 0x9ae   : > { %v4051_v54 = vpop.f32.mrf.mxu0 }
 0x9b0   : > { %v5902_v23 = vpop.f32.mrf.mxu0 }
 0x9bf   : > { %v4144_v14 = vpop.f32.mrf.mxu1 }
 0x9c0   : > { %v4159_v56 = vcombine.low %v4051_v54, %v4144_v14 }
 0x9c1   : > { %v5919_v46 = vpop.f32.mrf.mxu1 }
 0x9c2   : > { %v4169_v9 = vsel %vm2786_vm2, %v4159_v56, 0.0  ;;  %v8781_v56 = vlaneseq }
 0x9c3   : > { %v4170_v5 = vadd.f32 %v4169_v9, %v4168_v59 }
 0x9c4   : > { %v4257_v59 = vshrl.u32 %v8781_v56, 7 }
 0x9c5   : > { %v4171_v51 = vrot.slane %v4170_v5, 4 }
 0x9c7   : > { %v4172_v32 = vadd.f32 %v4171_v51, %v4170_v5 }
 0x9c9   : > { %v4173_v60 = vrot.slane %v4172_v32, 2 }
 0x9cb   : > { %v4174_v3 = vadd.f32 %v4173_v60, %v4172_v32 }
 0x9cd   : > { %v4175_v12 = vrot.slane %v4174_v3, 1 }
 0x9cf   : > { %v4176_v57 = vadd.f32 %v4175_v12, %v4174_v3 }
 0x9d1   : > { %v4178_v28 = vmul.f32 0.03125, %v4176_v57 }
 0x9d3   : > { %v4180_v33 = vcombine.high %v4178_v28, %v4178_v28  ;;  %v8316_v62 = vsub.f32 %v3493_v2, %v4178_v28  ;;  %v8318_v6 = vsub.f32 %v3679_v8, %v4178_v28  ;;  %v8320_v47 = vsub.f32 %v3865_v0, %v4178_v28 }
 0x9d4   : > { %v8322_v50 = vsub.f32 %v4051_v54, %v4178_v28  ;;  %v6483_v8 = vmov 6   ;;  %v6484_v0 = vmov 7  }
 0x9d5   : > { %v8325_v63 = vsub.f32 %v3586_v31, %v4180_v33  ;;  %v8327_v20 = vsub.f32 %v3772_v41, %v4180_v33  ;;  %v8329_v11 = vsub.f32 %v3958_v61, %v4180_v33  ;;  %v8331_v40 = vsub.f32 %v4144_v14, %v4180_v33  ;;  %6140 = vset.pattern.permute.xlu0 %v6483_v8  ;;  %v4249_v61 = vpop.permute.xlu1 %4248 }
 0x9d6   : > { %v4190_v26 = vmul.f32 %v8316_v62, %v8316_v62  ;;  %v4192_v52 = vmul.f32 %v8318_v6, %v8318_v6  ;;  %v4194_v4 = vmul.f32 %v8320_v47, %v8320_v47  ;;  %v4196_v21 = vmul.f32 %v8322_v50, %v8322_v50  ;;  %4775 = vperm.xlu0 %6140, %v8274_v43  }
 0x9d7   : > { %v4191_v29 = vmul.f32 %v8325_v63, %v8325_v63  ;;  %v4193_v1 = vmul.f32 %v8327_v20, %v8327_v20  ;;  %v4195_v44 = vmul.f32 %v8329_v11, %v8329_v11  ;;  %v4197_v45 = vmul.f32 %v8331_v40, %v8331_v40  ;;  %6141 = vset.pattern.permute.xlu1 %v6484_v0 }
 0x9d8   : > { %4795 = vperm.xlu1 %6141, %v8274_v43   ;;  %v6486_v43 = vmov 1985246804   ;;  %v4255_v14 = vunpack.c.0.s8 %v4254_v17 }
 0x9d9   : > { %v4206_v25 = vcombine.low %v4190_v26, %v4191_v29  ;;  %v4207_v22 = vcombine.low %v4192_v52, %v4193_v1  ;;  %v4208_v16 = vcombine.low %v4194_v4, %v4195_v44  ;;  %v4209_v13 = vcombine.low %v4196_v21, %v4197_v45  ;;  %v4252_v15 = vpop.permute.xlu1 %4251 }
 0x9da   : > { %6143 = vset.pattern.permute.xlu0 %v6484_v0  ;;  %v4261_v34 = vunpack.c.l.s4 %v6486_v43 }
 0x9db   : > { %v4214_v24 = vsel %vm2786_vm2, %v4206_v25, 0.0  ;;  %v4215_v49 = vsel %vm2786_vm2, %v4207_v22, 0.0  ;;  %v4217_v36 = vsel %vm2786_vm2, %v4208_v16, 0.0  ;;  %v4219_v18 = vsel %vm2786_vm2, %v4209_v13, 0.0  ;;  %4799 = vperm.xlu0 %6143, %v8305_v19  }
 0x9dc   : > { %v4216_v2 = vadd.f32 %v4215_v49, %v4214_v24  ;;  %6142 = vset.pattern.permute.xlu1 %v6483_v8  ;;  %v4262_v9 = vunpack.c.0.s8 %v4261_v34 }
 0x9dd   : > { %4779 = vperm.xlu1 %6142, %v8305_v19   ;;  %v4333_v10 = vpop.permute.xlu1 %4332  ;;  %v8366_v19 = vsub.s32 %v4255_v14, %v4257_v59 }
 0x9de   : > { %v4218_v31 = vadd.f32 %v4217_v36, %v4216_v2  ;;  %v8368_v5 = vsub.s32 %v4262_v9, %v4257_v59 }
 0x9df   : > { %6145 = vset.pattern.permute.xlu0 %v6483_v8  ;;  %v4287_v60 = vrot.slane %v4249_v61, %v8366_v19  ;;  %v4301_v57 = vrot.slane %v4252_v15, %v8366_v19 }
 0x9e0   : > { %v4220_v37 = vadd.f32 %v4219_v18, %v4218_v31  ;;  %4787 = vperm.xlu0 %6145, %v8283_v53   ;;  %v4294_v28 = vrot.slane %v4249_v61, %v8368_v5  ;;  %v4308_v35 = vrot.slane %v4252_v15, %v8368_v5  ;;  %v4343_v18 = vrot.slane %v4327_v42, %v8366_v19 }
 0x9e1   : > { %4783 = vperm.xlu1 %6142, %v8266_v58   ;;  %v4336_v46 = vpop.permute.xlu1 %4335 }
 0x9e2   : > { %v4221_v41 = vrot.slane %v4220_v37, 4  ;;  %v4385_v33 = vrot.slane %v4336_v46, %v8366_v19 }
 0x9e4   : > { %v4222_v27 = vadd.f32 %v4221_v41, %v4220_v37  ;;  %6146 = vset.pattern.permute.xlu0 %v6484_v0 }
 0x9e5   : > { %6144 = vset.pattern.permute.xlu1 %v6484_v0  ;;  %v4243_v51 = vpop.permute.xlu1 %4242 }
 0x9e6   : > { %v4223_v55 = vrot.slane %v4222_v27, 2  ;;  %4803 = vperm.xlu1 %6144, %v8266_v58   ;;  %v4259_v44 = vrot.slane %v4243_v51, %v8366_v19 }
 0x9e8   : > { %v4224_v48 = vadd.f32 %v4223_v55, %v4222_v27 }
 0x9e9   : > { %v4246_v16 = vpop.permute.xlu1 %4245 }
 0x9ea   : > { %v4225_v54 = vrot.slane %v4224_v48, 1  ;;  %4807 = vperm.xlu1 %6144, %v8283_v53   ;;  %v4371_v53 = vrot.slane %v4333_v10, %v8366_v19  ;;  %v4280_v30 = vrot.slane %v4246_v16, %v8368_v5 }
 0x9ec   : > { %v4226_v23 = vadd.f32 %v4225_v54, %v4224_v48  ;;  %v4273_v54 = vrot.slane %v4246_v16, %v8366_v19 }
 0x9ed   : > { %v4330_v0 = vpop.permute.xlu1 %4329 }
 0x9ee   : > { %v4227_v39 = vmul.f32 0.03125, %v4226_v23  ;;  %v4357_v17 = vrot.slane %v4330_v0, %v8366_v19 }
 0x9f0   : > { %v4228_v7 = vadd.f32 1e-05, %v4227_v39 }
 0x9f2   : > { %6395 = vrsqrt.f32 %v4228_v7 }
 0x9ff   : > { %v6396_v32 = vpop.eup %6395 }
 0xa00   : > { %v4231_v3 = vcombine.high %v6396_v32, %v6396_v32  ;;  %v4237_v12 = vmul.f32 %v6396_v32, %v8320_v47  ;;  %v4239_v58 = vmul.f32 %v6396_v32, %v8322_v50  ;;  %v4378_v47 = vrot.slane %v4333_v10, %v8368_v5 }
 0xa01   : > { %v4392_v50 = vrot.slane %v4336_v46, %v8368_v5  ;;  %v4233_v1 = vmul.f32 %v6396_v32, %v8316_v62  ;;  %v4266_v62 = vrot.slane %v4243_v51, %v8368_v5  ;;  %v4235_v61 = vmul.f32 %v6396_v32, %v8318_v6 }
 0xa02   : > { %v4240_v26 = vmul.f32 %v4231_v3, %v8331_v40  ;;  %v4238_v52 = vmul.f32 %v4231_v3, %v8329_v11  ;;  %v4321_v4 = vmul.f32 %v4287_v60, %v4237_v12  ;;  %v4323_v29 = vmul.f32 %v4301_v57, %v4239_v58 }
 0xa03   : > { %v4234_v24 = vmul.f32 %v4231_v3, %v8325_v63  ;;  %v4317_v31 = vmul.f32 %v4259_v44, %v4233_v1  ;;  %v4350_v63 = vrot.slane %v4327_v42, %v8368_v5  ;;  %v4236_v48 = vmul.f32 %v4231_v3, %v8327_v20 }
 0xa04   : > { %v4322_v45 = vmul.f32 %v4294_v28, %v4238_v52  ;;  %v4324_v21 = vmul.f32 %v4308_v35, %v4240_v26  ;;  %v4405_v25 = vadd.f32 %v4371_v53, %v4321_v4  ;;  %v8384_v22 = vadd.f32 %v4385_v33, %v4323_v29 }
 0xa05   : > { %v4318_v27 = vmul.f32 %v4266_v62, %v4234_v24  ;;  %v8405_v39 = vadd.f32 %v4343_v18, %v4317_v31  ;;  %v4364_v6 = vrot.slane %v4330_v0, %v8368_v5  ;;  %v4319_v56 = vmul.f32 %v4273_v54, %v4235_v61 }
 0xa06   : > { %v4406_v40 = vadd.f32 %v4378_v47, %v4322_v45  ;;  %v4421_v13 = vmul.f32 0.70710677, %v4405_v25  ;;  %v8386_v11 = vadd.f32 %v4392_v50, %v4324_v21  ;;  %v8390_v49 = vmul.f32 0.70710677, %v8384_v22 }
 0xa07   : > { %v8410_v34 = vadd.f32 %v4350_v63, %v4318_v27  ;;  %v4320_v59 = vmul.f32 %v4280_v30, %v4236_v48  ;;  %v8414_v46 = vmul.f32 0.70710677, %v8405_v39  ;;  %v8420_v60 = vadd.f32 %v4357_v17, %v4319_v56 }
 0xa08   : > { %v8393_v2 = vmul.f32 0.70710677, %v4406_v40  ;;  %v4445_v36 = vand.u32 2147483647, %v4421_v13  ;;  %v8397_v8 = vmul.f32 0.70710677, %v8386_v11 }
 0xa09   : > { %v4447_v55 = vand.u32 2147483647, %v8390_v49  ;;  %v8417_v32 = vmul.f32 0.70710677, %v8410_v34  ;;  %v4441_v19 = vand.u32 2147483647, %v8414_v46  ;;  %v8422_v3 = vadd.f32 %v4364_v6, %v4320_v59 }
 0xa0a   : > { %v4446_v37 = vand.u32 2147483647, %v8393_v2  ;;  %v4453_v41 = vmul.f32 0.3275911, %v4445_v36  ;;  %v4448_v7 = vand.u32 2147483647, %v8397_v8 }
 0xa0b   : > { %v4455_v10 = vmul.f32 0.3275911, %v4447_v55  ;;  %v4557_v51 = vsub.f32 0.0, %v4445_v36  ;;  %v4442_v5 = vand.u32 2147483647, %v8417_v32  ;;  %vm4429_vm7 = vcmp.ge.f32.partialorder %v4421_v13, 0.0 }
 0xa0c   : > { %v4454_v23 = vmul.f32 0.3275911, %v4446_v37  ;;  %v4461_v15 = vadd.f32 1.0, %v4453_v41  ;;  %v4456_v20 = vmul.f32 0.3275911, %v4448_v7  ;;  %v4558_v58 = vsub.f32 0.0, %v4446_v37 }
 0xa0d   : > { %v4463_v14 = vadd.f32 1.0, %v4455_v10  ;;  %v4449_v12 = vmul.f32 0.3275911, %v4441_v19  ;;  %v4565_v57 = vmul.f32 %v4557_v51, %v4445_v36  ;;  %v4450_v28 = vmul.f32 0.3275911, %v4442_v5 }
 0xa0e   : > { %v4462_v43 = vadd.f32 1.0, %v4454_v23  ;;  %6397 = vrcp.f32 %v4461_v15  ;;  %v4464_v9 = vadd.f32 1.0, %v4456_v20  ;;  %v8425_v53 = vmul.f32 0.5, %v4405_v25 }
 0xa0f   : > { %v4457_v35 = vadd.f32 1.0, %v4449_v12  ;;  %v8428_v33 = vmul.f32 0.70710677, %v8420_v60  ;;  %v8431_v26 = vmul.f32 0.70710677, %v8422_v3  ;;  %v4559_v52 = vsub.f32 0.0, %v4447_v55 }
 0xa10   : > { %6399 = vrcp.f32 %v4462_v43  ;;  %v4560_v4 = vsub.f32 0.0, %v4448_v7  ;;  %v4458_v29 = vadd.f32 1.0, %v4450_v28  ;;  %v8433_v47 = vmul.f32 0.5, %v4406_v40 }
 0xa11   : > { %6401 = vrcp.f32 %v4463_v14  ;;  %v6487_v50 = vmov -1.0   ;;  %v8439_v44 = vmul.f32 0.5, %v8384_v22  ;;  %v4443_v45 = vand.u32 2147483647, %v8428_v33 }
 0xa12   : > { %6403 = vrcp.f32 %v4464_v9  ;;  %v8436_v1 = vsel %vm4429_vm7, 1.0, %v6487_v50  ;;  %vm4430_vm4 = vcmp.ge.f32.partialorder %v8393_v2, 0.0  ;;  %v4566_v21 = vmul.f32 %v4558_v58, %v4446_v37 }
 0xa13   : > { %6405 = vrcp.f32 %v4457_v35  ;;  %v4577_v25 = vmul.f32 1.442695, %v4565_v57  ;;  %v8446_v42 = vmul.f32 0.5, %v8386_v11  ;;  %v4553_v40 = vsub.f32 0.0, %v4441_v19 }
 0xa14   : > { %6407 = vrcp.f32 %v4458_v29  ;;  %v4444_v13 = vand.u32 2147483647, %v8431_v26  ;;  %v4451_v24 = vmul.f32 0.3275911, %v4443_v45  ;;  %vm4431_vm10 = vcmp.ge.f32.partialorder %v8390_v49, 0.0 }
 0xa15   : > { %v4567_v22 = vmul.f32 %v4559_v52, %v4447_v55  ;;  %v4568_v36 = vmul.f32 %v4560_v4, %v4448_v7  ;;  %v8454_v2 = vsel %vm4430_vm4, 1.0, %v6487_v50  ;;  %v4554_v18 = vsub.f32 0.0, %v4442_v5 }
 0xa16   : > { %v4452_v37 = vmul.f32 0.3275911, %v4444_v13  ;;  %v4459_v41 = vadd.f32 1.0, %v4451_v24  ;;  %6409 = vpow2.f32 %v4577_v25  ;;  %v4579_v63 = vmul.f32 1.442695, %v4566_v21 }
 0xa17   : > { %v4561_v0 = vmul.f32 %v4553_v40, %v4441_v19  ;;  %v4555_v48 = vsub.f32 0.0, %v4443_v45  ;;  %v4581_v15 = vmul.f32 1.442695, %v4567_v22  ;;  %v4583_v7 = vmul.f32 1.442695, %v4568_v36 }
 0xa18   : > { %v4460_v61 = vadd.f32 1.0, %v4452_v37  ;;  %6411 = vrcp.f32 %v4459_v41  ;;  %v4562_v17 = vmul.f32 %v4554_v18, %v4442_v5  ;;  %v4556_v43 = vsub.f32 0.0, %v4444_v13 }
 0xa19   : > { %vm4432_vm1 = vcmp.ge.f32.partialorder %v8397_v8, 0.0  ;;  %v4569_v59 = vmul.f32 1.442695, %v4561_v0  ;;  %v4563_v9 = vmul.f32 %v4555_v48, %v4443_v45  ;;  %v8478_v21 = vsel %vm4431_vm10, 1.0, %v6487_v50 }
 0xa1a   : > { %6413 = vrcp.f32 %v4460_v61  ;;  %v4571_v57 = vmul.f32 1.442695, %v4562_v17  ;;  %v4564_v28 = vmul.f32 %v4556_v43, %v4444_v13  ;;  %v4440_v0 = vsel %vm4432_vm1, 1.0, %v6487_v50 }
 0xa1b   : > { %v8443_v16 = vpop.eup %6397  ;;  %6415 = vpow2.f32 %v4579_v63  ;;  %v4573_v40 = vmul.f32 1.442695, %v4563_v9  ;;  %vm4425_vm11 = vcmp.ge.f32.partialorder %v8414_v46, 0.0  ;;  %vm4426_vm12 = vcmp.ge.f32.partialorder %v8417_v32, 0.0 }
 0xa1c   : > { %v4485_v62 = vmul.f32 1.0614054, %v8443_v16  ;;  %6417 = vpow2.f32 %v4581_v15  ;;  %v4575_v37 = vmul.f32 1.442695, %v4564_v28  ;;  %vm4427_vm13 = vcmp.ge.f32.partialorder %v8428_v33, 0.0 }
 0xa1d   : > { %v8451_v31 = vpop.eup %6399  ;;  %6419 = vpow2.f32 %v4583_v7  ;;  %v4410_v46 = vmul.f32 0.5, %v8410_v34  ;;  %vm4428_vm5 = vcmp.ge.f32.partialorder %v8431_v26, 0.0  ;;  %v4409_v33 = vmul.f32 0.5, %v8405_v39  ;;  %v8784_v39 = vld [vmem:[#allocation13_spill] sm:$0xff] }
 0xa1e   : > { %v4486_v11 = vmul.f32 1.0614054, %v8451_v31  ;;  %v4493_v27 = vadd.f32 -1.4531521, %v4485_v62  ;;  %v8457_v54 = vpop.eup %6401  ;;  %6421 = vpow2.f32 %v4569_v59  ;;  %v4436_v34 = vsel %vm4428_vm5, 1.0, %v6487_v50 }
 0xa1f   : > { %v8460_v10 = vpop.eup %6403  ;;  %v4487_v30 = vmul.f32 1.0614054, %v8457_v54  ;;  %6423 = vpow2.f32 %v4571_v57  ;;  %v4411_v26 = vmul.f32 0.5, %v8420_v60  ;;  %v6162_v60 = vld [vmem:[%s8677_s6 + $0x8] sm:$0xff]  }
 0xa20   : > { %v4494_v55 = vadd.f32 -1.4531521, %v4486_v11  ;;  %v4501_v23 = vmul.f32 %v8443_v16, %v4493_v27  ;;  %v4488_v14 = vmul.f32 1.0614054, %v8460_v10  ;;  %v8467_v58 = vpop.eup %6405  ;;  %6425 = vpow2.f32 %v4573_v40 }
 0xa21   : > { %v4495_v56 = vadd.f32 -1.4531521, %v4487_v30  ;;  %v4481_v29 = vmul.f32 1.0614054, %v8467_v58  ;;  %v8473_v45 = vpop.eup %6407  ;;  %6427 = vpow2.f32 %v4575_v37 }
 0xa22   : > { %v4502_v6 = vmul.f32 %v8451_v31, %v4494_v55  ;;  %v4509_v20 = vadd.f32 1.4214138, %v4501_v23  ;;  %v4496_v12 = vadd.f32 -1.4531521, %v4488_v14  ;;  %v4482_v22 = vmul.f32 1.0614054, %v8473_v45 }
 0xa23   : > { %v4503_v5 = vmul.f32 %v8457_v54, %v4495_v56  ;;  %v4489_v18 = vadd.f32 -1.4531521, %v4481_v29  ;;  %v6410_v63 = vpop.eup %6409 }
 0xa24   : > { %v4510_v51 = vadd.f32 1.4214138, %v4502_v6  ;;  %v4517_v19 = vmul.f32 %v8443_v16, %v4509_v20  ;;  %v4504_v4 = vmul.f32 %v8460_v10, %v4496_v12  ;;  %v4490_v27 = vadd.f32 -1.4531521, %v4482_v22 }
 0xa25   : > { %v4511_v25 = vadd.f32 1.4214138, %v4503_v5  ;;  %v4497_v48 = vmul.f32 %v8467_v58, %v4489_v18  ;;  %v8489_v55 = vpop.eup %6411 }
 0xa26   : > { %v4518_v35 = vmul.f32 %v8451_v31, %v4510_v51  ;;  %v4525_v52 = vadd.f32 -0.28449672, %v4517_v19  ;;  %v4512_v62 = vadd.f32 1.4214138, %v4504_v4  ;;  %v4498_v30 = vmul.f32 %v8473_v45, %v4490_v27 }
 0xa27   : > { %v4519_v36 = vmul.f32 %v8457_v54, %v4511_v25  ;;  %v4505_v43 = vadd.f32 1.4214138, %v4497_v48  ;;  %v4483_v6 = vmul.f32 1.0614054, %v8489_v55  ;;  %v8495_v8 = vpop.eup %6413 }
 0xa28   : > { %v4526_v24 = vadd.f32 -0.28449672, %v4518_v35  ;;  %v4533_v13 = vmul.f32 %v8443_v16, %v4525_v52  ;;  %v4520_v49 = vmul.f32 %v8460_v10, %v4512_v62  ;;  %v4506_v59 = vadd.f32 1.4214138, %v4498_v30  ;;  %v6416_v9 = vpop.eup %6415 }
 0xa29   : > { %v4527_v61 = vadd.f32 -0.28449672, %v4519_v36  ;;  %v4484_v19 = vmul.f32 1.0614054, %v8495_v8  ;;  %v4491_v12 = vadd.f32 -1.4531521, %v4483_v6  ;;  %v6418_v52 = vpop.eup %6417 }
 0xa2a   : > { %v4534_v41 = vmul.f32 %v8451_v31, %v4526_v24  ;;  %v4541_v11 = vadd.f32 0.2548296, %v4533_v13  ;;  %v4528_v7 = vadd.f32 -0.28449672, %v4520_v49  ;;  %v4514_v35 = vmul.f32 %v8473_v45, %v4506_v59  ;;  %v6420_v40 = vpop.eup %6419 }
 0xa2b   : > { %v4535_v17 = vmul.f32 %v8457_v54, %v4527_v61  ;;  %v4492_v29 = vadd.f32 -1.4531521, %v4484_v19  ;;  %v4499_v25 = vmul.f32 %v8489_v55, %v4491_v12 }
 0xa2c   : > { %v4542_v23 = vadd.f32 0.2548296, %v4534_v41  ;;  %v4549_v15 = vmul.f32 %v8443_v16, %v4541_v11  ;;  %v4536_v56 = vmul.f32 %v8460_v10, %v4528_v7  ;;  %v4513_v16 = vmul.f32 %v8467_v58, %v4505_v43  ;;  %v6422_v11 = vpop.eup %6421 }
 0xa2d   : > { %v4543_v51 = vadd.f32 0.2548296, %v4535_v17  ;;  %v4522_v22 = vadd.f32 -0.28449672, %v4514_v35  ;;  %v4500_v37 = vmul.f32 %v8495_v8, %v4492_v29  ;;  %v4507_v41 = vadd.f32 1.4214138, %v4499_v25 }
 0xa2e   : > { %v4550_v20 = vmul.f32 %v8451_v31, %v4542_v23  ;;  %v4589_v14 = vmul.f32 %v6410_v63, %v4549_v15  ;;  %v4544_v28 = vadd.f32 0.2548296, %v4536_v56  ;;  %v4521_v31 = vadd.f32 -0.28449672, %v4513_v16 }
 0xa2f   : > { %v4551_v4 = vmul.f32 %v8457_v54, %v4543_v51  ;;  %v4530_v63 = vmul.f32 %v8473_v45, %v4522_v22  ;;  %v4508_v23 = vadd.f32 1.4214138, %v4500_v37  ;;  %v8783_v22 = vld [vmem:[#allocation12_spill] sm:$0xff] }
 0xa30   : > { %v4590_v5 = vmul.f32 %v6416_v9, %v4550_v20  ;;  %v4597_v57 = vsub.f32 1.0, %v4589_v14  ;;  %v4552_v62 = vmul.f32 %v8460_v10, %v4544_v28  ;;  %v4529_v18 = vmul.f32 %v8467_v58, %v4521_v31  ;;  %v6424_v10 = vpop.eup %6423 }
 0xa31   : > { %v4591_v36 = vmul.f32 %v6418_v52, %v4551_v4  ;;  %v4538_v30 = vadd.f32 0.2548296, %v4530_v63  ;;  %v6426_v20 = vpop.eup %6425  ;;  %v4434_v4 = vsel %vm4426_vm12, 1.0, %v6487_v50 }
 0xa32   : > { %v4598_v24 = vsub.f32 1.0, %v4590_v5  ;;  %v4605_v13 = vmul.f32 %v4597_v57, %v8436_v1  ;;  %v4592_v27 = vmul.f32 %v6420_v40, %v4552_v62  ;;  %v4537_v48 = vadd.f32 0.2548296, %v4529_v18  ;;  %v6428_v5 = vpop.eup %6427 }
 0xa33   : > { %v4599_v61 = vsub.f32 1.0, %v4591_v36  ;;  %v4515_v1 = vmul.f32 %v8489_v55, %v4507_v41  ;;  %v4546_v9 = vmul.f32 %v8473_v45, %v4538_v30  ;;  %v4433_v45 = vsel %vm4425_vm11, 1.0, %v6487_v50 }
 0xa34   : > { %v4606_v54 = vmul.f32 %v4598_v24, %v8454_v2  ;;  %v4613_v49 = vadd.f32 1.0, %v4605_v13  ;;  %v4600_v7 = vsub.f32 1.0, %v4592_v27  ;;  %v4545_v43 = vmul.f32 %v8467_v58, %v4537_v48  ;;  %v8782_v24 = vld [vmem:[#allocation11_spill] sm:$0xff] }
 0xa35   : > { %v4607_v17 = vmul.f32 %v4599_v61, %v8478_v21  ;;  %v4516_v2 = vmul.f32 %v8495_v8, %v4508_v23  ;;  %v4523_v6 = vadd.f32 -0.28449672, %v4515_v1  ;;  %v4586_v58 = vmul.f32 %v6424_v10, %v4546_v9  ;;  %v4934_v9 = vld [vmem:[%s8678_s7 + $0x40] sm:$0xff] }
 0xa36   : > { %v4614_v15 = vadd.f32 1.0, %v4606_v54  ;;  %v4621_v14 = vmul.f32 %v4613_v49, %v8425_v53  ;;  %v4608_v59 = vmul.f32 %v4600_v7, %v4440_v0  ;;  %v4585_v16 = vmul.f32 %v6422_v11, %v4545_v43 }
 0xa37   : > { %v4615_v51 = vadd.f32 1.0, %v4607_v17  ;;  %v4524_v19 = vadd.f32 -0.28449672, %v4516_v2  ;;  %v4531_v12 = vmul.f32 %v8489_v55, %v4523_v6  ;;  %v4594_v52 = vsub.f32 1.0, %v4586_v58  ;;  %v8785_v17 = vld [vmem:[#allocation10_spill] sm:$0xff] }
 0xa38   : > { %v4622_v56 = vmul.f32 %v4614_v15, %v8433_v47  ;;  %v4616_v21 = vadd.f32 1.0, %v4608_v59  ;;  %v4593_v28 = vsub.f32 1.0, %v4585_v16  ;;  %v4435_v41 = vsel %vm4427_vm13, 1.0, %v6487_v50  ;;  %v4938_v6 = vld [vmem:[%s8678_s7 + $0x60] sm:$0x1]  ;;  %v4935_v59 = vld [vmem:[%s8678_s7 + $0x48] sm:$0xff] }
 0xa39   : > { %v4532_v35 = vmul.f32 %v8495_v8, %v4524_v19  ;;  %v4539_v53 = vadd.f32 0.2548296, %v4531_v12  ;;  %v4623_v47 = vmul.f32 %v4615_v51, %v8439_v44  ;;  %v4602_v25 = vmul.f32 %v4594_v52, %v4434_v4  ;;  %v4933_v51 = vld [vmem:[%s8678_s7 + $0x38] sm:$0xff]  ;;  %v4932_v16 = vld [vmem:[%s8678_s7 + $0x30] sm:$0xff]  ;;  %v4931_v12 = vld [vmem:[%s8678_s7 + $0x28] sm:$0xff] }
 0xa3a   : > { %v4635_v57 = vcombine.low %v4621_v14, %v4622_v56  ;;  %v4624_v0 = vmul.f32 %v4616_v21, %v8446_v42  ;;  %v4601_v31 = vmul.f32 %v4593_v28, %v4433_v45  ;;  %v4412_v48 = vmul.f32 0.5, %v8422_v3  ;;  %v4939_v3 = vld [vmem:[%s8678_s7 + $0x68] sm:$0x1]  ;;  %v4936_v14 = vld [vmem:[%s8678_s7 + $0x50] sm:$0xff]  ;;  %v4653_v56 = vpop.permute.xlu1 %4652  ;;  %v4926_v45 = vld [vmem:[%s8678_s7] sm:$0xff] }
 0xa3b   : > { %v4540_v29 = vadd.f32 0.2548296, %v4532_v35  ;;  %v4547_v32 = vmul.f32 %v8489_v55, %v4539_v53  ;;  %v4610_v62 = vadd.f32 1.0, %v4602_v25  ;;  %v4928_v28 = vld [vmem:[%s8678_s7 + $0x10] sm:$0xff]  ;;  %v4657_v53 = vpop.permute.xlu0 %4656 }
 0xa3c   : > { %v4636_v40 = vcombine.low %v4623_v47, %v4624_v0  ;;  %v8529_v13 = vadd.f32 %v8782_v24, %v4635_v57  ;;  %v4609_v18 = vadd.f32 1.0, %v4601_v31  ;;  %v4929_v57 = vld [vmem:[%s8678_s7 + $0x18] sm:$0xff]  ;;  %v4927_v47 = vld [vmem:[%s8678_s7 + $0x8] sm:$0xff] }
 0xa3d   : > { %v4548_v44 = vmul.f32 %v8495_v8, %v4540_v29  ;;  %v4587_v42 = vmul.f32 %v6426_v20, %v4547_v32  ;;  %v4618_v8 = vmul.f32 %v4610_v62, %v4410_v46  ;;  %v4937_v20 = vld [vmem:[%s8678_s7 + $0x58] sm:$0xff] }
 0xa3e   : > { %v8535_v36 = vadd.f32 %v8783_v22, %v4636_v40  ;;  %v4617_v27 = vmul.f32 %v4609_v18, %v4409_v33  ;;  %v4661_v58 = vpop.permute.xlu1 %4660 }
 0xa3f   : > { %v4588_v55 = vmul.f32 %v6428_v5, %v4548_v44  ;;  %v4595_v37 = vsub.f32 1.0, %v4587_v42  ;;  %v4930_v5 = vld [vmem:[%s8678_s7 + $0x20] sm:$0xff] }
 0xa40   : > { %v4650_v11 = vpack.c.bf16 %v8535_v36, %v8529_v13  ;;  %v4633_v1 = vcombine.low %v4617_v27, %v4618_v8 }
 0xa41   : > { %v4596_v54 = vsub.f32 1.0, %v4588_v55  ;;  %v4603_v49 = vmul.f32 %v4595_v37, %v4435_v41 }
 0xa42   : > { %5920 = vmatprep.subr.bf16.mxu0 %v4650_v11  ;;  %v8546_v30 = vadd.f32 %v8784_v39, %v4633_v1  ;;  %v4665_v29 = vpop.permute.xlu1 %4664 }
 0xa43   : > { %v4604_v63 = vmul.f32 %v4596_v54, %v4436_v34  ;;  %v4611_v61 = vadd.f32 1.0, %v4603_v49  ;;  %5921 = vmatpush3.bf16.msra.mxu0 %v4650_v11 }
 0xa45   : > { %v4612_v23 = vadd.f32 1.0, %v4604_v63  ;;  %v4619_v10 = vmul.f32 %v4611_v61, %v4411_v26 }
 0xa47   : > { %v4620_v15 = vmul.f32 %v4612_v23, %v4412_v48 }
 0xa49   : > { %v4634_v7 = vcombine.low %v4619_v10, %v4620_v15 }
 0xa4b   : > { %v8549_v43 = vadd.f32 %v8785_v17, %v4634_v7 }
 0xa4d   : > { %v4649_v2 = vpack.c.bf16 %v8549_v43, %v8546_v30 }
 0xa4f   : > { %5922 = vmatprep.subr.bf16.mxu0 %v4649_v2 }
 0xa50   : > { %5923 = vmatpush3.bf16.msra.mxu0 %v4649_v2 }
 0xa51   : > { %5368 = vmatprep.subr.msk.mxu0 %vm4952_vm6, %v4939_v3 }
 0xa53   : > { %5925 = vmatmul.mubr.msk.bf16.vlgmr.msra.gmra.mxu0 %vm725_vm8, %v6162_v60 }
 0xa54   : > { %5023 = vmatprep.mubr.f32.mxu0 %v8768_v38  ;;  %5369 = vmatpush1.msk.msra.mxu0 %vm4952_vm6, %v4938_v6  ;;  %v4796_v6 = vpop.permute.xlu1 %4795 }
 0xa55   : > { %4979 = vmatprep.subr.mxu0 %v4937_v20 }
 0xa56   : > { %4980 = vmatpush1.msra.mxu0 %v4936_v14 }
 0xa57   : > { %4981 = vmatprep.subr.mxu0 %v4935_v59 }
 0xa58   : > { %4982 = vmatpush1.msra.mxu0 %v4934_v9  ;;  %v4780_v9 = vpop.permute.xlu1 %4779 }
 0xa59   : > { %4983 = vmatprep.subr.mxu0 %v4933_v51  ;;  %v4776_v51 = vpop.permute.xlu0 %4775 }
 0xa5a   : > { %4984 = vmatpush1.msra.mxu0 %v4932_v16 }
 0xa5b   : > { %4985 = vmatprep.subr.mxu0 %v4931_v12 }
 0xa5c   : > { %4986 = vmatpush1.msra.mxu0 %v4930_v5  ;;  %v4784_v16 = vpop.permute.xlu1 %4783 }
 0xa5d   : > { %4987 = vmatprep.subr.mxu0 %v4929_v57 }
 0xa5e   : > { %4988 = vmatpush1.msra.mxu0 %v4928_v28 }
 0xa5f   : > { %4989 = vmatprep.subr.mxu0 %v4927_v47 }
 0xa60   : > { %4990 = vmatpush1.msra.mxu0 %v4926_v45 }
 0xa61   : > { %v4804_v12 = vpop.permute.xlu1 %4803 }
 0xb13   : > { %v5926_v19 = vpop.f32.mrf.mxu0 }
 0xb14   : > { %v4726_v4 = vadd.f32 %v5926_v19, %v4661_v58  ;;  %v4800_v19 = vpop.permute.xlu0 %4799 }
 0xb15   : > { %v4717_v21 = vpop.f32.mrf.mxu0 }
 0xb16   : > { %v4718_v0 = vadd.f32 %v4717_v21, %v4653_v56  ;;  %v4735_v44 = vsel %vm2786_vm2, %v4726_v4, 0.0 }
 0xb17   : > { %v5927_v35 = vpop.f32.mrf.mxu0 }
 0xb18   : > { %v4732_v32 = vsel %vm2786_vm2, %v4718_v0, 0.0  ;;  %v4729_v40 = vadd.f32 %v5927_v35, %v4665_v29  ;;  %v4788_v21 = vpop.permute.xlu0 %4787 }
 0xb19   : > { %v4720_v52 = vpop.f32.mrf.mxu0 }
 0xb1a   : > { %v4721_v31 = vadd.f32 %v4720_v52, %v4657_v53  ;;  %v4737_v46 = vsel %vm2786_vm2, %v4729_v40, 0.0  ;;  %v4808_v52 = vpop.permute.xlu1 %4807 }
 0xb1c   : > { %v4733_v25 = vsel %vm2786_vm2, %v4721_v31, 0.0 }
 0xb1d   : > { %v4734_v24 = vadd.f32 %v4733_v25, %v4732_v32 }
 0xb1f   : > { %v4736_v42 = vadd.f32 %v4735_v44, %v4734_v24 }
 0xb21   : > { %v4738_v62 = vadd.f32 %v4737_v46, %v4736_v42 }
 0xb23   : > { %v4739_v22 = vrot.slane %v4738_v62, 4 }
 0xb25   : > { %v4740_v18 = vadd.f32 %v4739_v22, %v4738_v62 }
 0xb27   : > { %v4741_v55 = vrot.slane %v4740_v18, 2 }
 0xb29   : > { %v4742_v37 = vadd.f32 %v4741_v55, %v4740_v18 }
 0xb2b   : > { %v4743_v41 = vrot.slane %v4742_v37, 1 }
 0xb2d   : > { %v4744_v11 = vadd.f32 %v4743_v41, %v4742_v37 }
 0xb2f   : > { %v4745_v33 = vmul.f32 0.03125, %v4744_v11 }
 0xb31   : > { %v4748_v8 = vsub.f32 %v4726_v4, %v4745_v33  ;;  %v4749_v54 = vsub.f32 %v4729_v40, %v4745_v33  ;;  %v4746_v49 = vsub.f32 %v4718_v0, %v4745_v33  ;;  %v4747_v34 = vsub.f32 %v4721_v31, %v4745_v33 }
 0xb33   : > { %v4750_v27 = vmul.f32 %v4746_v49, %v4746_v49  ;;  %v4751_v63 = vmul.f32 %v4747_v34, %v4747_v34  ;;  %v4752_v61 = vmul.f32 %v4748_v8, %v4748_v8  ;;  %v4753_v26 = vmul.f32 %v4749_v54, %v4749_v54 }
 0xb35   : > { %v4754_v48 = vsel %vm2786_vm2, %v4750_v27, 0.0  ;;  %v4755_v23 = vsel %vm2786_vm2, %v4751_v63, 0.0  ;;  %v4757_v10 = vsel %vm2786_vm2, %v4752_v61, 0.0  ;;  %v4759_v7 = vsel %vm2786_vm2, %v4753_v26, 0.0 }
 0xb36   : > { %v4756_v1 = vadd.f32 %v4755_v23, %v4754_v48 }
 0xb38   : > { %v4758_v15 = vadd.f32 %v4757_v10, %v4756_v1 }
 0xb3a   : > { %v4760_v39 = vadd.f32 %v4759_v7, %v4758_v15 }
 0xb3c   : > { %v4761_v17 = vrot.slane %v4760_v39, 4 }
 0xb3e   : > { %v4762_v2 = vadd.f32 %v4761_v17, %v4760_v39 }
 0xb40   : > { %v4763_v60 = vrot.slane %v4762_v2, 2 }
 0xb42   : > { %v4764_v3 = vadd.f32 %v4763_v60, %v4762_v2 }
 0xb44   : > { %v4765_v20 = vrot.slane %v4764_v3, 1 }
 0xb46   : > { %v4766_v14 = vadd.f32 %v4765_v20, %v4764_v3 }
 0xb48   : > { %v4767_v56 = vmul.f32 0.03125, %v4766_v14 }
 0xb4a   : > { %v4768_v59 = vadd.f32 1e-05, %v4767_v56 }
 0xb4c   : > { %6429 = vrsqrt.f32 %v4768_v59 }
 0xb59   : > { %v6430_v5 = vpop.eup %6429 }
 0xb5a   : > { %v4771_v58 = vmul.f32 %v6430_v5, %v4747_v34  ;;  %v4770_v57 = vmul.f32 %v6430_v5, %v4746_v49  ;;  %v4772_v28 = vmul.f32 %v6430_v5, %v4748_v8  ;;  %v4773_v35 = vmul.f32 %v6430_v5, %v4749_v54 }
 0xb5c   : > { %v4791_v53 = vmul.f32 %v4780_v9, %v4771_v58  ;;  %v4790_v47 = vmul.f32 %v4776_v51, %v4770_v57  ;;  %v4792_v0 = vmul.f32 %v4784_v16, %v4772_v28  ;;  %v4793_v45 = vmul.f32 %v4788_v21, %v4773_v35 }
 0xb5e   : > { %v8608_v4 = vadd.f32 %v4796_v6, %v4790_v47  ;;  %v8610_v31 = vadd.f32 %v4800_v19, %v4791_v53  ;;  %v8612_v29 = vadd.f32 %v4804_v12, %v4792_v0  ;;  %v8614_v32 = vadd.f32 %v4808_v52, %v4793_v45 }
 0xb60   : > { %v8617_v25 = vmul.f32 0.70710677, %v8608_v4  ;;  %v8620_v40 = vmul.f32 0.70710677, %v8610_v31  ;;  %v8623_v24 = vmul.f32 0.70710677, %v8612_v29 }
 0xb61   : > { %v8629_v62 = vmul.f32 0.70710677, %v8614_v32 }
 0xb62   : > { %v4830_v44 = vand.u32 2147483647, %v8617_v25  ;;  %v4831_v42 = vand.u32 2147483647, %v8620_v40  ;;  %v4832_v46 = vand.u32 2147483647, %v8623_v24 }
 0xb63   : > { %v4833_v11 = vand.u32 2147483647, %v8629_v62  ;;  %vm4822_vm8 = vcmp.ge.f32.partialorder %v8617_v25, 0.0  ;;  %vm4823_vm9 = vcmp.ge.f32.partialorder %v8620_v40, 0.0  ;;  %vm4824_vm14 = vcmp.ge.f32.partialorder %v8623_v24, 0.0 }
 0xb64   : > { %v4834_v22 = vmul.f32 0.3275911, %v4830_v44  ;;  %v4835_v18 = vmul.f32 0.3275911, %v4831_v42  ;;  %v4836_v55 = vmul.f32 0.3275911, %v4832_v46 }
 0xb65   : > { %v4837_v8 = vmul.f32 0.3275911, %v4833_v11  ;;  %v4886_v49 = vsub.f32 0.0, %v4830_v44  ;;  %v4887_v34 = vsub.f32 0.0, %v4831_v42  ;;  %v4888_v63 = vsub.f32 0.0, %v4832_v46 }
 0xb66   : > { %v4838_v37 = vadd.f32 1.0, %v4834_v22  ;;  %v4839_v41 = vadd.f32 1.0, %v4835_v18  ;;  %v4840_v33 = vadd.f32 1.0, %v4836_v55  ;;  %v4889_v26 = vsub.f32 0.0, %v4833_v11 }
 0xb67   : > { %v4841_v54 = vadd.f32 1.0, %v4837_v8  ;;  %v4890_v27 = vmul.f32 %v4886_v49, %v4830_v44  ;;  %v4891_v61 = vmul.f32 %v4887_v34, %v4831_v42  ;;  %v4892_v15 = vmul.f32 %v4888_v63, %v4832_v46 }
 0xb68   : > { %6431 = vrcp.f32 %v4838_v37  ;;  %v4893_v17 = vmul.f32 %v4889_v26, %v4833_v11  ;;  %v4814_v40 = vmul.f32 0.5, %v8608_v4  ;;  %vm4825_vm15 = vcmp.ge.f32.partialorder %v8629_v62, 0.0 }
 0xb69   : > { %6433 = vrcp.f32 %v4839_v41  ;;  %v4894_v10 = vmul.f32 1.442695, %v4890_v27  ;;  %v4896_v39 = vmul.f32 1.442695, %v4891_v61  ;;  %v4898_v14 = vmul.f32 1.442695, %v4892_v15 }
 0xb6a   : > { %6435 = vrcp.f32 %v4840_v33  ;;  %v4900_v9 = vmul.f32 1.442695, %v4893_v17  ;;  %v4829_v24 = vsel %vm4825_vm15, 1.0, %v6487_v50 }
 0xb6b   : > { %6437 = vrcp.f32 %v4841_v54 }
 0xb6c   : > { %6439 = vpow2.f32 %v4894_v10  ;;  %v4826_v10 = vsel %vm4822_vm8, 1.0, %v6487_v50 }
 0xb6d   : > { %6441 = vpow2.f32 %v4896_v39 }
 0xb6e   : > { %6443 = vpow2.f32 %v4898_v14 }
 0xb6f   : > { %6445 = vpow2.f32 %v4900_v9 }
 0xb75   : > { %v6432_v48 = vpop.eup %6431 }
 0xb76   : > { %v6434_v23 = vpop.eup %6433  ;;  %v4850_v1 = vmul.f32 1.0614054, %v6432_v48 }
 0xb77   : > { %v4851_v7 = vmul.f32 1.0614054, %v6434_v23  ;;  %v6436_v60 = vpop.eup %6435 }
 0xb78   : > { %v4854_v2 = vadd.f32 -1.4531521, %v4850_v1  ;;  %v4852_v20 = vmul.f32 1.0614054, %v6436_v60  ;;  %v6438_v56 = vpop.eup %6437 }
 0xb79   : > { %v4855_v3 = vadd.f32 -1.4531521, %v4851_v7  ;;  %v4853_v19 = vmul.f32 1.0614054, %v6438_v56  ;;  %v6440_v11 = vpop.eup %6439 }
 0xb7a   : > { %v4858_v6 = vmul.f32 %v6432_v48, %v4854_v2  ;;  %v4856_v16 = vadd.f32 -1.4531521, %v4852_v20  ;;  %v6442_v8 = vpop.eup %6441  ;;  %v4828_v20 = vsel %vm4824_vm14, 1.0, %v6487_v50 }
 0xb7b   : > { %v4859_v59 = vmul.f32 %v6434_v23, %v4855_v3  ;;  %v4857_v58 = vadd.f32 -1.4531521, %v4853_v19  ;;  %v6444_v1 = vpop.eup %6443 }
 0xb7c   : > { %v4862_v51 = vadd.f32 1.4214138, %v4858_v6  ;;  %v4860_v21 = vmul.f32 %v6436_v60, %v4856_v16  ;;  %v6446_v39 = vpop.eup %6445 }
 0xb7d   : > { %v4863_v12 = vadd.f32 1.4214138, %v4859_v59  ;;  %v4861_v53 = vmul.f32 %v6438_v56, %v4857_v58  ;;  %v4815_v59 = vmul.f32 0.5, %v8610_v31 }
 0xb7e   : > { %v4866_v5 = vmul.f32 %v6432_v48, %v4862_v51  ;;  %v4864_v35 = vadd.f32 1.4214138, %v4860_v21  ;;  %v4817_v21 = vmul.f32 0.5, %v8614_v32  ;;  %v8786_v32 = vld [vmem:[#allocation2_spill] sm:$0xff] }
 0xb7f   : > { %v4867_v57 = vmul.f32 %v6434_v23, %v4863_v12  ;;  %v4865_v52 = vadd.f32 1.4214138, %v4861_v53  ;;  %v4816_v12 = vmul.f32 0.5, %v8612_v29  ;;  %v8788_v53 = vld [vmem:[#allocation5_spill] sm:$0xff] }
 0xb80   : > { %v4870_v28 = vadd.f32 -0.28449672, %v4866_v5  ;;  %v4868_v45 = vmul.f32 %v6436_v60, %v4864_v35 }
 0xb81   : > { %v4871_v47 = vadd.f32 -0.28449672, %v4867_v57  ;;  %v4869_v22 = vmul.f32 %v6438_v56, %v4865_v52  ;;  %v8790_v52 = vld [vmem:[#allocation7_spill] sm:$0xff] }
 0xb82   : > { %v4874_v0 = vmul.f32 %v6432_v48, %v4870_v28  ;;  %v4872_v46 = vadd.f32 -0.28449672, %v4868_v45 }
 0xb83   : > { %v4875_v44 = vmul.f32 %v6434_v23, %v4871_v47  ;;  %v4873_v41 = vadd.f32 -0.28449672, %v4869_v22 }
 0xb84   : > { %v4878_v42 = vadd.f32 0.2548296, %v4874_v0  ;;  %v4876_v37 = vmul.f32 %v6436_v60, %v4872_v46  ;;  %v8791_v46 = vld [vmem:[#allocation6_spill] sm:$0xff] }
 0xb85   : > { %v4879_v18 = vadd.f32 0.2548296, %v4875_v44  ;;  %v4877_v34 = vmul.f32 %v6438_v56, %v4873_v41 }
 0xb86   : > { %v4882_v55 = vmul.f32 %v6432_v48, %v4878_v42  ;;  %v4880_v49 = vadd.f32 0.2548296, %v4876_v37  ;;  %v4827_v48 = vsel %vm4823_vm9, 1.0, %v6487_v50 }
 0xb87   : > { %v4883_v33 = vmul.f32 %v6434_v23, %v4879_v18  ;;  %v4881_v26 = vadd.f32 0.2548296, %v4877_v34 }
 0xb88   : > { %v4902_v54 = vmul.f32 %v6440_v11, %v4882_v55  ;;  %v4884_v61 = vmul.f32 %v6436_v60, %v4880_v49  ;;  %v8792_v55 = vld [vmem:[#allocation9_spill] sm:$0xff]  ;;  %v8793_v11 = vld [vmem:[#allocation8_spill] sm:$0xff] }
 0xb89   : > { %v4903_v27 = vmul.f32 %v6442_v8, %v4883_v33  ;;  %v4885_v23 = vmul.f32 %v6438_v56, %v4881_v26 }
 0xb8a   : > { %v4906_v63 = vsub.f32 1.0, %v4902_v54  ;;  %v4904_v25 = vmul.f32 %v6444_v1, %v4884_v61 }
 0xb8b   : > { %v4907_v15 = vsub.f32 1.0, %v4903_v27  ;;  %v4905_v60 = vmul.f32 %v6446_v39, %v4885_v23 }
 0xb8c   : > { %v4910_v7 = vmul.f32 %v4906_v63, %v4826_v10  ;;  %v4908_v3 = vsub.f32 1.0, %v4904_v25 }
 0xb8d   : > { %v4911_v17 = vmul.f32 %v4907_v15, %v4827_v48  ;;  %v4909_v51 = vsub.f32 1.0, %v4905_v60 }
 0xb8e   : > { %v4914_v2 = vadd.f32 1.0, %v4910_v7  ;;  %v4912_v9 = vmul.f32 %v4908_v3, %v4828_v20 }
 0xb8f   : > { %v4915_v6 = vadd.f32 1.0, %v4911_v17  ;;  %v4913_v19 = vmul.f32 %v4909_v51, %v4829_v24 }
 0xb90   : > { %v4918_v14 = vmul.f32 %v4914_v2, %v4814_v40  ;;  %v4916_v4 = vadd.f32 1.0, %v4912_v9 }
 0xb91   : > { %v4919_v16 = vmul.f32 %v4915_v6, %v4815_v59  ;;  %v4917_v31 = vadd.f32 1.0, %v4913_v19 }
 0xb92   : > { %v4922_v56 = vadd.f32 %v4918_v14, %v8546_v30  ;;  %v4920_v5 = vmul.f32 %v4916_v4, %v4816_v12 }
 0xb93   : > { %v4923_v62 = vadd.f32 %v4919_v16, %v8549_v43  ;;  %v4921_v30 = vmul.f32 %v4917_v31, %v4817_v21 }
 0xb94   : > { %5370 = vmatmul.mubr.msk.f32.vlgmr.msra.gmra.mxu0 %vm2786_vm2, %v4922_v56  ;;  %v4924_v50 = vadd.f32 %v4920_v5, %v8529_v13  ;;  %v8787_v13 = vld [vmem:[#allocation3_spill] sm:$0xff] }
 0xb95   : > { %5029 = vmatprep.mubr.f32.mxu0 %v8768_v38  ;;  %v4925_v29 = vadd.f32 %v4921_v30, %v8535_v36  ;;  %v8789_v36 = vld [vmem:[#allocation4_spill] sm:$0xff] }
 0xb98   : > { %5371 = vmatmul.mubr.msk.f32.gmra.mxu0 %vm2786_vm2, %v4923_v62 }
 0xb99   : > { %5035 = vmatprep.mubr.f32.mxu0 %v8768_v38 }
 0xb9c   : > { %5372 = vmatmul.mubr.msk.f32.gmra.mxu0 %vm2786_vm2, %v4924_v50 }
 0xb9d   : > { %5041 = vmatprep.mubr.f32.mxu0 %v8768_v38 }
 0xba0   : > { %5373 = vmatmul.mubr.msk.f32.gmra.mxu0 %vm2786_vm2, %v4925_v29 }
 0xc54   : > { %v5025_v43 = vpop.f32.mrf.mxu0 }
 0xc55   : > { %v5048_v58 = vadd.f32 %v5025_v43, %v8786_v32 }
 0xc56   : > { %v5027_v57 = vpop.f32.mrf.mxu0 }
 0xc57   : > { %5056 = vst [vmem:[%s332_s14] sm:$0xff] %v5048_v58  ;;  %v5049_v28 = vadd.f32 %v5027_v57, %v8787_v13 }
 0xc58   : > { %v5031_v35 = vpop.f32.mrf.mxu0 }
 0xc59   : > { %5057 = vst [vmem:[%s332_s14 + $0x8] sm:$0xff] %v5049_v28  ;;  %v5050_v38 = vadd.f32 %v5031_v35, %v8788_v53 }
 0xc5a   : > { %v5033_v47 = vpop.f32.mrf.mxu0 }
 0xc5b   : > { %5058 = vst [vmem:[%s332_s14 + $0x10] sm:$0xff] %v5050_v38  ;;  %v5051_v0 = vadd.f32 %v5033_v47, %v8789_v36 }
 0xc5c   : > { %v5037_v45 = vpop.f32.mrf.mxu0 }
 0xc5d   : > { %5059 = vst [vmem:[%s332_s14 + $0x18] sm:$0xff] %v5051_v0  ;;  %v5052_v44 = vadd.f32 %v5037_v45, %v8790_v52 }
 0xc5e   : > { %v5039_v42 = vpop.f32.mrf.mxu0 }
 0xc5f   : > { %5060 = vst [vmem:[%s332_s14 + $0x20] sm:$0xff] %v5052_v44  ;;  %v5053_v22 = vadd.f32 %v5039_v42, %v8791_v46 }
 0xc60   : > { %v5043_v18 = vpop.f32.mrf.mxu0 }
 0xc61   : > { %5061 = vst [vmem:[%s332_s14 + $0x28] sm:$0xff] %v5053_v22  ;;  %v5054_v37 = vadd.f32 %v5043_v18, %v8792_v55 }
 0xc62   : > { %v5045_v41 = vpop.f32.mrf.mxu0 }
 0xc63   : > { %5062 = vst [vmem:[%s332_s14 + $0x30] sm:$0xff] %v5054_v37  ;;  %v5055_v33 = vadd.f32 %v5045_v41, %v8793_v11 }
 0xc65   : > { %5063 = vst [vmem:[%s332_s14 + $0x38] sm:$0xff] %v5055_v33 }
 0xc66 PF: > { %s19_s30 = sadd.s32 1, %s6465_s30  }
 0xc67   : > { %p16_p4 = scmp.ge.s32.totalorder %s19_s30, 4  }
 0xc69   :  { %18 = sbr.rel (!%p16_p4) target bundleno = 1 (0x1), region = 86 }

</bundles_post_ra>
